<compile_context>
chip_gen: v7x
topology: tpu7x:2x2x1
jax: 0.10.0
libtpu: 0.0.40
codegen_flags: <defaults>
</compile_context>

<pallas_src>
import functools

import jax
import jax.numpy as jnp
from jax.experimental import pallas as pl
from jax.experimental.pallas import tpu as pltpu


# ----------------------------------------------------------------------------
# Fused encoder kernel
# ----------------------------------------------------------------------------
def _encoder_kernel(cols1_ref, aux_ref,
                    w1_ref, b1_ref, w2_ref, b2_ref, w3_ref, b3_ref, wfa_ref,
                    out_ref,
                    a1_ref, acc2_ref, *, bblk):
    B = bblk
    f32 = jnp.float32

    # Zero the padded conv2-input parity planes.  Done every step (not gated
    # on program_id==0) so the kernel stays correct when the "parallel" batch
    # axis is split across TensorCores (v7x) -- each step is self-contained.
    a1_ref[...] = jnp.zeros_like(a1_ref)

    # ---- conv1: 3x3, stride 2, pad 1, 1 -> 8.  ONE (196B,9)x(9,8) matmul ----
    # cols1 rows are ordered (rr, rc, qr, qc, b) where the conv1 output
    # position is (oh, ow) = (2*qr + rr, 2*qc + rc).
    o1 = jnp.dot(cols1_ref[0], w1_ref[...], preferred_element_type=f32)
    o1 = jnp.maximum(o1 + b1_ref[...], 0.0).astype(a1_ref.dtype)   # (196B, 8)

    # Scatter into the zero-padded parity planes of conv2's 16x16 input:
    # conv1 output (oh, ow) -> plane (1-rr, 1-rc), row ((qr+rr)*8 + qc+rc)*B+b.
    # 28 contiguous (7B, 8) stores.
    for rr in range(2):
        for rc in range(2):
            base = (rr * 2 + rc) * 49 * B
            pi_r, pi_c = 1 - rr, 1 - rc
            for qr in range(7):
                dst = ((qr + rr) * 8 + rc) * B
                a1_ref[pi_r, pi_c, pl.ds(dst, 7 * B), :] = (
                    o1[base + qr * 7 * B: base + (qr + 1) * 7 * B, :])

    # ---- conv2: 3x3, stride 2, pad 1, 8 -> 16.  9 taps, ONE add per tap -----
    # acc2 rows are ordered (g, b) with g = oh*8 + ow (ow stride 8, 55 groups
    # kept, i.e. g <= 54).  The ow==7 "junk" groups hold finite garbage and
    # are killed later by the zero rows pre-padded into w3.
    for i in range(3):
        for j in range(3):
            pi_r, pi_c = i % 2, j % 2
            start = ((i // 2) * 8 + (j // 2)) * B
            slab = a1_ref[pi_r, pi_c, pl.ds(start, 55 * B), :]     # (55B, 8)
            contrib = jnp.dot(slab, w2_ref[i * 3 + j],
                              preferred_element_type=f32)          # (55B, 16)
            if i == 0 and j == 0:
                acc2_ref[...] = contrib      # first tap assigns: no zero-init
            else:
                acc2_ref[...] += contrib

    a2 = jnp.maximum(acc2_ref[...] + b2_ref[...], 0.0)             # (55B, 16)

    # ---- conv3: 7x7, stride 1, no pad, 16 -> 64  ==  ONE (B,880)x(880,64) ---
    # Regroup a2 from (g, b)-major rows to batch-major rows via 55 static
    # lane-concats, then a single deep-K MXU matmul (w3 already has zero rows
    # at the ow==7 positions).
    a2_bm = jnp.concatenate(
        [a2[g * B:(g + 1) * B, :] for g in range(55)], axis=1)     # (B, 880)
    conv_out = jnp.maximum(
        jnp.dot(a2_bm.astype(jnp.bfloat16), w3_ref[...],
                preferred_element_type=f32) + b3_ref[...], 0.0)    # (B, 64)

    # ---- fc (74 -> 4): one-hot(y) part pre-gathered host-side into aux ------
    aux = aux_ref[0]                                               # (B, 6)
    fc_out = (jnp.dot(conv_out, wfa_ref[...], preferred_element_type=f32)
              + aux[:, 0:4])                                       # (B, 4)

    # ---- reparameterization; single (B, 10) output store ---------------------
    mean = fc_out[:, 0:2]
    logvar = fc_out[:, 2:4]
    std = jnp.exp(0.5 * logvar)
    var = std * std                      # == exp(logvar); one EUP exp total
    z = mean + std * aux[:, 4:6]
    out_ref[0, :, :] = jnp.concatenate([z, fc_out, std, var], axis=1)


# ----------------------------------------------------------------------------
# Parameters: PyTorch-shaped init, then one-time re-layout to kernel layouts
# ----------------------------------------------------------------------------
def init_params(key):
    ks = jax.random.split(key, 8)

    def norm(k, shape, scale=0.1):
        return jax.random.normal(k, shape, jnp.float32) * scale

    return {
        "conv1_w": norm(ks[0], (8, 1, 3, 3)),
        "conv1_b": norm(ks[1], (8,)),
        "conv2_w": norm(ks[2], (16, 8, 3, 3)),
        "conv2_b": norm(ks[3], (16,)),
        "conv3_w": norm(ks[4], (64, 16, 7, 7)),
        "conv3_b": norm(ks[5], (64,)),
        "fc_w":    norm(ks[6], (4, 74)),   # nn.Linear(74, 4) weight (out, in)
        "fc_b":    norm(ks[7], (4,)),
    }


def prepare_params(raw):
    """One-time weight re-layout (done at init, not per forward call)."""
    p = {}
    p["w1"] = raw["conv1_w"].reshape(8, 9).T.astype(jnp.bfloat16)            # (9, 8)
    p["b1"] = raw["conv1_b"].reshape(1, 8)
    p["w2"] = (raw["conv2_w"].transpose(2, 3, 1, 0)                          # (9, 8, 16)
               .reshape(9, 8, 16).astype(jnp.bfloat16))
    p["b2"] = raw["conv2_b"].reshape(1, 16)
    # conv3: (64,16,7,7) -> (oh, ow, c, out), pad ow to 8 with zero rows, keep
    # the first 55 (oh*8+ow) groups -> (880, 64).  The zero rows absorb the
    # ow==7 junk groups produced by conv2's strided accumulator layout.
    w3 = raw["conv3_w"].transpose(2, 3, 1, 0)                                # (7,7,16,64)
    w3 = jnp.pad(w3, ((0, 0), (0, 1), (0, 0), (0, 0)))                       # (7,8,16,64)
    p["w3"] = w3.reshape(896, 64)[:880].astype(jnp.bfloat16)                 # (880, 64)
    p["b3"] = raw["conv3_b"].reshape(1, 64)
    p["wfa"] = raw["fc_w"][:, :64].T                                         # (64, 4)
    p["wfb"] = raw["fc_w"][:, 64:].T                                         # (10, 4)
    p["bfc"] = raw["fc_b"].reshape(1, 4)
    return p


# ----------------------------------------------------------------------------
# Wrapper
# ----------------------------------------------------------------------------
def _build_conv1_cols(x, nb, bblk):
    """x: (B,1,28,28) -> (nb, 196*bblk, 9) bf16 conv1 patch rows, ordered
    (rr, rc, qr, qc, b) so the kernel can issue ONE conv1 matmul and scatter
    contiguous slices into the conv2 parity planes.  This is the only patch
    gather done in XLA (it reads the HBM input the kernel needs anyway)."""
    xp = jnp.pad(x[:, 0], ((0, 0), (1, 1), (1, 1)))               # (B, 30, 30)
    taps = [xp[:, i:i + 28:2, j:j + 28:2]                          # (B, 14, 14)
            for i in range(3) for j in range(3)]
    t = jnp.stack(taps, axis=-1)                                   # (B,14,14,9)
    t = t.reshape(nb, bblk, 7, 2, 7, 2, 9)                         # (nb,b,qr,rr,qc,rc,9)
    t = t.transpose(0, 3, 5, 2, 4, 1, 6)                           # (nb,rr,rc,qr,qc,b,9)
    return t.reshape(nb, 4 * 49 * bblk, 9).astype(jnp.bfloat16)


def encoder_forward(params, x, y, noise_key, *, block_b=256):
    """x: (B,1,28,28) f32 NCHW, y: (B,) int32 labels in [0,10).

    block_b is the batch block per grid step (primary tuning knob).  Per-step
    VMEM is ~25 KB/sample, so bblk up to ~1K fits the default scoped VMEM on
    every generation; on v7x pick bblk = B/2 so both TensorCores get work."""
    B = x.shape[0]
    bblk = min(B, block_b)
    while B % bblk:                 # largest divisor of B that is <= block_b
        bblk -= 1
    nb = B // bblk

    cols1 = _build_conv1_cols(x, nb, bblk)
    # one-hot(y) @ wfb + fc bias gathered host-side; packed with eps into one
    # tiny aux input (one DMA descriptor, no in-kernel one-hot matmul).
    # TODO(synk): eps could be drawn in-kernel (pltpu.prng_seed +
    # prng_random_bits); kept host-side for deterministic jax.random semantics.
    fc_y = params["wfb"][y] + params["bfc"]                        # (B, 4)
    eps = jax.random.normal(noise_key, (B, 2), jnp.float32)
    aux = jnp.concatenate([fc_y, eps], axis=1).reshape(nb, bblk, 6)

    kernel = functools.partial(_encoder_kernel, bblk=bblk)
    # bf16 parity planes need even batch blocks (packed sublane pairs); fall
    # back to f32 planes for odd bblk.
    a1_dtype = jnp.bfloat16 if bblk % 2 == 0 else jnp.float32

    def full(shape):
        return pl.BlockSpec(shape, lambda i, _n=len(shape): (0,) * _n)

    grid_spec = pltpu.PrefetchScalarGridSpec(
        num_scalar_prefetch=0,
        grid=(nb,),
        in_specs=[
            pl.BlockSpec((1, 196 * bblk, 9), lambda i: (i, 0, 0)),  # cols1
            pl.BlockSpec((1, bblk, 6), lambda i: (i, 0, 0)),        # aux (fc_y|eps)
            full((9, 8)), full((1, 8)),                             # conv1 w, b
            full((9, 8, 16)), full((1, 16)),                        # conv2 w, b
            full((880, 64)), full((1, 64)),                         # conv3 w, b
            full((64, 4)),                                          # fc (conv part)
        ],
        out_specs=pl.BlockSpec((1, bblk, 10), lambda i: (i, 0, 0)),
        scratch_shapes=[
            pltpu.VMEM((2, 2, 64 * bblk, 8), a1_dtype),    # conv2-input parity planes
            pltpu.VMEM((55 * bblk, 16), jnp.float32),      # conv2 accumulator (8-stride ow)
        ],
    )

    out = pl.pallas_call(
        kernel,
        out_shape=jax.ShapeDtypeStruct((nb, bblk, 10), jnp.float32),
        grid_spec=grid_spec,
        compiler_params=pltpu.CompilerParams(
            dimension_semantics=("parallel",)),        # batch blocks -> v7x cores
    )(cols1, aux,
      params["w1"], params["b1"], params["w2"], params["b2"],
      params["w3"], params["b3"], params["wfa"])

    out = out.reshape(B, 10)
    z = out[:, 0:2]
    posteri = {"mean": out[:, 2:4], "logvar": out[:, 4:6],
               "std": out[:, 6:8], "var": out[:, 8:10]}
    return z, posteri


# ----------------------------------------------------------------------------
if __name__ == "__main__":
    key = jax.random.PRNGKey(0)
    pkey, xkey, ykey, ekey = jax.random.split(key, 4)

    params = prepare_params(init_params(pkey))

    B = 2
    # Spatial size 28 is implied by the architecture: 28 -> 14 -> 7 -> 1.
    x = jax.random.normal(xkey, (B, 1, 28, 28), jnp.float32)
    y = jax.random.randint(ykey, (B,), 0, 10)

    fwd = jax.jit(encoder_forward)
    z, posteri = fwd(params, x, y, ekey)
    jax.block_until_ready(z)
    jax.block_until_ready(posteri["std"])

    assert z.shape == (B, 2)
    assert posteri["mean"].shape == (B, 2)
    assert posteri["logvar"].shape == (B, 2)
    assert posteri["std"].shape == (B, 2)
    assert posteri["var"].shape == (B, 2)
    print("KERNEL_OK")
</pallas_src>

<mosaic_0001>
module attributes {stable_mosaic.version = 11 : i64} {
  func.func @_encoder_kernel(%arg0: i32, %arg1: memref<1x392x9xbf16, #tpu.memory_space<vmem>>, %arg2: memref<1x2x6xf32, #tpu.memory_space<vmem>>, %arg3: memref<9x8xbf16, #tpu.memory_space<vmem>>, %arg4: memref<1x8xf32, #tpu.memory_space<vmem>>, %arg5: memref<9x8x16xbf16, #tpu.memory_space<vmem>>, %arg6: memref<1x16xf32, #tpu.memory_space<vmem>>, %arg7: memref<880x64xbf16, #tpu.memory_space<vmem>>, %arg8: memref<1x64xf32, #tpu.memory_space<vmem>>, %arg9: memref<64x4xf32, #tpu.memory_space<vmem>>, %arg10: memref<1x2x10xf32, #tpu.memory_space<vmem>>, %arg11: memref<2x2x128x8xbf16, #tpu.memory_space<vmem>>, %arg12: memref<110x16xf32, #tpu.memory_space<vmem>>) attributes {dimension_semantics = [#tpu.dimension_semantics<parallel>], iteration_bounds = array<i64: 1>, scalar_prefetch = 0 : i64, scratch_operands = 2 : i64, tpu.core_type = #tpu.core_type<tc>, window_params = [{transform_indices = @transform_0, window_bounds = array<i64: 1, 392, 9>}, {transform_indices = @transform_1, window_bounds = array<i64: 1, 2, 6>}, {pipeline_mode = #tpu.pipeline_mode<synchronous>, transform_indices = @transform_2, window_bounds = array<i64: 9, 8>}, {pipeline_mode = #tpu.pipeline_mode<synchronous>, transform_indices = @transform_3, window_bounds = array<i64: 1, 8>}, {pipeline_mode = #tpu.pipeline_mode<synchronous>, transform_indices = @transform_4, window_bounds = array<i64: 9, 8, 16>}, {pipeline_mode = #tpu.pipeline_mode<synchronous>, transform_indices = @transform_5, window_bounds = array<i64: 1, 16>}, {pipeline_mode = #tpu.pipeline_mode<synchronous>, transform_indices = @transform_6, window_bounds = array<i64: 880, 64>}, {pipeline_mode = #tpu.pipeline_mode<synchronous>, transform_indices = @transform_7, window_bounds = array<i64: 1, 64>}, {pipeline_mode = #tpu.pipeline_mode<synchronous>, transform_indices = @transform_8, window_bounds = array<i64: 64, 4>}, {transform_indices = @transform_9, window_bounds = array<i64: 1, 2, 10>}]} {
    %cst = arith.constant 0.000000e+00 : bf16
    %0 = vector.broadcast %cst : bf16 to vector<2x2x128x8xbf16>
    %c0 = arith.constant 0 : index
    %c0_0 = arith.constant 0 : index
    %c0_1 = arith.constant 0 : index
    %c0_2 = arith.constant 0 : index
    %1 = vector.load %arg11[%c0, %c0_0, %c0_1, %c0_2] : memref<2x2x128x8xbf16, #tpu.memory_space<vmem>>, vector<2x2x128x8xbf16>
    tpu.vector_store %arg11[%c0, %c0_0, %c0_1, %c0_2], %0 {strides = array<i32>} : memref<2x2x128x8xbf16, #tpu.memory_space<vmem>>, vector<2x2x128x8xbf16>,
    %c0_3 = arith.constant 0 : index
    %c0_4 = arith.constant 0 : index
    %c0_5 = arith.constant 0 : index
    %2 = vector.load %arg1[%c0_3, %c0_4, %c0_5] : memref<1x392x9xbf16, #tpu.memory_space<vmem>>, vector<1x392x9xbf16>
    %3 = vector.shape_cast %2 : vector<1x392x9xbf16> to vector<392x9xbf16>
    %c0_6 = arith.constant 0 : index
    %c0_7 = arith.constant 0 : index
    %4 = vector.load %arg3[%c0_6, %c0_7] : memref<9x8xbf16, #tpu.memory_space<vmem>>, vector<9x8xbf16>
    %cst_8 = arith.constant dense<0.000000e+00> : vector<392x8xf32>
    %5 = tpu.matmul %3, %4, %cst_8 {dimension_numbers = #tpu.dot_dimension_numbers<[1], [0], [0], [1], [0, 0, 1, 1], [], []>} : vector<392x9xbf16>, vector<9x8xbf16>, vector<392x8xf32> -> vector<392x8xf32>
    %c0_9 = arith.constant 0 : index
    %c0_10 = arith.constant 0 : index
    %6 = vector.load %arg4[%c0_9, %c0_10] : memref<1x8xf32, #tpu.memory_space<vmem>>, vector<1x8xf32>
    %7 = vector.broadcast %6 : vector<1x8xf32> to vector<392x8xf32>
    %8 = arith.addf %5, %7 : vector<392x8xf32>
    %cst_11 = arith.constant 0.000000e+00 : f32
    %9 = vector.broadcast %cst_11 : f32 to vector<392x8xf32>
    %10 = arith.maximumf %8, %9 : vector<392x8xf32>
    %11 = arith.truncf %10 : vector<392x8xf32> to vector<392x8xbf16>
    %12 = vector.extract_strided_slice %11 {offsets = [0, 0], sizes = [14, 8], strides = [1, 1]} : vector<392x8xbf16> to vector<14x8xbf16>
    %c1 = arith.constant 1 : index
    %c1_12 = arith.constant 1 : index
    %c0_13 = arith.constant 0 : index
    %c0_14 = arith.constant 0 : index
    %13 = vector.load %arg11[%c1, %c1_12, %c0_13, %c0_14] : memref<2x2x128x8xbf16, #tpu.memory_space<vmem>>, vector<1x1x14x8xbf16>
    %14 = vector.shape_cast %13 : vector<1x1x14x8xbf16> to vector<14x8xbf16>
    %15 = vector.shape_cast %12 : vector<14x8xbf16> to vector<1x1x14x8xbf16>
    tpu.vector_store %arg11[%c1, %c1_12, %c0_13, %c0_14], %15 {strides = array<i32>} : memref<2x2x128x8xbf16, #tpu.memory_space<vmem>>, vector<1x1x14x8xbf16>,
    %16 = vector.extract_strided_slice %11 {offsets = [14, 0], sizes = [14, 8], strides = [1, 1]} : vector<392x8xbf16> to vector<14x8xbf16>
    %c1_15 = arith.constant 1 : index
    %c1_16 = arith.constant 1 : index
    %c16 = arith.constant 16 : index
    %c0_17 = arith.constant 0 : index
    %17 = vector.load %arg11[%c1_15, %c1_16, %c16, %c0_17] : memref<2x2x128x8xbf16, #tpu.memory_space<vmem>>, vector<1x1x14x8xbf16>
    %18 = vector.shape_cast %17 : vector<1x1x14x8xbf16> to vector<14x8xbf16>
    %19 = vector.shape_cast %16 : vector<14x8xbf16> to vector<1x1x14x8xbf16>
    tpu.vector_store %arg11[%c1_15, %c1_16, %c16, %c0_17], %19 {strides = array<i32>} : memref<2x2x128x8xbf16, #tpu.memory_space<vmem>>, vector<1x1x14x8xbf16>,
    %20 = vector.extract_strided_slice %11 {offsets = [28, 0], sizes = [14, 8], strides = [1, 1]} : vector<392x8xbf16> to vector<14x8xbf16>
    %c1_18 = arith.constant 1 : index
    %c1_19 = arith.constant 1 : index
    %c32 = arith.constant 32 : index
    %c0_20 = arith.constant 0 : index
    %21 = vector.load %arg11[%c1_18, %c1_19, %c32, %c0_20] : memref<2x2x128x8xbf16, #tpu.memory_space<vmem>>, vector<1x1x14x8xbf16>
    %22 = vector.shape_cast %21 : vector<1x1x14x8xbf16> to vector<14x8xbf16>
    %23 = vector.shape_cast %20 : vector<14x8xbf16> to vector<1x1x14x8xbf16>
    tpu.vector_store %arg11[%c1_18, %c1_19, %c32, %c0_20], %23 {strides = array<i32>} : memref<2x2x128x8xbf16, #tpu.memory_space<vmem>>, vector<1x1x14x8xbf16>,
    %24 = vector.extract_strided_slice %11 {offsets = [42, 0], sizes = [14, 8], strides = [1, 1]} : vector<392x8xbf16> to vector<14x8xbf16>
    %c1_21 = arith.constant 1 : index
    %c1_22 = arith.constant 1 : index
    %c48 = arith.constant 48 : index
    %c0_23 = arith.constant 0 : index
    %25 = vector.load %arg11[%c1_21, %c1_22, %c48, %c0_23] : memref<2x2x128x8xbf16, #tpu.memory_space<vmem>>, vector<1x1x14x8xbf16>
    %26 = vector.shape_cast %25 : vector<1x1x14x8xbf16> to vector<14x8xbf16>
    %27 = vector.shape_cast %24 : vector<14x8xbf16> to vector<1x1x14x8xbf16>
    tpu.vector_store %arg11[%c1_21, %c1_22, %c48, %c0_23], %27 {strides = array<i32>} : memref<2x2x128x8xbf16, #tpu.memory_space<vmem>>, vector<1x1x14x8xbf16>,
    %28 = vector.extract_strided_slice %11 {offsets = [56, 0], sizes = [14, 8], strides = [1, 1]} : vector<392x8xbf16> to vector<14x8xbf16>
    %c1_24 = arith.constant 1 : index
    %c1_25 = arith.constant 1 : index
    %c64 = arith.constant 64 : index
    %c0_26 = arith.constant 0 : index
    %29 = vector.load %arg11[%c1_24, %c1_25, %c64, %c0_26] : memref<2x2x128x8xbf16, #tpu.memory_space<vmem>>, vector<1x1x14x8xbf16>
    %30 = vector.shape_cast %29 : vector<1x1x14x8xbf16> to vector<14x8xbf16>
    %31 = vector.shape_cast %28 : vector<14x8xbf16> to vector<1x1x14x8xbf16>
    tpu.vector_store %arg11[%c1_24, %c1_25, %c64, %c0_26], %31 {strides = array<i32>} : memref<2x2x128x8xbf16, #tpu.memory_space<vmem>>, vector<1x1x14x8xbf16>,
    %32 = vector.extract_strided_slice %11 {offsets = [70, 0], sizes = [14, 8], strides = [1, 1]} : vector<392x8xbf16> to vector<14x8xbf16>
    %c1_27 = arith.constant 1 : index
    %c1_28 = arith.constant 1 : index
    %c80 = arith.constant 80 : index
    %c0_29 = arith.constant 0 : index
    %33 = vector.load %arg11[%c1_27, %c1_28, %c80, %c0_29] : memref<2x2x128x8xbf16, #tpu.memory_space<vmem>>, vector<1x1x14x8xbf16>
    %34 = vector.shape_cast %33 : vector<1x1x14x8xbf16> to vector<14x8xbf16>
    %35 = vector.shape_cast %32 : vector<14x8xbf16> to vector<1x1x14x8xbf16>
    tpu.vector_store %arg11[%c1_27, %c1_28, %c80, %c0_29], %35 {strides = array<i32>} : memref<2x2x128x8xbf16, #tpu.memory_space<vmem>>, vector<1x1x14x8xbf16>,
    %36 = vector.extract_strided_slice %11 {offsets = [84, 0], sizes = [14, 8], strides = [1, 1]} : vector<392x8xbf16> to vector<14x8xbf16>
    %c1_30 = arith.constant 1 : index
    %c1_31 = arith.constant 1 : index
    %c96 = arith.constant 96 : index
    %c0_32 = arith.constant 0 : index
    %37 = vector.load %arg11[%c1_30, %c1_31, %c96, %c0_32] : memref<2x2x128x8xbf16, #tpu.memory_space<vmem>>, vector<1x1x14x8xbf16>
    %38 = vector.shape_cast %37 : vector<1x1x14x8xbf16> to vector<14x8xbf16>
    %39 = vector.shape_cast %36 : vector<14x8xbf16> to vector<1x1x14x8xbf16>
    tpu.vector_store %arg11[%c1_30, %c1_31, %c96, %c0_32], %39 {strides = array<i32>} : memref<2x2x128x8xbf16, #tpu.memory_space<vmem>>, vector<1x1x14x8xbf16>,
    %40 = vector.extract_strided_slice %11 {offsets = [98, 0], sizes = [14, 8], strides = [1, 1]} : vector<392x8xbf16> to vector<14x8xbf16>
    %c1_33 = arith.constant 1 : index
    %c0_34 = arith.constant 0 : index
    %c2 = arith.constant 2 : index
    %c0_35 = arith.constant 0 : index
    %41 = vector.load %arg11[%c1_33, %c0_34, %c2, %c0_35] : memref<2x2x128x8xbf16, #tpu.memory_space<vmem>>, vector<1x1x14x8xbf16>
    %42 = vector.shape_cast %41 : vector<1x1x14x8xbf16> to vector<14x8xbf16>
    %43 = vector.shape_cast %40 : vector<14x8xbf16> to vector<1x1x14x8xbf16>
    tpu.vector_store %arg11[%c1_33, %c0_34, %c2, %c0_35], %43 {strides = array<i32>} : memref<2x2x128x8xbf16, #tpu.memory_space<vmem>>, vector<1x1x14x8xbf16>,
    %44 = vector.extract_strided_slice %11 {offsets = [112, 0], sizes = [14, 8], strides = [1, 1]} : vector<392x8xbf16> to vector<14x8xbf16>
    %c1_36 = arith.constant 1 : index
    %c0_37 = arith.constant 0 : index
    %c18 = arith.constant 18 : index
    %c0_38 = arith.constant 0 : index
    %45 = vector.load %arg11[%c1_36, %c0_37, %c18, %c0_38] : memref<2x2x128x8xbf16, #tpu.memory_space<vmem>>, vector<1x1x14x8xbf16>
    %46 = vector.shape_cast %45 : vector<1x1x14x8xbf16> to vector<14x8xbf16>
    %47 = vector.shape_cast %44 : vector<14x8xbf16> to vector<1x1x14x8xbf16>
    tpu.vector_store %arg11[%c1_36, %c0_37, %c18, %c0_38], %47 {strides = array<i32>} : memref<2x2x128x8xbf16, #tpu.memory_space<vmem>>, vector<1x1x14x8xbf16>,
    %48 = vector.extract_strided_slice %11 {offsets = [126, 0], sizes = [14, 8], strides = [1, 1]} : vector<392x8xbf16> to vector<14x8xbf16>
    %c1_39 = arith.constant 1 : index
    %c0_40 = arith.constant 0 : index
    %c34 = arith.constant 34 : index
    %c0_41 = arith.constant 0 : index
    %49 = vector.load %arg11[%c1_39, %c0_40, %c34, %c0_41] : memref<2x2x128x8xbf16, #tpu.memory_space<vmem>>, vector<1x1x14x8xbf16>
    %50 = vector.shape_cast %49 : vector<1x1x14x8xbf16> to vector<14x8xbf16>
    %51 = vector.shape_cast %48 : vector<14x8xbf16> to vector<1x1x14x8xbf16>
    tpu.vector_store %arg11[%c1_39, %c0_40, %c34, %c0_41], %51 {strides = array<i32>} : memref<2x2x128x8xbf16, #tpu.memory_space<vmem>>, vector<1x1x14x8xbf16>,
    %52 = vector.extract_strided_slice %11 {offsets = [140, 0], sizes = [14, 8], strides = [1, 1]} : vector<392x8xbf16> to vector<14x8xbf16>
    %c1_42 = arith.constant 1 : index
    %c0_43 = arith.constant 0 : index
    %c50 = arith.constant 50 : index
    %c0_44 = arith.constant 0 : index
    %53 = vector.load %arg11[%c1_42, %c0_43, %c50, %c0_44] : memref<2x2x128x8xbf16, #tpu.memory_space<vmem>>, vector<1x1x14x8xbf16>
    %54 = vector.shape_cast %53 : vector<1x1x14x8xbf16> to vector<14x8xbf16>
    %55 = vector.shape_cast %52 : vector<14x8xbf16> to vector<1x1x14x8xbf16>
    tpu.vector_store %arg11[%c1_42, %c0_43, %c50, %c0_44], %55 {strides = array<i32>} : memref<2x2x128x8xbf16, #tpu.memory_space<vmem>>, vector<1x1x14x8xbf16>,
    %56 = vector.extract_strided_slice %11 {offsets = [154, 0], sizes = [14, 8], strides = [1, 1]} : vector<392x8xbf16> to vector<14x8xbf16>
    %c1_45 = arith.constant 1 : index
    %c0_46 = arith.constant 0 : index
    %c66 = arith.constant 66 : index
    %c0_47 = arith.constant 0 : index
    %57 = vector.load %arg11[%c1_45, %c0_46, %c66, %c0_47] : memref<2x2x128x8xbf16, #tpu.memory_space<vmem>>, vector<1x1x14x8xbf16>
    %58 = vector.shape_cast %57 : vector<1x1x14x8xbf16> to vector<14x8xbf16>
    %59 = vector.shape_cast %56 : vector<14x8xbf16> to vector<1x1x14x8xbf16>
    tpu.vector_store %arg11[%c1_45, %c0_46, %c66, %c0_47], %59 {strides = array<i32>} : memref<2x2x128x8xbf16, #tpu.memory_space<vmem>>, vector<1x1x14x8xbf16>,
    %60 = vector.extract_strided_slice %11 {offsets = [168, 0], sizes = [14, 8], strides = [1, 1]} : vector<392x8xbf16> to vector<14x8xbf16>
    %c1_48 = arith.constant 1 : index
    %c0_49 = arith.constant 0 : index
    %c82 = arith.constant 82 : index
    %c0_50 = arith.constant 0 : index
    %61 = vector.load %arg11[%c1_48, %c0_49, %c82, %c0_50] : memref<2x2x128x8xbf16, #tpu.memory_space<vmem>>, vector<1x1x14x8xbf16>
    %62 = vector.shape_cast %61 : vector<1x1x14x8xbf16> to vector<14x8xbf16>
    %63 = vector.shape_cast %60 : vector<14x8xbf16> to vector<1x1x14x8xbf16>
    tpu.vector_store %arg11[%c1_48, %c0_49, %c82, %c0_50], %63 {strides = array<i32>} : memref<2x2x128x8xbf16, #tpu.memory_space<vmem>>, vector<1x1x14x8xbf16>,
    %64 = vector.extract_strided_slice %11 {offsets = [182, 0], sizes = [14, 8], strides = [1, 1]} : vector<392x8xbf16> to vector<14x8xbf16>
    %c1_51 = arith.constant 1 : index
    %c0_52 = arith.constant 0 : index
    %c98 = arith.constant 98 : index
    %c0_53 = arith.constant 0 : index
    %65 = vector.load %arg11[%c1_51, %c0_52, %c98, %c0_53] : memref<2x2x128x8xbf16, #tpu.memory_space<vmem>>, vector<1x1x14x8xbf16>
    %66 = vector.shape_cast %65 : vector<1x1x14x8xbf16> to vector<14x8xbf16>
    %67 = vector.shape_cast %64 : vector<14x8xbf16> to vector<1x1x14x8xbf16>
    tpu.vector_store %arg11[%c1_51, %c0_52, %c98, %c0_53], %67 {strides = array<i32>} : memref<2x2x128x8xbf16, #tpu.memory_space<vmem>>, vector<1x1x14x8xbf16>,
    %68 = vector.extract_strided_slice %11 {offsets = [196, 0], sizes = [14, 8], strides = [1, 1]} : vector<392x8xbf16> to vector<14x8xbf16>
    %c0_54 = arith.constant 0 : index
    %c1_55 = arith.constant 1 : index
    %c16_56 = arith.constant 16 : index
    %c0_57 = arith.constant 0 : index
    %69 = vector.load %arg11[%c0_54, %c1_55, %c16_56, %c0_57] : memref<2x2x128x8xbf16, #tpu.memory_space<vmem>>, vector<1x1x14x8xbf16>
    %70 = vector.shape_cast %69 : vector<1x1x14x8xbf16> to vector<14x8xbf16>
    %71 = vector.shape_cast %68 : vector<14x8xbf16> to vector<1x1x14x8xbf16>
    tpu.vector_store %arg11[%c0_54, %c1_55, %c16_56, %c0_57], %71 {strides = array<i32>} : memref<2x2x128x8xbf16, #tpu.memory_space<vmem>>, vector<1x1x14x8xbf16>,
    %72 = vector.extract_strided_slice %11 {offsets = [210, 0], sizes = [14, 8], strides = [1, 1]} : vector<392x8xbf16> to vector<14x8xbf16>
    %c0_58 = arith.constant 0 : index
    %c1_59 = arith.constant 1 : index
    %c32_60 = arith.constant 32 : index
    %c0_61 = arith.constant 0 : index
    %73 = vector.load %arg11[%c0_58, %c1_59, %c32_60, %c0_61] : memref<2x2x128x8xbf16, #tpu.memory_space<vmem>>, vector<1x1x14x8xbf16>
    %74 = vector.shape_cast %73 : vector<1x1x14x8xbf16> to vector<14x8xbf16>
    %75 = vector.shape_cast %72 : vector<14x8xbf16> to vector<1x1x14x8xbf16>
    tpu.vector_store %arg11[%c0_58, %c1_59, %c32_60, %c0_61], %75 {strides = array<i32>} : memref<2x2x128x8xbf16, #tpu.memory_space<vmem>>, vector<1x1x14x8xbf16>,
    %76 = vector.extract_strided_slice %11 {offsets = [224, 0], sizes = [14, 8], strides = [1, 1]} : vector<392x8xbf16> to vector<14x8xbf16>
    %c0_62 = arith.constant 0 : index
    %c1_63 = arith.constant 1 : index
    %c48_64 = arith.constant 48 : index
    %c0_65 = arith.constant 0 : index
    %77 = vector.load %arg11[%c0_62, %c1_63, %c48_64, %c0_65] : memref<2x2x128x8xbf16, #tpu.memory_space<vmem>>, vector<1x1x14x8xbf16>
    %78 = vector.shape_cast %77 : vector<1x1x14x8xbf16> to vector<14x8xbf16>
    %79 = vector.shape_cast %76 : vector<14x8xbf16> to vector<1x1x14x8xbf16>
    tpu.vector_store %arg11[%c0_62, %c1_63, %c48_64, %c0_65], %79 {strides = array<i32>} : memref<2x2x128x8xbf16, #tpu.memory_space<vmem>>, vector<1x1x14x8xbf16>,
    %80 = vector.extract_strided_slice %11 {offsets = [238, 0], sizes = [14, 8], strides = [1, 1]} : vector<392x8xbf16> to vector<14x8xbf16>
    %c0_66 = arith.constant 0 : index
    %c1_67 = arith.constant 1 : index
    %c64_68 = arith.constant 64 : index
    %c0_69 = arith.constant 0 : index
    %81 = vector.load %arg11[%c0_66, %c1_67, %c64_68, %c0_69] : memref<2x2x128x8xbf16, #tpu.memory_space<vmem>>, vector<1x1x14x8xbf16>
    %82 = vector.shape_cast %81 : vector<1x1x14x8xbf16> to vector<14x8xbf16>
    %83 = vector.shape_cast %80 : vector<14x8xbf16> to vector<1x1x14x8xbf16>
    tpu.vector_store %arg11[%c0_66, %c1_67, %c64_68, %c0_69], %83 {strides = array<i32>} : memref<2x2x128x8xbf16, #tpu.memory_space<vmem>>, vector<1x1x14x8xbf16>,
    %84 = vector.extract_strided_slice %11 {offsets = [252, 0], sizes = [14, 8], strides = [1, 1]} : vector<392x8xbf16> to vector<14x8xbf16>
    %c0_70 = arith.constant 0 : index
    %c1_71 = arith.constant 1 : index
    %c80_72 = arith.constant 80 : index
    %c0_73 = arith.constant 0 : index
    %85 = vector.load %arg11[%c0_70, %c1_71, %c80_72, %c0_73] : memref<2x2x128x8xbf16, #tpu.memory_space<vmem>>, vector<1x1x14x8xbf16>
    %86 = vector.shape_cast %85 : vector<1x1x14x8xbf16> to vector<14x8xbf16>
    %87 = vector.shape_cast %84 : vector<14x8xbf16> to vector<1x1x14x8xbf16>
    tpu.vector_store %arg11[%c0_70, %c1_71, %c80_72, %c0_73], %87 {strides = array<i32>} : memref<2x2x128x8xbf16, #tpu.memory_space<vmem>>, vector<1x1x14x8xbf16>,
    %88 = vector.extract_strided_slice %11 {offsets = [266, 0], sizes = [14, 8], strides = [1, 1]} : vector<392x8xbf16> to vector<14x8xbf16>
    %c0_74 = arith.constant 0 : index
    %c1_75 = arith.constant 1 : index
    %c96_76 = arith.constant 96 : index
    %c0_77 = arith.constant 0 : index
    %89 = vector.load %arg11[%c0_74, %c1_75, %c96_76, %c0_77] : memref<2x2x128x8xbf16, #tpu.memory_space<vmem>>, vector<1x1x14x8xbf16>
    %90 = vector.shape_cast %89 : vector<1x1x14x8xbf16> to vector<14x8xbf16>
    %91 = vector.shape_cast %88 : vector<14x8xbf16> to vector<1x1x14x8xbf16>
    tpu.vector_store %arg11[%c0_74, %c1_75, %c96_76, %c0_77], %91 {strides = array<i32>} : memref<2x2x128x8xbf16, #tpu.memory_space<vmem>>, vector<1x1x14x8xbf16>,
    %92 = vector.extract_strided_slice %11 {offsets = [280, 0], sizes = [14, 8], strides = [1, 1]} : vector<392x8xbf16> to vector<14x8xbf16>
    %c0_78 = arith.constant 0 : index
    %c1_79 = arith.constant 1 : index
    %c112 = arith.constant 112 : index
    %c0_80 = arith.constant 0 : index
    %93 = vector.load %arg11[%c0_78, %c1_79, %c112, %c0_80] : memref<2x2x128x8xbf16, #tpu.memory_space<vmem>>, vector<1x1x14x8xbf16>
    %94 = vector.shape_cast %93 : vector<1x1x14x8xbf16> to vector<14x8xbf16>
    %95 = vector.shape_cast %92 : vector<14x8xbf16> to vector<1x1x14x8xbf16>
    tpu.vector_store %arg11[%c0_78, %c1_79, %c112, %c0_80], %95 {strides = array<i32>} : memref<2x2x128x8xbf16, #tpu.memory_space<vmem>>, vector<1x1x14x8xbf16>,
    %96 = vector.extract_strided_slice %11 {offsets = [294, 0], sizes = [14, 8], strides = [1, 1]} : vector<392x8xbf16> to vector<14x8xbf16>
    %c0_81 = arith.constant 0 : index
    %c0_82 = arith.constant 0 : index
    %c18_83 = arith.constant 18 : index
    %c0_84 = arith.constant 0 : index
    %97 = vector.load %arg11[%c0_81, %c0_82, %c18_83, %c0_84] : memref<2x2x128x8xbf16, #tpu.memory_space<vmem>>, vector<1x1x14x8xbf16>
    %98 = vector.shape_cast %97 : vector<1x1x14x8xbf16> to vector<14x8xbf16>
    %99 = vector.shape_cast %96 : vector<14x8xbf16> to vector<1x1x14x8xbf16>
    tpu.vector_store %arg11[%c0_81, %c0_82, %c18_83, %c0_84], %99 {strides = array<i32>} : memref<2x2x128x8xbf16, #tpu.memory_space<vmem>>, vector<1x1x14x8xbf16>,
    %100 = vector.extract_strided_slice %11 {offsets = [308, 0], sizes = [14, 8], strides = [1, 1]} : vector<392x8xbf16> to vector<14x8xbf16>
    %c0_85 = arith.constant 0 : index
    %c0_86 = arith.constant 0 : index
    %c34_87 = arith.constant 34 : index
    %c0_88 = arith.constant 0 : index
    %101 = vector.load %arg11[%c0_85, %c0_86, %c34_87, %c0_88] : memref<2x2x128x8xbf16, #tpu.memory_space<vmem>>, vector<1x1x14x8xbf16>
    %102 = vector.shape_cast %101 : vector<1x1x14x8xbf16> to vector<14x8xbf16>
    %103 = vector.shape_cast %100 : vector<14x8xbf16> to vector<1x1x14x8xbf16>
    tpu.vector_store %arg11[%c0_85, %c0_86, %c34_87, %c0_88], %103 {strides = array<i32>} : memref<2x2x128x8xbf16, #tpu.memory_space<vmem>>, vector<1x1x14x8xbf16>,
    %104 = vector.extract_strided_slice %11 {offsets = [322, 0], sizes = [14, 8], strides = [1, 1]} : vector<392x8xbf16> to vector<14x8xbf16>
    %c0_89 = arith.constant 0 : index
    %c0_90 = arith.constant 0 : index
    %c50_91 = arith.constant 50 : index
    %c0_92 = arith.constant 0 : index
    %105 = vector.load %arg11[%c0_89, %c0_90, %c50_91, %c0_92] : memref<2x2x128x8xbf16, #tpu.memory_space<vmem>>, vector<1x1x14x8xbf16>
    %106 = vector.shape_cast %105 : vector<1x1x14x8xbf16> to vector<14x8xbf16>
    %107 = vector.shape_cast %104 : vector<14x8xbf16> to vector<1x1x14x8xbf16>
    tpu.vector_store %arg11[%c0_89, %c0_90, %c50_91, %c0_92], %107 {strides = array<i32>} : memref<2x2x128x8xbf16, #tpu.memory_space<vmem>>, vector<1x1x14x8xbf16>,
    %108 = vector.extract_strided_slice %11 {offsets = [336, 0], sizes = [14, 8], strides = [1, 1]} : vector<392x8xbf16> to vector<14x8xbf16>
    %c0_93 = arith.constant 0 : index
    %c0_94 = arith.constant 0 : index
    %c66_95 = arith.constant 66 : index
    %c0_96 = arith.constant 0 : index
    %109 = vector.load %arg11[%c0_93, %c0_94, %c66_95, %c0_96] : memref<2x2x128x8xbf16, #tpu.memory_space<vmem>>, vector<1x1x14x8xbf16>
    %110 = vector.shape_cast %109 : vector<1x1x14x8xbf16> to vector<14x8xbf16>
    %111 = vector.shape_cast %108 : vector<14x8xbf16> to vector<1x1x14x8xbf16>
    tpu.vector_store %arg11[%c0_93, %c0_94, %c66_95, %c0_96], %111 {strides = array<i32>} : memref<2x2x128x8xbf16, #tpu.memory_space<vmem>>, vector<1x1x14x8xbf16>,
    %112 = vector.extract_strided_slice %11 {offsets = [350, 0], sizes = [14, 8], strides = [1, 1]} : vector<392x8xbf16> to vector<14x8xbf16>
    %c0_97 = arith.constant 0 : index
    %c0_98 = arith.constant 0 : index
    %c82_99 = arith.constant 82 : index
    %c0_100 = arith.constant 0 : index
    %113 = vector.load %arg11[%c0_97, %c0_98, %c82_99, %c0_100] : memref<2x2x128x8xbf16, #tpu.memory_space<vmem>>, vector<1x1x14x8xbf16>
    %114 = vector.shape_cast %113 : vector<1x1x14x8xbf16> to vector<14x8xbf16>
    %115 = vector.shape_cast %112 : vector<14x8xbf16> to vector<1x1x14x8xbf16>
    tpu.vector_store %arg11[%c0_97, %c0_98, %c82_99, %c0_100], %115 {strides = array<i32>} : memref<2x2x128x8xbf16, #tpu.memory_space<vmem>>, vector<1x1x14x8xbf16>,
    %116 = vector.extract_strided_slice %11 {offsets = [364, 0], sizes = [14, 8], strides = [1, 1]} : vector<392x8xbf16> to vector<14x8xbf16>
    %c0_101 = arith.constant 0 : index
    %c0_102 = arith.constant 0 : index
    %c98_103 = arith.constant 98 : index
    %c0_104 = arith.constant 0 : index
    %117 = vector.load %arg11[%c0_101, %c0_102, %c98_103, %c0_104] : memref<2x2x128x8xbf16, #tpu.memory_space<vmem>>, vector<1x1x14x8xbf16>
    %118 = vector.shape_cast %117 : vector<1x1x14x8xbf16> to vector<14x8xbf16>
    %119 = vector.shape_cast %116 : vector<14x8xbf16> to vector<1x1x14x8xbf16>
    tpu.vector_store %arg11[%c0_101, %c0_102, %c98_103, %c0_104], %119 {strides = array<i32>} : memref<2x2x128x8xbf16, #tpu.memory_space<vmem>>, vector<1x1x14x8xbf16>,
    %120 = vector.extract_strided_slice %11 {offsets = [378, 0], sizes = [14, 8], strides = [1, 1]} : vector<392x8xbf16> to vector<14x8xbf16>
    %c0_105 = arith.constant 0 : index
    %c0_106 = arith.constant 0 : index
    %c114 = arith.constant 114 : index
    %c0_107 = arith.constant 0 : index
    %121 = vector.load %arg11[%c0_105, %c0_106, %c114, %c0_107] : memref<2x2x128x8xbf16, #tpu.memory_space<vmem>>, vector<1x1x14x8xbf16>
    %122 = vector.shape_cast %121 : vector<1x1x14x8xbf16> to vector<14x8xbf16>
    %123 = vector.shape_cast %120 : vector<14x8xbf16> to vector<1x1x14x8xbf16>
    tpu.vector_store %arg11[%c0_105, %c0_106, %c114, %c0_107], %123 {strides = array<i32>} : memref<2x2x128x8xbf16, #tpu.memory_space<vmem>>, vector<1x1x14x8xbf16>,
    %c0_108 = arith.constant 0 : index
    %c0_109 = arith.constant 0 : index
    %c0_110 = arith.constant 0 : index
    %c0_111 = arith.constant 0 : index
    %124 = vector.load %arg11[%c0_108, %c0_109, %c0_110, %c0_111] : memref<2x2x128x8xbf16, #tpu.memory_space<vmem>>, vector<1x1x110x8xbf16>
    %125 = vector.shape_cast %124 : vector<1x1x110x8xbf16> to vector<110x8xbf16>
    %c0_112 = arith.constant 0 : index
    %c0_113 = arith.constant 0 : index
    %c0_114 = arith.constant 0 : index
    %126 = vector.load %arg5[%c0_112, %c0_113, %c0_114] : memref<9x8x16xbf16, #tpu.memory_space<vmem>>, vector<1x8x16xbf16>
    %127 = vector.shape_cast %126 : vector<1x8x16xbf16> to vector<8x16xbf16>
    %cst_115 = arith.constant dense<0.000000e+00> : vector<110x16xf32>
    %128 = tpu.matmul %125, %127, %cst_115 {dimension_numbers = #tpu.dot_dimension_numbers<[1], [0], [0], [1], [0, 0, 1, 1], [], []>} : vector<110x8xbf16>, vector<8x16xbf16>, vector<110x16xf32> -> vector<110x16xf32>
    %c0_116 = arith.constant 0 : index
    %c0_117 = arith.constant 0 : index
    %129 = vector.load %arg12[%c0_116, %c0_117] : memref<110x16xf32, #tpu.memory_space<vmem>>, vector<110x16xf32>
    tpu.vector_store %arg12[%c0_116, %c0_117], %128 {strides = array<i32>} : memref<110x16xf32, #tpu.memory_space<vmem>>, vector<110x16xf32>,
    %c0_118 = arith.constant 0 : index
    %c1_119 = arith.constant 1 : index
    %c0_120 = arith.constant 0 : index
    %c0_121 = arith.constant 0 : index
    %130 = vector.load %arg11[%c0_118, %c1_119, %c0_120, %c0_121] : memref<2x2x128x8xbf16, #tpu.memory_space<vmem>>, vector<1x1x110x8xbf16>
    %131 = vector.shape_cast %130 : vector<1x1x110x8xbf16> to vector<110x8xbf16>
    %c1_122 = arith.constant 1 : index
    %c0_123 = arith.constant 0 : index
    %c0_124 = arith.constant 0 : index
    %132 = vector.load %arg5[%c1_122, %c0_123, %c0_124] : memref<9x8x16xbf16, #tpu.memory_space<vmem>>, vector<1x8x16xbf16>
    %133 = vector.shape_cast %132 : vector<1x8x16xbf16> to vector<8x16xbf16>
    %cst_125 = arith.constant dense<0.000000e+00> : vector<110x16xf32>
    %134 = tpu.matmul %131, %133, %cst_125 {dimension_numbers = #tpu.dot_dimension_numbers<[1], [0], [0], [1], [0, 0, 1, 1], [], []>} : vector<110x8xbf16>, vector<8x16xbf16>, vector<110x16xf32> -> vector<110x16xf32>
    %c0_126 = arith.constant 0 : index
    %c0_127 = arith.constant 0 : index
    %135 = vector.load %arg12[%c0_126, %c0_127] : memref<110x16xf32, #tpu.memory_space<vmem>>, vector<110x16xf32>
    %136 = arith.addf %135, %134 : vector<110x16xf32>
    %c0_128 = arith.constant 0 : index
    %c0_129 = arith.constant 0 : index
    %137 = vector.load %arg12[%c0_128, %c0_129] : memref<110x16xf32, #tpu.memory_space<vmem>>, vector<110x16xf32>
    tpu.vector_store %arg12[%c0_128, %c0_129], %136 {strides = array<i32>} : memref<110x16xf32, #tpu.memory_space<vmem>>, vector<110x16xf32>,
    %c0_130 = arith.constant 0 : index
    %c0_131 = arith.constant 0 : index
    %c2_132 = arith.constant 2 : index
    %c0_133 = arith.constant 0 : index
    %138 = vector.load %arg11[%c0_130, %c0_131, %c2_132, %c0_133] : memref<2x2x128x8xbf16, #tpu.memory_space<vmem>>, vector<1x1x110x8xbf16>
    %139 = vector.shape_cast %138 : vector<1x1x110x8xbf16> to vector<110x8xbf16>
    %c2_134 = arith.constant 2 : index
    %c0_135 = arith.constant 0 : index
    %c0_136 = arith.constant 0 : index
    %140 = vector.load %arg5[%c2_134, %c0_135, %c0_136] : memref<9x8x16xbf16, #tpu.memory_space<vmem>>, vector<1x8x16xbf16>
    %141 = vector.shape_cast %140 : vector<1x8x16xbf16> to vector<8x16xbf16>
    %cst_137 = arith.constant dense<0.000000e+00> : vector<110x16xf32>
    %142 = tpu.matmul %139, %141, %cst_137 {dimension_numbers = #tpu.dot_dimension_numbers<[1], [0], [0], [1], [0, 0, 1, 1], [], []>} : vector<110x8xbf16>, vector<8x16xbf16>, vector<110x16xf32> -> vector<110x16xf32>
    %c0_138 = arith.constant 0 : index
    %c0_139 = arith.constant 0 : index
    %143 = vector.load %arg12[%c0_138, %c0_139] : memref<110x16xf32, #tpu.memory_space<vmem>>, vector<110x16xf32>
    %144 = arith.addf %143, %142 : vector<110x16xf32>
    %c0_140 = arith.constant 0 : index
    %c0_141 = arith.constant 0 : index
    %145 = vector.load %arg12[%c0_140, %c0_141] : memref<110x16xf32, #tpu.memory_space<vmem>>, vector<110x16xf32>
    tpu.vector_store %arg12[%c0_140, %c0_141], %144 {strides = array<i32>} : memref<110x16xf32, #tpu.memory_space<vmem>>, vector<110x16xf32>,
    %c1_142 = arith.constant 1 : index
    %c0_143 = arith.constant 0 : index
    %c0_144 = arith.constant 0 : index
    %c0_145 = arith.constant 0 : index
    %146 = vector.load %arg11[%c1_142, %c0_143, %c0_144, %c0_145] : memref<2x2x128x8xbf16, #tpu.memory_space<vmem>>, vector<1x1x110x8xbf16>
    %147 = vector.shape_cast %146 : vector<1x1x110x8xbf16> to vector<110x8xbf16>
    %c3 = arith.constant 3 : index
    %c0_146 = arith.constant 0 : index
    %c0_147 = arith.constant 0 : index
    %148 = vector.load %arg5[%c3, %c0_146, %c0_147] : memref<9x8x16xbf16, #tpu.memory_space<vmem>>, vector<1x8x16xbf16>
    %149 = vector.shape_cast %148 : vector<1x8x16xbf16> to vector<8x16xbf16>
    %cst_148 = arith.constant dense<0.000000e+00> : vector<110x16xf32>
    %150 = tpu.matmul %147, %149, %cst_148 {dimension_numbers = #tpu.dot_dimension_numbers<[1], [0], [0], [1], [0, 0, 1, 1], [], []>} : vector<110x8xbf16>, vector<8x16xbf16>, vector<110x16xf32> -> vector<110x16xf32>
    %c0_149 = arith.constant 0 : index
    %c0_150 = arith.constant 0 : index
    %151 = vector.load %arg12[%c0_149, %c0_150] : memref<110x16xf32, #tpu.memory_space<vmem>>, vector<110x16xf32>
    %152 = arith.addf %151, %150 : vector<110x16xf32>
    %c0_151 = arith.constant 0 : index
    %c0_152 = arith.constant 0 : index
    %153 = vector.load %arg12[%c0_151, %c0_152] : memref<110x16xf32, #tpu.memory_space<vmem>>, vector<110x16xf32>
    tpu.vector_store %arg12[%c0_151, %c0_152], %152 {strides = array<i32>} : memref<110x16xf32, #tpu.memory_space<vmem>>, vector<110x16xf32>,
    %c1_153 = arith.constant 1 : index
    %c1_154 = arith.constant 1 : index
    %c0_155 = arith.constant 0 : index
    %c0_156 = arith.constant 0 : index
    %154 = vector.load %arg11[%c1_153, %c1_154, %c0_155, %c0_156] : memref<2x2x128x8xbf16, #tpu.memory_space<vmem>>, vector<1x1x110x8xbf16>
    %155 = vector.shape_cast %154 : vector<1x1x110x8xbf16> to vector<110x8xbf16>
    %c4 = arith.constant 4 : index
    %c0_157 = arith.constant 0 : index
    %c0_158 = arith.constant 0 : index
    %156 = vector.load %arg5[%c4, %c0_157, %c0_158] : memref<9x8x16xbf16, #tpu.memory_space<vmem>>, vector<1x8x16xbf16>
    %157 = vector.shape_cast %156 : vector<1x8x16xbf16> to vector<8x16xbf16>
    %cst_159 = arith.constant dense<0.000000e+00> : vector<110x16xf32>
    %158 = tpu.matmul %155, %157, %cst_159 {dimension_numbers = #tpu.dot_dimension_numbers<[1], [0], [0], [1], [0, 0, 1, 1], [], []>} : vector<110x8xbf16>, vector<8x16xbf16>, vector<110x16xf32> -> vector<110x16xf32>
    %c0_160 = arith.constant 0 : index
    %c0_161 = arith.constant 0 : index
    %159 = vector.load %arg12[%c0_160, %c0_161] : memref<110x16xf32, #tpu.memory_space<vmem>>, vector<110x16xf32>
    %160 = arith.addf %159, %158 : vector<110x16xf32>
    %c0_162 = arith.constant 0 : index
    %c0_163 = arith.constant 0 : index
    %161 = vector.load %arg12[%c0_162, %c0_163] : memref<110x16xf32, #tpu.memory_space<vmem>>, vector<110x16xf32>
    tpu.vector_store %arg12[%c0_162, %c0_163], %160 {strides = array<i32>} : memref<110x16xf32, #tpu.memory_space<vmem>>, vector<110x16xf32>,
    %c1_164 = arith.constant 1 : index
    %c0_165 = arith.constant 0 : index
    %c2_166 = arith.constant 2 : index
    %c0_167 = arith.constant 0 : index
    %162 = vector.load %arg11[%c1_164, %c0_165, %c2_166, %c0_167] : memref<2x2x128x8xbf16, #tpu.memory_space<vmem>>, vector<1x1x110x8xbf16>
    %163 = vector.shape_cast %162 : vector<1x1x110x8xbf16> to vector<110x8xbf16>
    %c5 = arith.constant 5 : index
    %c0_168 = arith.constant 0 : index
    %c0_169 = arith.constant 0 : index
    %164 = vector.load %arg5[%c5, %c0_168, %c0_169] : memref<9x8x16xbf16, #tpu.memory_space<vmem>>, vector<1x8x16xbf16>
    %165 = vector.shape_cast %164 : vector<1x8x16xbf16> to vector<8x16xbf16>
    %cst_170 = arith.constant dense<0.000000e+00> : vector<110x16xf32>
    %166 = tpu.matmul %163, %165, %cst_170 {dimension_numbers = #tpu.dot_dimension_numbers<[1], [0], [0], [1], [0, 0, 1, 1], [], []>} : vector<110x8xbf16>, vector<8x16xbf16>, vector<110x16xf32> -> vector<110x16xf32>
    %c0_171 = arith.constant 0 : index
    %c0_172 = arith.constant 0 : index
    %167 = vector.load %arg12[%c0_171, %c0_172] : memref<110x16xf32, #tpu.memory_space<vmem>>, vector<110x16xf32>
    %168 = arith.addf %167, %166 : vector<110x16xf32>
    %c0_173 = arith.constant 0 : index
    %c0_174 = arith.constant 0 : index
    %169 = vector.load %arg12[%c0_173, %c0_174] : memref<110x16xf32, #tpu.memory_space<vmem>>, vector<110x16xf32>
    tpu.vector_store %arg12[%c0_173, %c0_174], %168 {strides = array<i32>} : memref<110x16xf32, #tpu.memory_space<vmem>>, vector<110x16xf32>,
    %c0_175 = arith.constant 0 : index
    %c0_176 = arith.constant 0 : index
    %c16_177 = arith.constant 16 : index
    %c0_178 = arith.constant 0 : index
    %170 = vector.load %arg11[%c0_175, %c0_176, %c16_177, %c0_178] : memref<2x2x128x8xbf16, #tpu.memory_space<vmem>>, vector<1x1x110x8xbf16>
    %171 = vector.shape_cast %170 : vector<1x1x110x8xbf16> to vector<110x8xbf16>
    %c6 = arith.constant 6 : index
    %c0_179 = arith.constant 0 : index
    %c0_180 = arith.constant 0 : index
    %172 = vector.load %arg5[%c6, %c0_179, %c0_180] : memref<9x8x16xbf16, #tpu.memory_space<vmem>>, vector<1x8x16xbf16>
    %173 = vector.shape_cast %172 : vector<1x8x16xbf16> to vector<8x16xbf16>
    %cst_181 = arith.constant dense<0.000000e+00> : vector<110x16xf32>
    %174 = tpu.matmul %171, %173, %cst_181 {dimension_numbers = #tpu.dot_dimension_numbers<[1], [0], [0], [1], [0, 0, 1, 1], [], []>} : vector<110x8xbf16>, vector<8x16xbf16>, vector<110x16xf32> -> vector<110x16xf32>
    %c0_182 = arith.constant 0 : index
    %c0_183 = arith.constant 0 : index
    %175 = vector.load %arg12[%c0_182, %c0_183] : memref<110x16xf32, #tpu.memory_space<vmem>>, vector<110x16xf32>
    %176 = arith.addf %175, %174 : vector<110x16xf32>
    %c0_184 = arith.constant 0 : index
    %c0_185 = arith.constant 0 : index
    %177 = vector.load %arg12[%c0_184, %c0_185] : memref<110x16xf32, #tpu.memory_space<vmem>>, vector<110x16xf32>
    tpu.vector_store %arg12[%c0_184, %c0_185], %176 {strides = array<i32>} : memref<110x16xf32, #tpu.memory_space<vmem>>, vector<110x16xf32>,
    %c0_186 = arith.constant 0 : index
    %c1_187 = arith.constant 1 : index
    %c16_188 = arith.constant 16 : index
    %c0_189 = arith.constant 0 : index
    %178 = vector.load %arg11[%c0_186, %c1_187, %c16_188, %c0_189] : memref<2x2x128x8xbf16, #tpu.memory_space<vmem>>, vector<1x1x110x8xbf16>
    %179 = vector.shape_cast %178 : vector<1x1x110x8xbf16> to vector<110x8xbf16>
    %c7 = arith.constant 7 : index
    %c0_190 = arith.constant 0 : index
    %c0_191 = arith.constant 0 : index
    %180 = vector.load %arg5[%c7, %c0_190, %c0_191] : memref<9x8x16xbf16, #tpu.memory_space<vmem>>, vector<1x8x16xbf16>
    %181 = vector.shape_cast %180 : vector<1x8x16xbf16> to vector<8x16xbf16>
    %cst_192 = arith.constant dense<0.000000e+00> : vector<110x16xf32>
    %182 = tpu.matmul %179, %181, %cst_192 {dimension_numbers = #tpu.dot_dimension_numbers<[1], [0], [0], [1], [0, 0, 1, 1], [], []>} : vector<110x8xbf16>, vector<8x16xbf16>, vector<110x16xf32> -> vector<110x16xf32>
    %c0_193 = arith.constant 0 : index
    %c0_194 = arith.constant 0 : index
    %183 = vector.load %arg12[%c0_193, %c0_194] : memref<110x16xf32, #tpu.memory_space<vmem>>, vector<110x16xf32>
    %184 = arith.addf %183, %182 : vector<110x16xf32>
    %c0_195 = arith.constant 0 : index
    %c0_196 = arith.constant 0 : index
    %185 = vector.load %arg12[%c0_195, %c0_196] : memref<110x16xf32, #tpu.memory_space<vmem>>, vector<110x16xf32>
    tpu.vector_store %arg12[%c0_195, %c0_196], %184 {strides = array<i32>} : memref<110x16xf32, #tpu.memory_space<vmem>>, vector<110x16xf32>,
    %c0_197 = arith.constant 0 : index
    %c0_198 = arith.constant 0 : index
    %c18_199 = arith.constant 18 : index
    %c0_200 = arith.constant 0 : index
    %186 = vector.load %arg11[%c0_197, %c0_198, %c18_199, %c0_200] : memref<2x2x128x8xbf16, #tpu.memory_space<vmem>>, vector<1x1x110x8xbf16>
    %187 = vector.shape_cast %186 : vector<1x1x110x8xbf16> to vector<110x8xbf16>
    %c8 = arith.constant 8 : index
    %c0_201 = arith.constant 0 : index
    %c0_202 = arith.constant 0 : index
    %188 = vector.load %arg5[%c8, %c0_201, %c0_202] : memref<9x8x16xbf16, #tpu.memory_space<vmem>>, vector<1x8x16xbf16>
    %189 = vector.shape_cast %188 : vector<1x8x16xbf16> to vector<8x16xbf16>
    %cst_203 = arith.constant dense<0.000000e+00> : vector<110x16xf32>
    %190 = tpu.matmul %187, %189, %cst_203 {dimension_numbers = #tpu.dot_dimension_numbers<[1], [0], [0], [1], [0, 0, 1, 1], [], []>} : vector<110x8xbf16>, vector<8x16xbf16>, vector<110x16xf32> -> vector<110x16xf32>
    %c0_204 = arith.constant 0 : index
    %c0_205 = arith.constant 0 : index
    %191 = vector.load %arg12[%c0_204, %c0_205] : memref<110x16xf32, #tpu.memory_space<vmem>>, vector<110x16xf32>
    %192 = arith.addf %191, %190 : vector<110x16xf32>
    %c0_206 = arith.constant 0 : index
    %c0_207 = arith.constant 0 : index
    %193 = vector.load %arg12[%c0_206, %c0_207] : memref<110x16xf32, #tpu.memory_space<vmem>>, vector<110x16xf32>
    tpu.vector_store %arg12[%c0_206, %c0_207], %192 {strides = array<i32>} : memref<110x16xf32, #tpu.memory_space<vmem>>, vector<110x16xf32>,
    %c0_208 = arith.constant 0 : index
    %c0_209 = arith.constant 0 : index
    %194 = vector.load %arg12[%c0_208, %c0_209] : memref<110x16xf32, #tpu.memory_space<vmem>>, vector<110x16xf32>
    %c0_210 = arith.constant 0 : index
    %c0_211 = arith.constant 0 : index
    %195 = vector.load %arg6[%c0_210, %c0_211] : memref<1x16xf32, #tpu.memory_space<vmem>>, vector<1x16xf32>
    %196 = vector.broadcast %195 : vector<1x16xf32> to vector<110x16xf32>
    %197 = arith.addf %194, %196 : vector<110x16xf32>
    %cst_212 = arith.constant 0.000000e+00 : f32
    %198 = vector.broadcast %cst_212 : f32 to vector<110x16xf32>
    %199 = arith.maximumf %197, %198 : vector<110x16xf32>
    %200 = vector.extract_strided_slice %199 {offsets = [0, 0], sizes = [2, 16], strides = [1, 1]} : vector<110x16xf32> to vector<2x16xf32>
    %201 = vector.extract_strided_slice %199 {offsets = [2, 0], sizes = [2, 16], strides = [1, 1]} : vector<110x16xf32> to vector<2x16xf32>
    %202 = vector.extract_strided_slice %199 {offsets = [4, 0], sizes = [2, 16], strides = [1, 1]} : vector<110x16xf32> to vector<2x16xf32>
    %203 = vector.extract_strided_slice %199 {offsets = [6, 0], sizes = [2, 16], strides = [1, 1]} : vector<110x16xf32> to vector<2x16xf32>
    %204 = vector.extract_strided_slice %199 {offsets = [8, 0], sizes = [2, 16], strides = [1, 1]} : vector<110x16xf32> to vector<2x16xf32>
    %205 = vector.extract_strided_slice %199 {offsets = [10, 0], sizes = [2, 16], strides = [1, 1]} : vector<110x16xf32> to vector<2x16xf32>
    %206 = vector.extract_strided_slice %199 {offsets = [12, 0], sizes = [2, 16], strides = [1, 1]} : vector<110x16xf32> to vector<2x16xf32>
    %207 = vector.extract_strided_slice %199 {offsets = [14, 0], sizes = [2, 16], strides = [1, 1]} : vector<110x16xf32> to vector<2x16xf32>
    %208 = vector.extract_strided_slice %199 {offsets = [16, 0], sizes = [2, 16], strides = [1, 1]} : vector<110x16xf32> to vector<2x16xf32>
    %209 = vector.extract_strided_slice %199 {offsets = [18, 0], sizes = [2, 16], strides = [1, 1]} : vector<110x16xf32> to vector<2x16xf32>
    %210 = vector.extract_strided_slice %199 {offsets = [20, 0], sizes = [2, 16], strides = [1, 1]} : vector<110x16xf32> to vector<2x16xf32>
    %211 = vector.extract_strided_slice %199 {offsets = [22, 0], sizes = [2, 16], strides = [1, 1]} : vector<110x16xf32> to vector<2x16xf32>
    %212 = vector.extract_strided_slice %199 {offsets = [24, 0], sizes = [2, 16], strides = [1, 1]} : vector<110x16xf32> to vector<2x16xf32>
    %213 = vector.extract_strided_slice %199 {offsets = [26, 0], sizes = [2, 16], strides = [1, 1]} : vector<110x16xf32> to vector<2x16xf32>
    %214 = vector.extract_strided_slice %199 {offsets = [28, 0], sizes = [2, 16], strides = [1, 1]} : vector<110x16xf32> to vector<2x16xf32>
    %215 = vector.extract_strided_slice %199 {offsets = [30, 0], sizes = [2, 16], strides = [1, 1]} : vector<110x16xf32> to vector<2x16xf32>
    %216 = vector.extract_strided_slice %199 {offsets = [32, 0], sizes = [2, 16], strides = [1, 1]} : vector<110x16xf32> to vector<2x16xf32>
    %217 = vector.extract_strided_slice %199 {offsets = [34, 0], sizes = [2, 16], strides = [1, 1]} : vector<110x16xf32> to vector<2x16xf32>
    %218 = vector.extract_strided_slice %199 {offsets = [36, 0], sizes = [2, 16], strides = [1, 1]} : vector<110x16xf32> to vector<2x16xf32>
    %219 = vector.extract_strided_slice %199 {offsets = [38, 0], sizes = [2, 16], strides = [1, 1]} : vector<110x16xf32> to vector<2x16xf32>
    %220 = vector.extract_strided_slice %199 {offsets = [40, 0], sizes = [2, 16], strides = [1, 1]} : vector<110x16xf32> to vector<2x16xf32>
    %221 = vector.extract_strided_slice %199 {offsets = [42, 0], sizes = [2, 16], strides = [1, 1]} : vector<110x16xf32> to vector<2x16xf32>
    %222 = vector.extract_strided_slice %199 {offsets = [44, 0], sizes = [2, 16], strides = [1, 1]} : vector<110x16xf32> to vector<2x16xf32>
    %223 = vector.extract_strided_slice %199 {offsets = [46, 0], sizes = [2, 16], strides = [1, 1]} : vector<110x16xf32> to vector<2x16xf32>
    %224 = vector.extract_strided_slice %199 {offsets = [48, 0], sizes = [2, 16], strides = [1, 1]} : vector<110x16xf32> to vector<2x16xf32>
    %225 = vector.extract_strided_slice %199 {offsets = [50, 0], sizes = [2, 16], strides = [1, 1]} : vector<110x16xf32> to vector<2x16xf32>
    %226 = vector.extract_strided_slice %199 {offsets = [52, 0], sizes = [2, 16], strides = [1, 1]} : vector<110x16xf32> to vector<2x16xf32>
    %227 = vector.extract_strided_slice %199 {offsets = [54, 0], sizes = [2, 16], strides = [1, 1]} : vector<110x16xf32> to vector<2x16xf32>
    %228 = vector.extract_strided_slice %199 {offsets = [56, 0], sizes = [2, 16], strides = [1, 1]} : vector<110x16xf32> to vector<2x16xf32>
    %229 = vector.extract_strided_slice %199 {offsets = [58, 0], sizes = [2, 16], strides = [1, 1]} : vector<110x16xf32> to vector<2x16xf32>
    %230 = vector.extract_strided_slice %199 {offsets = [60, 0], sizes = [2, 16], strides = [1, 1]} : vector<110x16xf32> to vector<2x16xf32>
    %231 = vector.extract_strided_slice %199 {offsets = [62, 0], sizes = [2, 16], strides = [1, 1]} : vector<110x16xf32> to vector<2x16xf32>
    %232 = vector.extract_strided_slice %199 {offsets = [64, 0], sizes = [2, 16], strides = [1, 1]} : vector<110x16xf32> to vector<2x16xf32>
    %233 = vector.extract_strided_slice %199 {offsets = [66, 0], sizes = [2, 16], strides = [1, 1]} : vector<110x16xf32> to vector<2x16xf32>
    %234 = vector.extract_strided_slice %199 {offsets = [68, 0], sizes = [2, 16], strides = [1, 1]} : vector<110x16xf32> to vector<2x16xf32>
    %235 = vector.extract_strided_slice %199 {offsets = [70, 0], sizes = [2, 16], strides = [1, 1]} : vector<110x16xf32> to vector<2x16xf32>
    %236 = vector.extract_strided_slice %199 {offsets = [72, 0], sizes = [2, 16], strides = [1, 1]} : vector<110x16xf32> to vector<2x16xf32>
    %237 = vector.extract_strided_slice %199 {offsets = [74, 0], sizes = [2, 16], strides = [1, 1]} : vector<110x16xf32> to vector<2x16xf32>
    %238 = vector.extract_strided_slice %199 {offsets = [76, 0], sizes = [2, 16], strides = [1, 1]} : vector<110x16xf32> to vector<2x16xf32>
    %239 = vector.extract_strided_slice %199 {offsets = [78, 0], sizes = [2, 16], strides = [1, 1]} : vector<110x16xf32> to vector<2x16xf32>
    %240 = vector.extract_strided_slice %199 {offsets = [80, 0], sizes = [2, 16], strides = [1, 1]} : vector<110x16xf32> to vector<2x16xf32>
    %241 = vector.extract_strided_slice %199 {offsets = [82, 0], sizes = [2, 16], strides = [1, 1]} : vector<110x16xf32> to vector<2x16xf32>
    %242 = vector.extract_strided_slice %199 {offsets = [84, 0], sizes = [2, 16], strides = [1, 1]} : vector<110x16xf32> to vector<2x16xf32>
    %243 = vector.extract_strided_slice %199 {offsets = [86, 0], sizes = [2, 16], strides = [1, 1]} : vector<110x16xf32> to vector<2x16xf32>
    %244 = vector.extract_strided_slice %199 {offsets = [88, 0], sizes = [2, 16], strides = [1, 1]} : vector<110x16xf32> to vector<2x16xf32>
    %245 = vector.extract_strided_slice %199 {offsets = [90, 0], sizes = [2, 16], strides = [1, 1]} : vector<110x16xf32> to vector<2x16xf32>
    %246 = vector.extract_strided_slice %199 {offsets = [92, 0], sizes = [2, 16], strides = [1, 1]} : vector<110x16xf32> to vector<2x16xf32>
    %247 = vector.extract_strided_slice %199 {offsets = [94, 0], sizes = [2, 16], strides = [1, 1]} : vector<110x16xf32> to vector<2x16xf32>
    %248 = vector.extract_strided_slice %199 {offsets = [96, 0], sizes = [2, 16], strides = [1, 1]} : vector<110x16xf32> to vector<2x16xf32>
    %249 = vector.extract_strided_slice %199 {offsets = [98, 0], sizes = [2, 16], strides = [1, 1]} : vector<110x16xf32> to vector<2x16xf32>
    %250 = vector.extract_strided_slice %199 {offsets = [100, 0], sizes = [2, 16], strides = [1, 1]} : vector<110x16xf32> to vector<2x16xf32>
    %251 = vector.extract_strided_slice %199 {offsets = [102, 0], sizes = [2, 16], strides = [1, 1]} : vector<110x16xf32> to vector<2x16xf32>
    %252 = vector.extract_strided_slice %199 {offsets = [104, 0], sizes = [2, 16], strides = [1, 1]} : vector<110x16xf32> to vector<2x16xf32>
    %253 = vector.extract_strided_slice %199 {offsets = [106, 0], sizes = [2, 16], strides = [1, 1]} : vector<110x16xf32> to vector<2x16xf32>
    %254 = vector.extract_strided_slice %199 {offsets = [108, 0], sizes = [2, 16], strides = [1, 1]} : vector<110x16xf32> to vector<2x16xf32>
    %255 = tpu.concatenate %200, %201, %202, %203, %204, %205, %206, %207, %208, %209, %210, %211, %212, %213, %214, %215 in 1 : vector<2x16xf32>, vector<2x16xf32>, vector<2x16xf32>, vector<2x16xf32>, vector<2x16xf32>, vector<2x16xf32>, vector<2x16xf32>, vector<2x16xf32>, vector<2x16xf32>, vector<2x16xf32>, vector<2x16xf32>, vector<2x16xf32>, vector<2x16xf32>, vector<2x16xf32>, vector<2x16xf32>, vector<2x16xf32> -> vector<2x256xf32>
    %256 = tpu.concatenate %216, %217, %218, %219, %220, %221, %222, %223, %224, %225, %226, %227, %228, %229, %230, %231 in 1 : vector<2x16xf32>, vector<2x16xf32>, vector<2x16xf32>, vector<2x16xf32>, vector<2x16xf32>, vector<2x16xf32>, vector<2x16xf32>, vector<2x16xf32>, vector<2x16xf32>, vector<2x16xf32>, vector<2x16xf32>, vector<2x16xf32>, vector<2x16xf32>, vector<2x16xf32>, vector<2x16xf32>, vector<2x16xf32> -> vector<2x256xf32>
    %257 = tpu.concatenate %232, %233, %234, %235, %236, %237, %238, %239, %240, %241, %242, %243, %244, %245, %246, %247 in 1 : vector<2x16xf32>, vector<2x16xf32>, vector<2x16xf32>, vector<2x16xf32>, vector<2x16xf32>, vector<2x16xf32>, vector<2x16xf32>, vector<2x16xf32>, vector<2x16xf32>, vector<2x16xf32>, vector<2x16xf32>, vector<2x16xf32>, vector<2x16xf32>, vector<2x16xf32>, vector<2x16xf32>, vector<2x16xf32> -> vector<2x256xf32>
    %258 = tpu.concatenate %248, %249, %250, %251, %252, %253, %254 in 1 : vector<2x16xf32>, vector<2x16xf32>, vector<2x16xf32>, vector<2x16xf32>, vector<2x16xf32>, vector<2x16xf32>, vector<2x16xf32> -> vector<2x112xf32>
    %259 = tpu.concatenate %255, %256, %257, %258 in 1 : vector<2x256xf32>, vector<2x256xf32>, vector<2x256xf32>, vector<2x112xf32> -> vector<2x880xf32>
    %260 = arith.truncf %259 : vector<2x880xf32> to vector<2x880xbf16>
    %c0_213 = arith.constant 0 : index
    %c0_214 = arith.constant 0 : index
    %261 = vector.load %arg7[%c0_213, %c0_214] : memref<880x64xbf16, #tpu.memory_space<vmem>>, vector<880x64xbf16>
    %cst_215 = arith.constant dense<0.000000e+00> : vector<2x64xf32>
    %262 = tpu.matmul %260, %261, %cst_215 {dimension_numbers = #tpu.dot_dimension_numbers<[1], [0], [0], [1], [0, 0, 1, 1], [], []>} : vector<2x880xbf16>, vector<880x64xbf16>, vector<2x64xf32> -> vector<2x64xf32>
    %c0_216 = arith.constant 0 : index
    %c0_217 = arith.constant 0 : index
    %263 = vector.load %arg8[%c0_216, %c0_217] : memref<1x64xf32, #tpu.memory_space<vmem>>, vector<1x64xf32>
    %264 = vector.broadcast %263 : vector<1x64xf32> to vector<2x64xf32>
    %265 = arith.addf %262, %264 : vector<2x64xf32>
    %cst_218 = arith.constant 0.000000e+00 : f32
    %266 = vector.broadcast %cst_218 : f32 to vector<2x64xf32>
    %267 = arith.maximumf %265, %266 : vector<2x64xf32>
    %c0_219 = arith.constant 0 : index
    %c0_220 = arith.constant 0 : index
    %c0_221 = arith.constant 0 : index
    %268 = vector.load %arg2[%c0_219, %c0_220, %c0_221] : memref<1x2x6xf32, #tpu.memory_space<vmem>>, vector<1x2x6xf32>
    %269 = vector.shape_cast %268 : vector<1x2x6xf32> to vector<2x6xf32>
    %c0_222 = arith.constant 0 : index
    %c0_223 = arith.constant 0 : index
    %270 = vector.load %arg9[%c0_222, %c0_223] : memref<64x4xf32, #tpu.memory_space<vmem>>, vector<64x4xf32>
    %cst_224 = arith.constant dense<0.000000e+00> : vector<2x4xf32>
    %271 = tpu.matmul %267, %270, %cst_224 {dimension_numbers = #tpu.dot_dimension_numbers<[1], [0], [0], [1], [0, 0, 1, 1], [], []>} : vector<2x64xf32>, vector<64x4xf32>, vector<2x4xf32> -> vector<2x4xf32>
    %272 = vector.extract_strided_slice %269 {offsets = [0, 0], sizes = [2, 4], strides = [1, 1]} : vector<2x6xf32> to vector<2x4xf32>
    %273 = arith.addf %271, %272 : vector<2x4xf32>
    %274 = vector.extract_strided_slice %273 {offsets = [0, 0], sizes = [2, 2], strides = [1, 1]} : vector<2x4xf32> to vector<2x2xf32>
    %275 = vector.extract_strided_slice %273 {offsets = [0, 2], sizes = [2, 2], strides = [1, 1]} : vector<2x4xf32> to vector<2x2xf32>
    %cst_225 = arith.constant 5.000000e-01 : f32
    %276 = vector.broadcast %cst_225 : f32 to vector<2x2xf32>
    %277 = arith.mulf %276, %275 : vector<2x2xf32>
    %278 = math.exp %277 : vector<2x2xf32>
    %279 = arith.mulf %278, %278 : vector<2x2xf32>
    %280 = vector.extract_strided_slice %269 {offsets = [0, 4], sizes = [2, 2], strides = [1, 1]} : vector<2x6xf32> to vector<2x2xf32>
    %281 = arith.mulf %278, %280 : vector<2x2xf32>
    %282 = arith.addf %274, %281 : vector<2x2xf32>
    %283 = tpu.concatenate %282, %273, %278, %279 in 1 : vector<2x2xf32>, vector<2x4xf32>, vector<2x2xf32>, vector<2x2xf32> -> vector<2x10xf32>
    %c0_226 = arith.constant 0 : index
    %c0_227 = arith.constant 0 : index
    %c0_228 = arith.constant 0 : index
    %284 = vector.load %arg10[%c0_226, %c0_227, %c0_228] : memref<1x2x10xf32, #tpu.memory_space<vmem>>, vector<1x2x10xf32>
    %285 = vector.shape_cast %284 : vector<1x2x10xf32> to vector<2x10xf32>
    %286 = vector.shape_cast %283 : vector<2x10xf32> to vector<1x2x10xf32>
    tpu.vector_store %arg10[%c0_226, %c0_227, %c0_228], %286 {strides = array<i32>} : memref<1x2x10xf32, #tpu.memory_space<vmem>>, vector<1x2x10xf32>,
    return
  }
  func.func @transform_0(%arg0: i32) -> (i32, i32, i32) {
    %c0_i32 = arith.constant 0 : i32
    %c0_i32_0 = arith.constant 0 : i32
    %c0_i32_1 = arith.constant 0 : i32
    return %arg0, %c0_i32, %c0_i32_0 : i32, i32, i32
  }
  func.func @transform_1(%arg0: i32) -> (i32, i32, i32) {
    %c0_i32 = arith.constant 0 : i32
    %c0_i32_0 = arith.constant 0 : i32
    %c0_i32_1 = arith.constant 0 : i32
    return %arg0, %c0_i32, %c0_i32_0 : i32, i32, i32
  }
  func.func @transform_2(%arg0: i32) -> (i32, i32) {
    %c0_i32 = arith.constant 0 : i32
    %c0_i32_0 = arith.constant 0 : i32
    %c0_i32_1 = arith.constant 0 : i32
    return %c0_i32, %c0_i32_0 : i32, i32
  }
  func.func @transform_3(%arg0: i32) -> (i32, i32) {
    %c0_i32 = arith.constant 0 : i32
    %c0_i32_0 = arith.constant 0 : i32
    %c0_i32_1 = arith.constant 0 : i32
    return %c0_i32, %c0_i32_0 : i32, i32
  }
  func.func @transform_4(%arg0: i32) -> (i32, i32, i32) {
    %c0_i32 = arith.constant 0 : i32
    %c0_i32_0 = arith.constant 0 : i32
    %c0_i32_1 = arith.constant 0 : i32
    %c0_i32_2 = arith.constant 0 : i32
    return %c0_i32, %c0_i32_0, %c0_i32_1 : i32, i32, i32
  }
  func.func @transform_5(%arg0: i32) -> (i32, i32) {
    %c0_i32 = arith.constant 0 : i32
    %c0_i32_0 = arith.constant 0 : i32
    %c0_i32_1 = arith.constant 0 : i32
    return %c0_i32, %c0_i32_0 : i32, i32
  }
  func.func @transform_6(%arg0: i32) -> (i32, i32) {
    %c0_i32 = arith.constant 0 : i32
    %c0_i32_0 = arith.constant 0 : i32
    %c0_i32_1 = arith.constant 0 : i32
    return %c0_i32, %c0_i32_0 : i32, i32
  }
  func.func @transform_7(%arg0: i32) -> (i32, i32) {
    %c0_i32 = arith.constant 0 : i32
    %c0_i32_0 = arith.constant 0 : i32
    %c0_i32_1 = arith.constant 0 : i32
    return %c0_i32, %c0_i32_0 : i32, i32
  }
  func.func @transform_8(%arg0: i32) -> (i32, i32) {
    %c0_i32 = arith.constant 0 : i32
    %c0_i32_0 = arith.constant 0 : i32
    %c0_i32_1 = arith.constant 0 : i32
    return %c0_i32, %c0_i32_0 : i32, i32
  }
  func.func @transform_9(%arg0: i32) -> (i32, i32, i32) {
    %c0_i32 = arith.constant 0 : i32
    %c0_i32_0 = arith.constant 0 : i32
    %c0_i32_1 = arith.constant 0 : i32
    return %arg0, %c0_i32, %c0_i32_0 : i32, i32, i32
  }
}

</mosaic_0001>

<bundles_post_ra>
// kernel: encoder_forward.1
= control target key start
LH: loop header
LB: loop body
LE: loop exit
PB: predicated region body
PF: predicated region fallthrough
CT: control target
= control target key end

     0   :  { %vm328_vm0 = vcmask 1043456   ;;  %vm329_vm1 = vcmask 1044480   ;;  %v4333_v0 = vmov 0.0   ;;  %v4334_v2 = vmov 65535   ;;  %s4337_s12 = smov 48   ;;  %s4341_s23 = smov 96   ;;  %s5622_s2 = inlined_call_operand.vmem [shape: bf16[9,8], index: 2, kind: input, shape index: {}]   ;;  %s5623_s0 = inlined_call_operand.vmem [shape: bf16[1,392,9], index: 0, kind: input, shape index: {}]   ;;  %s5624_s4 = inlined_call_operand.vmem [shape: bf16[9,8,16], index: 4, kind: input, shape index: {}]   ;;  %s5625_s3 = inlined_call_operand.vmem [shape: f32[1,8], index: 3, kind: input, shape index: {}]   ;;  %s5626_s6 = inlined_call_operand.vmem [shape: bf16[880,64], index: 6, kind: input, shape index: {}]   ;;  %s5627_s5 = inlined_call_operand.vmem [shape: f32[1,16], index: 5, kind: input, shape index: {}]   ;;  %s5628_s8 = inlined_call_operand.vmem [shape: f32[64,4], index: 8, kind: input, shape index: {}]   ;;  %s5629_s1 = inlined_call_operand.vmem [shape: f32[1,2,6], index: 1, kind: input, shape index: {}]   ;;  %s5630_s7 = inlined_call_operand.vmem [shape: f32[1,64], index: 7, kind: input, shape index: {}]   ;;  %s5631_s9 = inlined_call_operand.vmem [shape: f32[1,2,10], index: 9, kind: output, shape index: {}]  }
   0x1   :  { %3706 = vmatprep.subr.bf16.mxu0 %v4333_v0  ;;  %v4250_v1 = vld [vmem:[%s5622_s2] sm:$0x1f]   ;;  %4127 = vmatprep.subr.bf16.mxu1 %v4333_v0  ;;  %v330_v3 = vsel %vm328_vm0, 4294967295, %v4334_v2  ;;  %vm4335_vm2 = vmmov 0   ;;  %vm252_vm3 = vcmask 72704   ;;  %v4252_v7 = vld [vmem:[%s5623_s0 + $0x8] sm:$0xff]  }
   0x2   :  { %v331_v4 = vsel %vm329_vm1, %v330_v3, 0  ;;  %3708 = vmatprep.mubr.msk.bf16.mxu0 %vm4335_vm2, %v4333_v0  ;;  %3804 = vmatprep.mubr.msk.bf16.mxu1 %vm4335_vm2, %v4333_v0  ;;  %v4251_v6 = vld [vmem:[%s5623_s0] sm:$0xff]   ;;  %v4253_v8 = vld [vmem:[%s5623_s0 + $0x10] sm:$0xff]   ;;  %v4254_v9 = vld [vmem:[%s5623_s0 + $0x18] sm:$0xff]   ;;  %vm33_vm4 = vcmask 64512   ;;  %v4336_v19 = vmov 0  }
   0x3   :  { %v333_v5 = vand.u32 %v4250_v1, %v331_v4  ;;  %v4255_v10 = vld [vmem:[%s5623_s0 + $0x20] sm:$0xff]   ;;  %v4256_v11 = vld [vmem:[%s5623_s0 + $0x28] sm:$0xff]   ;;  %v4257_v12 = vld [vmem:[%s5623_s0 + $0x30] sm:$0xff]   ;;  %58 = vst.msk [vmem:[#allocation2 + $0xc0] sm:$0xff] %vm33_vm4, %v4336_v19  ;;  %vm642_vm5 = vcmask 63488   ;;  %vm646_vm6 = vcmask 1040384  }
   0x4   :  { %v4258_v13 = vld [vmem:[%s5623_s0 + $0x38] sm:$0xff]   ;;  %v4275_v14 = vld [vmem:[%s5623_s0 + $0xc0] ss:$0 sps:$4 sm:$0xff]   ;;  %v4260_v16 = vld [vmem:[%s5623_s0 + $0x48] sm:$0xff]   ;;  %34 = vst.msk [vmem:[#allocation2] sm:$0xff] %vm33_vm4, %v4336_v19  ;;  %vm653_vm7 = vcmask 1041408  }
   0x5   :  { %3707 = vmatpush3.bf16.msra.mxu0 %v333_v5  ;;  %4128 = vmatpush3.bf16.msra.mxu1 %v333_v5  ;;  %v4259_v15 = vld [vmem:[%s5623_s0 + $0x40] sm:$0xff]   ;;  %v4261_v17 = vld [vmem:[%s5623_s0 + $0x50] sm:$0xff]   ;;  %v4262_v18 = vld [vmem:[%s5623_s0 + $0x58] sm:$0xff]   ;;  %35 = vst.msk [vmem:[#allocation2 + $0x8] sm:$0xff] %vm33_vm4, %v4336_v19  ;;  %vm660_vm8 = vcmask 1042432   ;;  %vm688_vm9 = vcmask 64513  }
   0x6   :  { %3928 = vmatprep.subr.bf16.mxu0 %v4333_v0  ;;  %3808 = vmatprep.subr.bf16.mxu1 %v4333_v0  ;;  %36 = vst.msk [vmem:[#allocation2 + $0x10] sm:$0xff] %vm33_vm4, %v4336_v19  ;;  %37 = vst.msk [vmem:[#allocation2 + $0x18] sm:$0xff] %vm33_vm4, %v4336_v19  ;;  %v4263_v20 = vld [vmem:[%s5623_s0 + $0x60] sm:$0xff]   ;;  %v3426_v21 = vld [vmem:[%s5624_s4 + $0x10] sm:$0xf]  ;;  %vm681_vm10 = vcmask 1045504  }
   0x7   :  { %38 = vst.msk [vmem:[#allocation2 + $0x20] sm:$0xff] %vm33_vm4, %v4336_v19  ;;  %39 = vst.msk [vmem:[#allocation2 + $0x28] sm:$0xff] %vm33_vm4, %v4336_v19  ;;  %v1475_v22 = vsel %vm328_vm0, %v3426_v21, 0  ;;  %v4264_v23 = vld [vmem:[%s5623_s0 + $0x68] sm:$0xff]   ;;  %v4265_v24 = vld [vmem:[%s5623_s0 + $0x70] sm:$0xff]   ;;  %vm766_vm11 = vcmask 1046528  }
   0x8   :  { %3709 = vmatmul.mubr.msk.bf16.vlgmr.msra.gmra.mrb[0].mxu0 %vm252_vm3, %v4251_v6  ;;  %3805 = vmatmul.mubr.msk.bf16.vlgmr.msra.gmra.mrb[0].mxu1 %vm252_vm3, %v4275_v14  ;;  %40 = vst.msk [vmem:[#allocation2 + $0x30] sm:$0xff] %vm33_vm4, %v4336_v19  ;;  %41 = vst.msk [vmem:[#allocation2 + $0x38] sm:$0xff] %vm33_vm4, %v4336_v19  ;;  %v4266_v25 = vld [vmem:[%s5623_s0 + $0x78] sm:$0xff]   ;;  %v4267_v26 = vld [vmem:[%s5623_s0 + $0x80] sm:$0xff]   ;;  %vm916_vm12 = vcmask 130048   ;;  %vm930_vm13 = vcmask 128000  }
   0x9   :  { %3712 = vmatprep.mubr.msk.bf16.mxu0 %vm4335_vm2, %v4333_v0  ;;  %3810 = vmatprep.mubr.msk.bf16.mxu1 %vm4335_vm2, %v4333_v0  ;;  %42 = vst.msk [vmem:[#allocation2 + $0x40] sm:$0xff] %vm33_vm4, %v4336_v19  ;;  %43 = vst.msk [vmem:[#allocation2 + $0x48] sm:$0xff] %vm33_vm4, %v4336_v19  ;;  %v4268_v27 = vld [vmem:[%s5623_s0 + $0x88] sm:$0xff]   ;;  %v4269_v28 = vld [vmem:[%s5623_s0 + $0x90] sm:$0xff]   ;;  %s4342_s24 = smov 80   ;;  %s4343_s27 = smov 112  }
   0xa   :  { %44 = vst.msk [vmem:[#allocation2 + $0x50] sm:$0xff] %vm33_vm4, %v4336_v19  ;;  %45 = vst.msk [vmem:[#allocation2 + $0x58] sm:$0xff] %vm33_vm4, %v4336_v19  ;;  %3929 = vmatpush3.bf16.msra.mxu0 %v1475_v22  ;;  %v4270_v29 = vld [vmem:[%s5623_s0 + $0x98] sm:$0xff]   ;;  %v4271_v30 = vld [vmem:[%s5623_s0 + $0xa0] sm:$0xff]   ;;  %vm2412_vm14 = vcmask 261120   ;;  %vm2414_vm15 = vcmask 392192  }
   0xb   :  { %46 = vst.msk [vmem:[#allocation2 + $0x60] sm:$0xff] %vm33_vm4, %v4336_v19  ;;  %47 = vst.msk [vmem:[#allocation2 + $0x68] sm:$0xff] %vm33_vm4, %v4336_v19  ;;  %3988 = vmatprep.subr.bf16.mxu0 %v4333_v0  ;;  %v4272_v31 = vld [vmem:[%s5623_s0 + $0xa8] sm:$0xff]   ;;  %v4273_v32 = vld [vmem:[%s5623_s0 + $0xb0] sm:$0xff]   ;;  %s4345_s18 = smov 126  }
   0xc   :  { %48 = vst.msk [vmem:[#allocation2 + $0x70] sm:$0xff] %vm33_vm4, %v4336_v19  ;;  %49 = vst.msk [vmem:[#allocation2 + $0x78] sm:$0xff] %vm33_vm4, %v4336_v19  ;;  %v4274_v33 = vld [vmem:[%s5623_s0 + $0xb8] sm:$0xff]   ;;  %v4600_v34 = vld [vmem:[%s5625_s3] ss:$0 sm:$0xff]  ;;  %s4339_s0 = smov 32  }
   0xd   :  { %50 = vst.msk [vmem:[#allocation2 + $0x80] sm:$0xff] %vm33_vm4, %v4336_v19  ;;  %51 = vst.msk [vmem:[#allocation2 + $0x88] sm:$0xff] %vm33_vm4, %v4336_v19  ;;  %s4340_s3 = smov 64  }
   0xe   :  { %52 = vst.msk [vmem:[#allocation2 + $0x90] sm:$0xff] %vm33_vm4, %v4336_v19  ;;  %53 = vst.msk [vmem:[#allocation2 + $0x98] sm:$0xff] %vm33_vm4, %v4336_v19 }
   0xf   :  { %54 = vst.msk [vmem:[#allocation2 + $0xa0] sm:$0xff] %vm33_vm4, %v4336_v19  ;;  %55 = vst.msk [vmem:[#allocation2 + $0xa8] sm:$0xff] %vm33_vm4, %v4336_v19 }
  0x10   :  { %3713 = vmatmul.mubr.msk.bf16.gmra.mrb[4].mxu0 %vm252_vm3, %v4252_v7  ;;  %56 = vst.msk [vmem:[#allocation2 + $0xb0] sm:$0xff] %vm33_vm4, %v4336_v19  ;;  %59 = vst.msk [vmem:[#allocation2 + $0xc8] sm:$0xff] %vm33_vm4, %v4336_v19 }
  0x11   :  { %3716 = vmatprep.mubr.msk.bf16.mxu0 %vm4335_vm2, %v4333_v0  ;;  %60 = vst.msk [vmem:[#allocation2 + $0xd0] sm:$0xff] %vm33_vm4, %v4336_v19  ;;  %61 = vst.msk [vmem:[#allocation2 + $0xd8] sm:$0xff] %vm33_vm4, %v4336_v19 }
  0x12   :  { %62 = vst.msk [vmem:[#allocation2 + $0xe0] sm:$0xff] %vm33_vm4, %v4336_v19  ;;  %63 = vst.msk [vmem:[#allocation2 + $0xe8] sm:$0xff] %vm33_vm4, %v4336_v19 }
  0x13   :  { %64 = vst.msk [vmem:[#allocation2 + $0xf0] sm:$0xff] %vm33_vm4, %v4336_v19  ;;  %v795_v19 = vld [vmem:[#allocation2] sm:$0xff] }
  0x18   :  { %3717 = vmatmul.mubr.msk.bf16.gmra.mrb[8].mxu0 %vm252_vm3, %v4253_v8 }
  0x19   :  { %3720 = vmatprep.mubr.msk.bf16.mxu0 %vm4335_vm2, %v4333_v0 }
  0x20   :  { %3721 = vmatmul.mubr.msk.bf16.gmra.mrb[12].mxu0 %vm252_vm3, %v4254_v9 }
  0x21   :  { %3724 = vmatprep.mubr.msk.bf16.mxu0 %vm4335_vm2, %v4333_v0 }
  0x28   :  { %3725 = vmatmul.mubr.msk.bf16.gmra.mrb[16].mxu0 %vm252_vm3, %v4255_v10 }
  0x29   :  { %3728 = vmatprep.mubr.msk.bf16.mxu0 %vm4335_vm2, %v4333_v0 }
  0x30   :  { %3729 = vmatmul.mubr.msk.bf16.gmra.mrb[20].mxu0 %vm252_vm3, %v4256_v11 }
  0x31   :  { %3732 = vmatprep.mubr.msk.bf16.mxu0 %vm4335_vm2, %v4333_v0 }
  0x38   :  { %3733 = vmatmul.mubr.msk.bf16.gmra.mrb[24].mxu0 %vm252_vm3, %v4257_v12 }
  0x39   :  { %3736 = vmatprep.mubr.msk.bf16.mxu0 %vm4335_vm2, %v4333_v0 }
  0x40   :  { %3737 = vmatmul.mubr.msk.bf16.gmra.mrb[28].mxu0 %vm252_vm3, %v4258_v13  ;;  %v802_v13 = vld [vmem:[%s5624_s4] sm:$0xf] }
  0x41   :  { %3740 = vmatprep.mubr.msk.bf16.mxu0 %vm4335_vm2, %v4333_v0 }
  0x48   :  { %3741 = vmatmul.mubr.msk.bf16.gmra.mrb[32].mxu0 %vm252_vm3, %v4259_v15 }
  0x49   :  { %3744 = vmatprep.mubr.msk.bf16.mxu0 %vm4335_vm2, %v4333_v0 }
  0x50   :  { %3745 = vmatmul.mubr.msk.bf16.gmra.mrb[36].mxu0 %vm252_vm3, %v4260_v16  ;;  %v825_v16 = vsel %vm328_vm0, %v802_v13, 0 }
  0x51   :  { %3748 = vmatprep.mubr.msk.bf16.mxu0 %vm4335_vm2, %v4333_v0  ;;  %3809 = vmatpush3.bf16.msra.mxu1 %v825_v16 }
  0x52   :  { %3838 = vmatprep.subr.bf16.mxu1 %v4333_v0 }
  0x54   :  { %3811 = vmatmul.mubr.msk.bf16.vlgmr.msra.gmra.mrb[4].mxu1 %vm33_vm4, %v795_v19 }
  0x55   :  { %3814 = vmatprep.mubr.msk.bf16.mxu1 %vm4335_vm2, %v4333_v0 }
  0x58   :  { %3749 = vmatmul.mubr.msk.bf16.gmra.mrb[40].mxu0 %vm252_vm3, %v4261_v17 }
  0x59   :  { %3752 = vmatprep.mubr.msk.bf16.mxu0 %vm4335_vm2, %v4333_v0 }
  0x60   :  { %3753 = vmatmul.mubr.msk.bf16.gmra.mrb[44].mxu0 %vm252_vm3, %v4262_v18 }
  0x61   :  { %3756 = vmatprep.mubr.msk.bf16.mxu0 %vm4335_vm2, %v4333_v0 }
  0x68   :  { %3757 = vmatmul.mubr.msk.bf16.gmra.mrb[48].mxu0 %vm252_vm3, %v4263_v20 }
  0x69   :  { %3760 = vmatprep.mubr.msk.bf16.mxu0 %vm4335_vm2, %v4333_v0 }
  0x70   :  { %3761 = vmatmul.mubr.msk.bf16.gmra.mrb[52].mxu0 %vm252_vm3, %v4264_v23 }
  0x71   :  { %3764 = vmatprep.mubr.msk.bf16.mxu0 %vm4335_vm2, %v4333_v0 }
  0x78   :  { %3765 = vmatmul.mubr.msk.bf16.gmra.mrb[56].mxu0 %vm252_vm3, %v4265_v24 }
  0x79   :  { %3768 = vmatprep.mubr.msk.bf16.mxu0 %vm4335_vm2, %v4333_v0 }
  0x80   :  { %3769 = vmatmul.mubr.msk.bf16.gmra.mrb[60].mxu0 %vm252_vm3, %v4266_v25 }
  0x81   :  { %3772 = vmatprep.mubr.msk.bf16.mxu0 %vm4335_vm2, %v4333_v0 }
  0x88   :  { %3773 = vmatmul.mubr.msk.bf16.gmra.mrb[64].mxu0 %vm252_vm3, %v4267_v26 }
  0x89   :  { %3776 = vmatprep.mubr.msk.bf16.mxu0 %vm4335_vm2, %v4333_v0 }
  0x90   :  { %3777 = vmatmul.mubr.msk.bf16.gmra.mrb[68].mxu0 %vm252_vm3, %v4268_v27 }
  0x91   :  { %3780 = vmatprep.mubr.msk.bf16.mxu0 %vm4335_vm2, %v4333_v0 }
  0x98   :  { %3781 = vmatmul.mubr.msk.bf16.gmra.mrb[72].mxu0 %vm252_vm3, %v4269_v28 }
  0x99   :  { %3784 = vmatprep.mubr.msk.bf16.mxu0 %vm4335_vm2, %v4333_v0 }
  0xa0   :  { %3785 = vmatmul.mubr.msk.bf16.gmra.mrb[76].mxu0 %vm252_vm3, %v4270_v29 }
  0xa1   :  { %3788 = vmatprep.mubr.msk.bf16.mxu0 %vm4335_vm2, %v4333_v0 }
  0xa8   :  { %3789 = vmatmul.mubr.msk.bf16.gmra.mrb[80].mxu0 %vm252_vm3, %v4271_v30 }
  0xa9   :  { %3792 = vmatprep.mubr.msk.bf16.mxu0 %vm4335_vm2, %v4333_v0 }
  0xb0   :  { %3793 = vmatmul.mubr.msk.bf16.gmra.mrb[84].mxu0 %vm252_vm3, %v4272_v31 }
  0xb1   :  { %3796 = vmatprep.mubr.msk.bf16.mxu0 %vm4335_vm2, %v4333_v0 }
  0xb8   :  { %3797 = vmatmul.mubr.msk.bf16.gmra.mrb[88].mxu0 %vm252_vm3, %v4273_v32  ;;  %v3442_v32 = vld [vmem:[%s5624_s4 + $0x18] sm:$0xf] }
  0xb9   :  { %3800 = vmatprep.mubr.msk.bf16.mxu0 %vm4335_vm2, %v4333_v0 }
  0xc0   :  { %3801 = vmatmul.mubr.msk.bf16.gmra.mrb[92].mxu0 %vm252_vm3, %v4274_v33  ;;  %vm2420_vm3 = vcmask 785408  }
  0xc1   :  { %3930 = vmatprep.mubr.msk.bf16.mxu0 %vm4335_vm2, %v4333_v0 }
  0xdb   :  { %v369_v35 = vpop.f32.mrb[0].mxu0 }
  0xdc   :  { %v370_v36 = vadd.f32 %v4600_v34, %v369_v35  ;;  %v3710_v37 = vpop.f32.mrb[1].mxu0  ;;  %v1823_v35 = vsel %vm328_vm0, %v3442_v32, 0 }
  0xdd   :  { %v372_v38 = vpop.f32.mrb[2].mxu0 }
  0xde   :  { %v373_v39 = vadd.f32 %v4600_v34, %v372_v38  ;;  %v3711_v40 = vpop.f32.mrb[3].mxu0  ;;  %v567_v41 = vmax.f32 %v370_v36, 0.0 }
  0xe0   :  { %v568_v42 = vmax.f32 %v373_v39, 0.0 }
  0xe2   :  { %v616_v43 = vpack.c.bf16 %v568_v42, %v567_v41 }
  0xe3   :  { %v377_v44 = vpop.f32.mrb[4].mxu0 }
  0xe4   :  { %643 = vst.msk [vmem:[#allocation2 + $0xc0] sm:$0x7f] %vm642_vm5, %v616_v43  ;;  %v378_v45 = vadd.f32 %v4600_v34, %v377_v44  ;;  %v3714_v46 = vpop.f32.mrb[5].mxu0  ;;  %v647_v55 = vrot.slane %v616_v43, 7 }
  0xe5   :  { %v380_v47 = vpop.f32.mrb[6].mxu0 }
  0xe6   :  { %v381_v48 = vadd.f32 %v4600_v34, %v380_v47  ;;  %v3715_v49 = vpop.f32.mrb[7].mxu0  ;;  %v569_v50 = vmax.f32 %v378_v45, 0.0  ;;  %v3402_v45 = vld [vmem:[%s5624_s4 + $0x4] sm:$0xf] }
  0xe8   :  { %v570_v51 = vmax.f32 %v381_v48, 0.0  ;;  %v963_v48 = vsel %vm328_vm0, %v3402_v45, 0 }
  0xe9   :  { %3839 = vmatpush3.bf16.msra.mxu1 %v963_v48 }
  0xea   :  { %v617_v52 = vpack.c.bf16 %v570_v51, %v569_v50  ;;  %3868 = vmatprep.subr.bf16.mxu1 %v4333_v0 }
  0xeb   :  { %v385_v53 = vpop.f32.mrb[8].mxu0  ;;  %v1444_v54 = vld [vmem:[#allocation2 + $0xc0] sm:$0xff] }
  0xec   :  { %v648_v56 = vrot.slane %v617_v52, 7  ;;  %v386_v57 = vadd.f32 %v4600_v34, %v385_v53  ;;  %v3718_v58 = vpop.f32.mrb[9].mxu0  ;;  %3931 = vmatmul.mubr.msk.bf16.vlgmr.msra.gmra.mrb[96].mxu0 %vm33_vm4, %v1444_v54  ;;  %v654_v4 = vrot.slane %v617_v52, 6 }
  0xed   :  { %v388_v59 = vpop.f32.mrb[10].mxu0  ;;  %3934 = vmatprep.mubr.msk.bf16.mxu0 %vm4335_vm2, %v4333_v0  ;;  %3989 = vmatpush3.bf16.msra.mxu0 %v1823_v35 }
  0xee   :  { %v649_v60 = vsel %vm646_vm6, %v647_v55, %v648_v56  ;;  %v389_v61 = vadd.f32 %v4600_v34, %v388_v59  ;;  %v3719_v62 = vpop.f32.mrb[11].mxu0  ;;  %v571_v63 = vmax.f32 %v386_v57, 0.0  ;;  %4048 = vmatprep.subr.bf16.mxu0 %v4333_v0 }
  0xef   :  { %651 = vst.msk [vmem:[#allocation2 + $0xc8] sm:$0x7f] %vm642_vm5, %v649_v60 }
  0xf0   :  { %v572_v1 = vmax.f32 %v389_v61, 0.0 }
  0xf2   :  { %v618_v2 = vpack.c.bf16 %v572_v1, %v571_v63 }
  0xf3   :  { %v393_v3 = vpop.f32.mrb[12].mxu0 }
  0xf4   :  { %v655_v5 = vrot.slane %v618_v2, 6  ;;  %v394_v6 = vadd.f32 %v4600_v34, %v393_v3  ;;  %v3722_v7 = vpop.f32.mrb[13].mxu0  ;;  %v661_v20 = vrot.slane %v618_v2, 5 }
  0xf5   :  { %v396_v8 = vpop.f32.mrb[14].mxu0 }
  0xf6   :  { %v656_v9 = vsel %vm653_vm7, %v654_v4, %v655_v5  ;;  %v397_v10 = vadd.f32 %v4600_v34, %v396_v8  ;;  %v3723_v11 = vpop.f32.mrb[15].mxu0  ;;  %v1445_v12 = vld [vmem:[#allocation2 + $0xc8] sm:$0xff]  ;;  %v573_v14 = vmax.f32 %v394_v6, 0.0  ;;  %v4662_v6 = vpop.f32.mrb[0].mxu1 }
  0xf7   :  { %658 = vst.msk [vmem:[#allocation2 + $0xd0] sm:$0x7f] %vm642_vm5, %v656_v9  ;;  %3935 = vmatmul.mubr.msk.bf16.gmra.mrb[100].mxu0 %vm33_vm4, %v1445_v12  ;;  %v3806_v11 = vpop.f32.mrb[1].mxu1 }
  0xf8   :  { %v574_v15 = vmax.f32 %v397_v10, 0.0  ;;  %3938 = vmatprep.mubr.msk.bf16.mxu0 %vm4335_vm2, %v4333_v0  ;;  %v564_v12 = vpop.f32.mrb[2].mxu1 }
  0xfa   :  { %v619_v17 = vpack.c.bf16 %v574_v15, %v573_v14  ;;  %v3807_v15 = vpop.f32.mrb[3].mxu1 }
  0xfb   :  { %v401_v18 = vpop.f32.mrb[16].mxu0 }
  0xfc   :  { %v662_v21 = vrot.slane %v619_v17, 5  ;;  %v402_v22 = vadd.f32 %v4600_v34, %v401_v18  ;;  %v3726_v23 = vpop.f32.mrb[17].mxu0  ;;  %v668_v36 = vrot.slane %v619_v17, 4 }
  0xfd   :  { %v404_v24 = vpop.f32.mrb[18].mxu0 }
  0xfe   :  { %v663_v25 = vsel %vm660_vm8, %v661_v20, %v662_v21  ;;  %v405_v26 = vadd.f32 %v4600_v34, %v404_v24  ;;  %v3727_v27 = vpop.f32.mrb[19].mxu0  ;;  %v1446_v28 = vld [vmem:[#allocation2 + $0xd0] sm:$0xff]  ;;  %v575_v29 = vmax.f32 %v402_v22, 0.0 }
  0xff   :  { %665 = vst.msk [vmem:[#allocation2 + $0xd8] sm:$0x7f] %vm642_vm5, %v663_v25  ;;  %3939 = vmatmul.mubr.msk.bf16.gmra.mrb[104].mxu0 %vm33_vm4, %v1446_v28 }
 0x100   :  { %v576_v30 = vmax.f32 %v405_v26, 0.0  ;;  %3942 = vmatprep.mubr.msk.bf16.mxu0 %vm4335_vm2, %v4333_v0 }
 0x102   :  { %v620_v31 = vpack.c.bf16 %v576_v30, %v575_v29 }
 0x103   :  { %v409_v33 = vpop.f32.mrb[20].mxu0 }
 0x104   :  { %v669_v37 = vrot.slane %v620_v31, 4  ;;  %v410_v38 = vadd.f32 %v4600_v34, %v409_v33  ;;  %v3730_v39 = vpop.f32.mrb[21].mxu0  ;;  %v675_v51 = vrot.slane %v620_v31, 3 }
 0x105   :  { %v412_v40 = vpop.f32.mrb[22].mxu0 }
 0x106   :  { %v670_v41 = vsel %vm328_vm0, %v668_v36, %v669_v37  ;;  %v413_v42 = vadd.f32 %v4600_v34, %v412_v40  ;;  %v3731_v43 = vpop.f32.mrb[23].mxu0  ;;  %v1447_v44 = vld [vmem:[#allocation2 + $0xd8] sm:$0xff]  ;;  %v577_v46 = vmax.f32 %v410_v38, 0.0 }
 0x107   :  { %672 = vst.msk [vmem:[#allocation2 + $0xe0] sm:$0x7f] %vm642_vm5, %v670_v41  ;;  %3943 = vmatmul.mubr.msk.bf16.gmra.mrb[108].mxu0 %vm33_vm4, %v1447_v44 }
 0x108   :  { %v578_v47 = vmax.f32 %v413_v42, 0.0  ;;  %3946 = vmatprep.mubr.msk.bf16.mxu0 %vm4335_vm2, %v4333_v0 }
 0x10a   :  { %v621_v49 = vpack.c.bf16 %v578_v47, %v577_v46 }
 0x10b   :  { %v417_v50 = vpop.f32.mrb[24].mxu0 }
 0x10c   :  { %v676_v52 = vrot.slane %v621_v49, 3  ;;  %v418_v53 = vadd.f32 %v4600_v34, %v417_v50  ;;  %v3734_v54 = vpop.f32.mrb[25].mxu0  ;;  %v682_v1 = vrot.slane %v621_v49, 2 }
 0x10d   :  { %v420_v55 = vpop.f32.mrb[26].mxu0 }
 0x10e   :  { %v677_v56 = vsel %vm329_vm1, %v675_v51, %v676_v52  ;;  %v421_v57 = vadd.f32 %v4600_v34, %v420_v55  ;;  %v3735_v58 = vpop.f32.mrb[27].mxu0  ;;  %v1448_v59 = vld [vmem:[#allocation2 + $0xe0] sm:$0xff]  ;;  %v579_v60 = vmax.f32 %v418_v53, 0.0 }
 0x10f   :  { %679 = vst.msk [vmem:[#allocation2 + $0xe8] sm:$0x7f] %vm642_vm5, %v677_v56  ;;  %3947 = vmatmul.mubr.msk.bf16.gmra.mrb[112].mxu0 %vm33_vm4, %v1448_v59 }
 0x110   :  { %v580_v61 = vmax.f32 %v421_v57, 0.0  ;;  %3950 = vmatprep.mubr.msk.bf16.mxu0 %vm4335_vm2, %v4333_v0 }
 0x112   :  { %v622_v62 = vpack.c.bf16 %v580_v61, %v579_v60 }
 0x113   :  { %v425_v63 = vpop.f32.mrb[28].mxu0 }
 0x114   :  { %v683_v2 = vrot.slane %v622_v62, 2  ;;  %689 = vst.msk [vmem:[#allocation2 + $0x80] sm:$0xfe] %vm688_vm9, %v622_v62  ;;  %v426_v3 = vadd.f32 %v4600_v34, %v425_v63  ;;  %v3738_v4 = vpop.f32.mrb[29].mxu0 }
 0x115   :  { %v428_v5 = vpop.f32.mrb[30].mxu0 }
 0x116   :  { %v684_v7 = vsel %vm681_vm10, %v682_v1, %v683_v2  ;;  %v429_v8 = vadd.f32 %v4600_v34, %v428_v5  ;;  %v3739_v9 = vpop.f32.mrb[31].mxu0  ;;  %v1449_v10 = vld [vmem:[#allocation2 + $0xe8] sm:$0xff]  ;;  %v581_v13 = vmax.f32 %v426_v3, 0.0 }
 0x117   :  { %686 = vst.msk [vmem:[#allocation2 + $0xf0] sm:$0x7f] %vm642_vm5, %v684_v7  ;;  %3951 = vmatmul.mubr.msk.bf16.gmra.mrb[116].mxu0 %vm33_vm4, %v1449_v10 }
 0x118   :  { %v582_v14 = vmax.f32 %v429_v8, 0.0  ;;  %3954 = vmatprep.mubr.msk.bf16.mxu0 %vm4335_vm2, %v4333_v0 }
 0x11a   :  { %v623_v16 = vpack.c.bf16 %v582_v14, %v581_v13 }
 0x11b   :  { %v433_v17 = vpop.f32.mrb[32].mxu0 }
 0x11c   :  { %v691_v18 = vrot.slane %v623_v16, 7  ;;  %v434_v19 = vadd.f32 %v4600_v34, %v433_v17  ;;  %v3742_v20 = vpop.f32.mrb[33].mxu0  ;;  %v695_v29 = vrot.slane %v623_v16, 6 }
 0x11d   :  { %v436_v21 = vpop.f32.mrb[34].mxu0 }
 0x11e   :  { %693 = vst.msk [vmem:[#allocation2 + $0x88] sm:$0xfe] %vm688_vm9, %v691_v18  ;;  %v437_v22 = vadd.f32 %v4600_v34, %v436_v21  ;;  %v3743_v23 = vpop.f32.mrb[35].mxu0  ;;  %v1450_v24 = vld [vmem:[#allocation2 + $0xf0] sm:$0x7f]  ;;  %v583_v25 = vmax.f32 %v434_v19, 0.0 }
 0x11f   :  { %3955 = vmatmul.mubr.msk.bf16.gmra.mrb[120].mxu0 %vm33_vm4, %v1450_v24 }
 0x120   :  { %v584_v26 = vmax.f32 %v437_v22, 0.0  ;;  %3990 = vmatprep.mubr.msk.bf16.mxu0 %vm4335_vm2, %v4333_v0 }
 0x122   :  { %v624_v27 = vpack.c.bf16 %v584_v26, %v583_v25 }
 0x123   :  { %v441_v28 = vpop.f32.mrb[36].mxu0 }
 0x124   :  { %v696_v30 = vrot.slane %v624_v27, 6  ;;  %v442_v31 = vadd.f32 %v4600_v34, %v441_v28  ;;  %v3746_v32 = vpop.f32.mrb[37].mxu0  ;;  %v701_v42 = vrot.slane %v624_v27, 5 }
 0x125   :  { %v444_v33 = vpop.f32.mrb[38].mxu0 }
 0x126   :  { %v697_v35 = vsel %vm653_vm7, %v695_v29, %v696_v30  ;;  %v445_v36 = vadd.f32 %v4600_v34, %v444_v33  ;;  %v3747_v37 = vpop.f32.mrb[39].mxu0  ;;  %v585_v38 = vmax.f32 %v442_v31, 0.0 }
 0x127   :  { %699 = vst.msk [vmem:[#allocation2 + $0x90] sm:$0xfe] %vm688_vm9, %v697_v35 }
 0x128   :  { %v586_v39 = vmax.f32 %v445_v36, 0.0 }
 0x12a   :  { %v625_v40 = vpack.c.bf16 %v586_v39, %v585_v38 }
 0x12b   :  { %v449_v41 = vpop.f32.mrb[40].mxu0 }
 0x12c   :  { %v702_v43 = vrot.slane %v625_v40, 5  ;;  %v450_v44 = vadd.f32 %v4600_v34, %v449_v41  ;;  %v3750_v45 = vpop.f32.mrb[41].mxu0  ;;  %v707_v54 = vrot.slane %v625_v40, 4 }
 0x12d   :  { %v452_v46 = vpop.f32.mrb[42].mxu0 }
 0x12e   :  { %v703_v47 = vsel %vm660_vm8, %v701_v42, %v702_v43  ;;  %v453_v48 = vadd.f32 %v4600_v34, %v452_v46  ;;  %v3751_v49 = vpop.f32.mrb[43].mxu0  ;;  %v587_v50 = vmax.f32 %v450_v44, 0.0 }
 0x12f   :  { %705 = vst.msk [vmem:[#allocation2 + $0x98] sm:$0xfe] %vm688_vm9, %v703_v47 }
 0x130   :  { %v588_v51 = vmax.f32 %v453_v48, 0.0 }
 0x132   :  { %v626_v52 = vpack.c.bf16 %v588_v51, %v587_v50 }
 0x133   :  { %v457_v53 = vpop.f32.mrb[44].mxu0 }
 0x134   :  { %v708_v55 = vrot.slane %v626_v52, 4  ;;  %v458_v56 = vadd.f32 %v4600_v34, %v457_v53  ;;  %v3754_v57 = vpop.f32.mrb[45].mxu0  ;;  %v713_v3 = vrot.slane %v626_v52, 3 }
 0x135   :  { %v460_v58 = vpop.f32.mrb[46].mxu0 }
 0x136   :  { %v709_v59 = vsel %vm328_vm0, %v707_v54, %v708_v55  ;;  %v461_v60 = vadd.f32 %v4600_v34, %v460_v58  ;;  %v3755_v61 = vpop.f32.mrb[47].mxu0  ;;  %v589_v62 = vmax.f32 %v458_v56, 0.0 }
 0x137   :  { %711 = vst.msk [vmem:[#allocation2 + $0xa0] sm:$0xfe] %vm688_vm9, %v709_v59 }
 0x138   :  { %v590_v63 = vmax.f32 %v461_v60, 0.0 }
 0x13a   :  { %v627_v1 = vpack.c.bf16 %v590_v63, %v589_v62 }
 0x13b   :  { %v465_v2 = vpop.f32.mrb[48].mxu0 }
 0x13c   :  { %v714_v4 = vrot.slane %v627_v1, 3  ;;  %v466_v5 = vadd.f32 %v4600_v34, %v465_v2  ;;  %v3758_v7 = vpop.f32.mrb[49].mxu0  ;;  %v719_v16 = vrot.slane %v627_v1, 2 }
 0x13d   :  { %v468_v8 = vpop.f32.mrb[50].mxu0 }
 0x13e   :  { %v715_v9 = vsel %vm329_vm1, %v713_v3, %v714_v4  ;;  %v469_v10 = vadd.f32 %v4600_v34, %v468_v8  ;;  %v3759_v11 = vpop.f32.mrb[51].mxu0  ;;  %v591_v12 = vmax.f32 %v466_v5, 0.0  ;;  %vm2418_vm1 = vcmask 654336  }
 0x13f   :  { %717 = vst.msk [vmem:[#allocation2 + $0xa8] sm:$0xfe] %vm688_vm9, %v715_v9 }
 0x140   :  { %v592_v13 = vmax.f32 %v469_v10, 0.0 }
 0x142   :  { %v628_v14 = vpack.c.bf16 %v592_v13, %v591_v12 }
 0x143   :  { %v473_v15 = vpop.f32.mrb[52].mxu0 }
 0x144   :  { %v720_v17 = vrot.slane %v628_v14, 2  ;;  %v474_v18 = vadd.f32 %v4600_v34, %v473_v15  ;;  %v3762_v19 = vpop.f32.mrb[53].mxu0 }
 0x145   :  { %v476_v20 = vpop.f32.mrb[54].mxu0 }
 0x146   :  { %v721_v21 = vsel %vm681_vm10, %v719_v16, %v720_v17  ;;  %v477_v22 = vadd.f32 %v4600_v34, %v476_v20  ;;  %v3763_v23 = vpop.f32.mrb[55].mxu0  ;;  %v593_v24 = vmax.f32 %v474_v18, 0.0 }
 0x147   :  { %723 = vst.msk [vmem:[#allocation2 + $0xb0] sm:$0xfe] %vm688_vm9, %v721_v21 }
 0x148   :  { %v594_v25 = vmax.f32 %v477_v22, 0.0 }
 0x14a   :  { %v629_v26 = vpack.c.bf16 %v594_v25, %v593_v24 }
 0x14b   :  { %v481_v27 = vpop.f32.mrb[56].mxu0 }
 0x14c   :  { %v725_v28 = vrot.slane %v629_v26, 2  ;;  %v730_v29 = vrot.slane %v629_v26, 1  ;;  %v482_v30 = vadd.f32 %v4600_v34, %v481_v27  ;;  %v3766_v31 = vpop.f32.mrb[57].mxu0 }
 0x14d   :  { %v484_v32 = vpop.f32.mrb[58].mxu0 }
 0x14e   :  { %v726_v33 = vsel %vm681_vm10, %v720_v17, %v725_v28  ;;  %732 = vst.msk [vmem:[#allocation2 + $0x50] sm:$0x7f] %vm642_vm5, %v730_v29  ;;  %v485_v35 = vadd.f32 %v4600_v34, %v484_v32  ;;  %v3767_v36 = vpop.f32.mrb[59].mxu0  ;;  %v595_v37 = vmax.f32 %v482_v30, 0.0 }
 0x14f   :  { %729 = vst.msk [vmem:[#allocation2 + $0x48] sm:$0x7f] %vm642_vm5, %v726_v33 }
 0x150   :  { %v596_v38 = vmax.f32 %v485_v35, 0.0 }
 0x152   :  { %v630_v39 = vpack.c.bf16 %v596_v38, %v595_v37 }
 0x153   :  { %v489_v40 = vpop.f32.mrb[60].mxu0 }
 0x154   :  { %733 = vst.msk [vmem:[#allocation2 + $0x58] sm:$0x7f] %vm642_vm5, %v630_v39  ;;  %v490_v41 = vadd.f32 %v4600_v34, %v489_v40  ;;  %v3770_v42 = vpop.f32.mrb[61].mxu0  ;;  %v736_v50 = vrot.slane %v630_v39, 7 }
 0x155   :  { %v492_v43 = vpop.f32.mrb[62].mxu0 }
 0x156   :  { %v493_v44 = vadd.f32 %v4600_v34, %v492_v43  ;;  %v3771_v45 = vpop.f32.mrb[63].mxu0  ;;  %v597_v46 = vmax.f32 %v490_v41, 0.0 }
 0x158   :  { %v598_v47 = vmax.f32 %v493_v44, 0.0 }
 0x15a   :  { %v631_v48 = vpack.c.bf16 %v598_v47, %v597_v46 }
 0x15b   :  { %v497_v49 = vpop.f32.mrb[64].mxu0 }
 0x15c   :  { %v737_v51 = vrot.slane %v631_v48, 7  ;;  %v498_v52 = vadd.f32 %v4600_v34, %v497_v49  ;;  %v3774_v53 = vpop.f32.mrb[65].mxu0  ;;  %v742_v62 = vrot.slane %v631_v48, 6  ;;  %v3458_v49 = vld [vmem:[%s5624_s4 + $0x20] sm:$0xf] }
 0x15d   :  { %v500_v54 = vpop.f32.mrb[66].mxu0 }
 0x15e   :  { %v738_v55 = vsel %vm646_vm6, %v736_v50, %v737_v51  ;;  %v501_v56 = vadd.f32 %v4600_v34, %v500_v54  ;;  %v3775_v57 = vpop.f32.mrb[67].mxu0  ;;  %v599_v58 = vmax.f32 %v498_v52, 0.0  ;;  %vm3334_vm6 = vcmask 48128  }
 0x15f   :  { %740 = vst.msk [vmem:[#allocation2 + $0x60] sm:$0x7f] %vm642_vm5, %v738_v55 }
 0x160   :  { %v600_v59 = vmax.f32 %v501_v56, 0.0 }
 0x162   :  { %v632_v60 = vpack.c.bf16 %v600_v59, %v599_v58 }
 0x163   :  { %v505_v61 = vpop.f32.mrb[68].mxu0 }
 0x164   :  { %v743_v63 = vrot.slane %v632_v60, 6  ;;  %v506_v1 = vadd.f32 %v4600_v34, %v505_v61  ;;  %v3778_v2 = vpop.f32.mrb[69].mxu0  ;;  %v748_v12 = vrot.slane %v632_v60, 5  ;;  %v2171_v60 = vsel %vm328_vm0, %v3458_v49, 0 }
 0x165   :  { %v508_v3 = vpop.f32.mrb[70].mxu0 }
 0x166   :  { %v744_v4 = vsel %vm653_vm7, %v742_v62, %v743_v63  ;;  %v509_v5 = vadd.f32 %v4600_v34, %v508_v3  ;;  %v3779_v7 = vpop.f32.mrb[71].mxu0  ;;  %v601_v8 = vmax.f32 %v506_v1, 0.0 }
 0x167   :  { %746 = vst.msk [vmem:[#allocation2 + $0x68] sm:$0x7f] %vm642_vm5, %v744_v4 }
 0x168   :  { %v602_v9 = vmax.f32 %v509_v5, 0.0 }
 0x16a   :  { %v633_v10 = vpack.c.bf16 %v602_v9, %v601_v8 }
 0x16b   :  { %v513_v11 = vpop.f32.mrb[72].mxu0 }
 0x16c   :  { %v749_v13 = vrot.slane %v633_v10, 5  ;;  %v514_v14 = vadd.f32 %v4600_v34, %v513_v11  ;;  %v3782_v15 = vpop.f32.mrb[73].mxu0  ;;  %v754_v24 = vrot.slane %v633_v10, 4  ;;  %v562_v10 = vadd.f32 %v4600_v34, %v4662_v6 }
 0x16d   :  { %v516_v16 = vpop.f32.mrb[74].mxu0 }
 0x16e   :  { %v750_v17 = vsel %vm660_vm8, %v748_v12, %v749_v13  ;;  %v517_v18 = vadd.f32 %v4600_v34, %v516_v16  ;;  %v3783_v19 = vpop.f32.mrb[75].mxu0  ;;  %v603_v20 = vmax.f32 %v514_v14, 0.0  ;;  %v615_v13 = vmax.f32 %v562_v10, 0.0 }
 0x16f   :  { %752 = vst.msk [vmem:[#allocation2 + $0x70] sm:$0x7f] %vm642_vm5, %v750_v17 }
 0x170   :  { %v604_v21 = vmax.f32 %v517_v18, 0.0 }
 0x172   :  { %v634_v22 = vpack.c.bf16 %v604_v21, %v603_v20 }
 0x173   :  { %v521_v23 = vpop.f32.mrb[76].mxu0 }
 0x174   :  { %v755_v25 = vrot.slane %v634_v22, 4  ;;  %v522_v26 = vadd.f32 %v4600_v34, %v521_v23  ;;  %v3786_v27 = vpop.f32.mrb[77].mxu0  ;;  %v760_v37 = vrot.slane %v634_v22, 2  ;;  %v640_v22 = vpack.c.bf16 %v615_v13, %v615_v13 }
 0x175   :  { %v524_v28 = vpop.f32.mrb[78].mxu0 }
 0x176   :  { %v756_v29 = vsel %vm328_vm0, %v754_v24, %v755_v25  ;;  %v525_v30 = vadd.f32 %v4600_v34, %v524_v28  ;;  %v3787_v31 = vpop.f32.mrb[79].mxu0  ;;  %v605_v32 = vmax.f32 %v522_v26, 0.0  ;;  %v791_v26 = vrot.slane %v640_v22, 4  ;;  %v938_v22 = vld [vmem:[#allocation2 + $0x70] sm:$0x7f] }
 0x177   :  { %758 = vst.msk [vmem:[#allocation2 + $0x78] sm:$0x7f] %vm642_vm5, %v756_v29  ;;  %vm2422_vm5 = vcmask 916480  }
 0x178   :  { %v606_v33 = vmax.f32 %v525_v30, 0.0 }
 0x17a   :  { %v635_v35 = vpack.c.bf16 %v606_v33, %v605_v32 }
 0x17b   :  { %v529_v36 = vpop.f32.mrb[80].mxu0 }
 0x17c   :  { %v761_v38 = vrot.slane %v635_v35, 2  ;;  %v530_v39 = vadd.f32 %v4600_v34, %v529_v36  ;;  %v3790_v40 = vpop.f32.mrb[81].mxu0  ;;  %v767_v50 = vrot.slane %v635_v35, 1 }
 0x17d   :  { %v532_v41 = vpop.f32.mrb[82].mxu0 }
 0x17e   :  { %v762_v42 = vsel %vm681_vm10, %v760_v37, %v761_v38  ;;  %v533_v43 = vadd.f32 %v4600_v34, %v532_v41  ;;  %v3791_v44 = vpop.f32.mrb[83].mxu0  ;;  %v607_v45 = vmax.f32 %v530_v39, 0.0  ;;  %v3410_v37 = vld [vmem:[%s5624_s4 + $0x8] sm:$0xf]  ;;  %v932_v38 = vld [vmem:[#allocation2 + $0x40] sm:$0xff] }
 0x17f   :  { %764 = vst.msk [vmem:[#allocation2 + $0x8] sm:$0xfe] %vm688_vm9, %v762_v42  ;;  %v1147_v39 = vsel %vm328_vm0, %v3410_v37, 0  ;;  %v4819_v44 = vld [vmem:[#allocation2 + $0x48] sm:$0xff] }
 0x180   :  { %v608_v46 = vmax.f32 %v533_v43, 0.0 }
 0x182   :  { %v636_v47 = vpack.c.bf16 %v608_v46, %v607_v45 }
 0x183   :  { %v537_v48 = vpop.f32.mrb[84].mxu0 }
 0x184   :  { %v768_v51 = vrot.slane %v636_v47, 1  ;;  %772 = vst.msk [vmem:[#allocation2 + $0x18] sm:$0xfe] %vm688_vm9, %v636_v47  ;;  %v538_v52 = vadd.f32 %v4600_v34, %v537_v48  ;;  %v3794_v53 = vpop.f32.mrb[85].mxu0 }
 0x185   :  { %v540_v54 = vpop.f32.mrb[86].mxu0 }
 0x186   :  { %v769_v55 = vsel %vm766_vm11, %v767_v50, %v768_v51  ;;  %v609_v56 = vmax.f32 %v538_v52, 0.0  ;;  %v541_v57 = vadd.f32 %v4600_v34, %v540_v54  ;;  %v4731_v58 = vld [vmem:[#allocation2 + $0x8] sm:$0xff]  ;;  %v3795_v59 = vpop.f32.mrb[87].mxu0  ;;  %v4835_v51 = vld [vmem:[#allocation2 + $0x50] sm:$0xff] }
 0x187   :  { %771 = vst.msk [vmem:[#allocation2 + $0x10] sm:$0xfe] %vm688_vm9, %v769_v55  ;;  %3815 = vmatmul.mubr.msk.bf16.gmra.mrb[8].mxu1 %vm33_vm4, %v4731_v58  ;;  %3991 = vmatmul.mubr.msk.bf16.vlgmr.msra.gmra.mrb[124].mxu0 %vm33_vm4, %v4731_v58  ;;  %v2120_v41 = vld [vmem:[#allocation2 + $0x8] sm:$0xfe]  ;;  %v4854_v59 = vld [vmem:[#allocation2 + $0x58] sm:$0xff] }
 0x188   :  { %v610_v61 = vmax.f32 %v541_v57, 0.0  ;;  %3818 = vmatprep.mubr.msk.bf16.mxu1 %vm4335_vm2, %v4333_v0  ;;  %3994 = vmatprep.mubr.msk.bf16.mxu0 %vm4335_vm2, %v4333_v0  ;;  %v2136_v43 = vrot.slane %v2120_v41, 1  ;;  %v1281_v41 = vld [vmem:[#allocation2 + $0x88] sm:$0xff] }
 0x189   :  { %4049 = vmatpush3.bf16.msra.mxu0 %v2171_v60 }
 0x18a   :  { %v637_v62 = vpack.c.bf16 %v610_v61, %v609_v56  ;;  %v861_v61 = vpop.f32.mrb[4].mxu1 }
 0x18b   :  { %v545_v63 = vpop.f32.mrb[88].mxu0  ;;  %v4761_v23 = vld [vmem:[#allocation2 + $0x18] sm:$0xff]  ;;  %917 = vst.msk [vmem:[#allocation3] sm:$0xff] %vm916_vm12, %v861_v61 }
 0x18c   :  { %v774_v1 = vrot.slane %v637_v62, 7  ;;  %v546_v2 = vadd.f32 %v4600_v34, %v545_v63  ;;  %v3798_v3 = vpop.f32.mrb[89].mxu0  ;;  %v778_v15 = vrot.slane %v637_v62, 6  ;;  %v2139_v50 = vrot.slane %v4761_v23, 1  ;;  %v3812_v62 = vpop.f32.mrb[5].mxu1 }
 0x18d   :  { %v548_v4 = vpop.f32.mrb[90].mxu0  ;;  %v864_v63 = vpop.f32.mrb[6].mxu1 }
 0x18e   :  { %776 = vst.msk [vmem:[#allocation2 + $0x20] sm:$0xfe] %vm688_vm9, %v774_v1  ;;  %v611_v5 = vmax.f32 %v546_v2, 0.0  ;;  %v549_v7 = vadd.f32 %v4600_v34, %v548_v4  ;;  %v4746_v8 = vld [vmem:[#allocation2 + $0x10] sm:$0xff]  ;;  %v3799_v9 = vpop.f32.mrb[91].mxu0  ;;  %v3813_v3 = vpop.f32.mrb[7].mxu1 }
 0x18f   :  { %3819 = vmatmul.mubr.msk.bf16.gmra.mrb[12].mxu1 %vm33_vm4, %v4746_v8  ;;  %3995 = vmatmul.mubr.msk.bf16.gmra.mrb[128].mxu0 %vm33_vm4, %v4746_v8  ;;  %v4817_v42 = vrot.slane %v4746_v8, 1  ;;  %918 = vst.msk [vmem:[#allocation3 + $0x8] sm:$0xff] %vm916_vm12, %v864_v63  ;;  %v4874_v8 = vld [vmem:[#allocation2 + $0x60] sm:$0xff] }
 0x190   :  { %v612_v11 = vmax.f32 %v549_v7, 0.0  ;;  %3822 = vmatprep.mubr.msk.bf16.mxu1 %vm4335_vm2, %v4333_v0  ;;  %3998 = vmatprep.mubr.msk.bf16.mxu0 %vm4335_vm2, %v4333_v0 }
 0x191   :  { %v2138_v45 = vsel %vm766_vm11, %v2136_v43, %v4817_v42  ;;  %v4839_v52 = vsel %vm766_vm11, %v4817_v42, %v2139_v50  ;;  %v4965_v43 = vld [vmem:[#allocation2 + $0x98] sm:$0xff] }
 0x192   :  { %v638_v12 = vpack.c.bf16 %v612_v11, %v611_v5 }
 0x193   :  { %v553_v14 = vpop.f32.mrb[92].mxu0 }
 0x194   :  { %v779_v16 = vrot.slane %v638_v12, 6  ;;  %v554_v6 = vadd.f32 %v4600_v34, %v553_v14  ;;  %v3802_v17 = vpop.f32.mrb[93].mxu0  ;;  %v784_v27 = vrot.slane %v638_v12, 5 }
 0x195   :  { %v556_v18 = vpop.f32.mrb[94].mxu0  ;;  %v4774_v32 = vld [vmem:[#allocation2 + $0x20] sm:$0xff] }
 0x196   :  { %v780_v19 = vsel %vm653_vm7, %v778_v15, %v779_v16  ;;  %v613_v20 = vmax.f32 %v554_v6, 0.0  ;;  %v557_v21 = vadd.f32 %v4600_v34, %v556_v18  ;;  %v3803_v24 = vpop.f32.mrb[95].mxu0  ;;  %v2141_v54 = vrot.slane %v4774_v32, 1  ;;  %v4889_v15 = vld [vmem:[#allocation2 + $0x68] sm:$0xff] }
 0x197   :  { %782 = vst.msk [vmem:[#allocation2 + $0x28] sm:$0xfe] %vm688_vm9, %v780_v19  ;;  %3823 = vmatmul.mubr.msk.bf16.gmra.mrb[16].mxu1 %vm33_vm4, %v4761_v23  ;;  %3999 = vmatmul.mubr.msk.bf16.gmra.mrb[132].mxu0 %vm33_vm4, %v4761_v23  ;;  %v1096_v24 = vld [vmem:[#allocation2] sm:$0xfe]  ;;  %vm3337_vm7 = vcmask 74752  }
 0x198   :  { %v614_v25 = vmax.f32 %v557_v21, 0.0  ;;  %3826 = vmatprep.mubr.msk.bf16.mxu1 %vm4335_vm2, %v4333_v0  ;;  %4002 = vmatprep.mubr.msk.bf16.mxu0 %vm4335_vm2, %v4333_v0  ;;  %v4857_v60 = vsel %vm766_vm11, %v2139_v50, %v2141_v54  ;;  %v1608_v50 = vld [vmem:[#allocation2 + $0x80] sm:$0xfe] }
 0x19a   :  { %v639_v34 = vpack.c.bf16 %v614_v25, %v613_v20 }
 0x19c   :  { %v785_v28 = vrot.slane %v639_v34, 5  ;;  %v790_v29 = vrot.slane %v639_v34, 4  ;;  %v1112_v34 = vrot.slane %v1096_v24, 1 }
 0x19e   :  { %v786_v30 = vsel %vm660_vm8, %v784_v27, %v785_v28  ;;  %v792_v31 = vsel %vm328_vm0, %v790_v29, %v791_v26  ;;  %v4786_v33 = vld [vmem:[#allocation2 + $0x28] sm:$0xff]  ;;  %v1113_v26 = vrot.slane %v4731_v58, 1 }
 0x19f   :  { %788 = vst.msk [vmem:[#allocation2 + $0x30] sm:$0xfe] %vm688_vm9, %v786_v30  ;;  %794 = vst.msk [vmem:[#allocation2 + $0x38] sm:$0xfe] %vm688_vm9, %v792_v31  ;;  %3827 = vmatmul.mubr.msk.bf16.gmra.mrb[20].mxu1 %vm33_vm4, %v4774_v32  ;;  %4003 = vmatmul.mubr.msk.bf16.gmra.mrb[136].mxu0 %vm33_vm4, %v4774_v32  ;;  %v2143_v2 = vrot.slane %v4786_v33, 1 }
 0x1a0   :  { %3830 = vmatprep.mubr.msk.bf16.mxu1 %vm4335_vm2, %v4333_v0  ;;  %4006 = vmatprep.mubr.msk.bf16.mxu0 %vm4335_vm2, %v4333_v0  ;;  %v3418_v27 = vld [vmem:[%s5624_s4 + $0xc] sm:$0xf]  ;;  %v1114_v32 = vsel %vm766_vm11, %v1112_v34, %v1113_v26  ;;  %v1116_v37 = vsel %vm766_vm11, %v1113_v26, %v4817_v42  ;;  %v1282_v42 = vld [vmem:[#allocation2 + $0x90] sm:$0xff]  ;;  %v1629_v26 = vrot.slane %v4965_v43, 1 }
 0x1a1   :  { %v2144_v9 = vsel %vm766_vm11, %v2141_v54, %v2143_v2  ;;  %v1311_v31 = vsel %vm328_vm0, %v3418_v27, 0 }
 0x1a6   :  { %v801_v35 = vld [vmem:[#allocation2 + $0x30] sm:$0x7f]  ;;  %v1798_v40 = vld [vmem:[#allocation2 + $0x38] sm:$0x7f] }
 0x1a7   :  { %3831 = vmatmul.mubr.msk.bf16.gmra.mrb[24].mxu1 %vm33_vm4, %v4786_v33  ;;  %4007 = vmatmul.mubr.msk.bf16.gmra.mrb[140].mxu0 %vm33_vm4, %v4786_v33  ;;  %v4796_v36 = vld [vmem:[#allocation2 + $0x30] sm:$0xff]  ;;  %v2126_v6 = vld [vmem:[#allocation2 + $0x38] sm:$0xff] }
 0x1a8   :  { %3834 = vmatprep.mubr.msk.bf16.mxu1 %vm4335_vm2, %v4333_v0  ;;  %4010 = vmatprep.mubr.msk.bf16.mxu0 %vm4335_vm2, %v4333_v0  ;;  %v2145_v11 = vrot.slane %v4796_v36, 1  ;;  %v2147_v18 = vrot.slane %v2126_v6, 1 }
 0x1aa   :  { %v2146_v16 = vsel %vm766_vm11, %v2143_v2, %v2145_v11  ;;  %v2148_v23 = vsel %vm766_vm11, %v2145_v11, %v2147_v18  ;;  %v1624_v2 = vrot.slane %v1608_v50, 1 }
 0x1af   :  { %3835 = vmatmul.mubr.msk.bf16.gmra.mrb[28].mxu1 %vm33_vm4, %v801_v35  ;;  %4011 = vmatmul.mubr.msk.bf16.gmra.mrb[144].mxu0 %vm33_vm4, %v4796_v36 }
 0x1b0   :  { %3840 = vmatprep.mubr.msk.bf16.mxu1 %vm4335_vm2, %v4333_v0  ;;  %4014 = vmatprep.mubr.msk.bf16.mxu0 %vm4335_vm2, %v4333_v0 }
 0x1b7   :  { %3841 = vmatmul.mubr.msk.bf16.vlgmr.msra.gmra.mrb[32].mxu1 %vm33_vm4, %v932_v38  ;;  %4015 = vmatmul.mubr.msk.bf16.gmra.mrb[148].mxu0 %vm33_vm4, %v1798_v40  ;;  %v3434_v38 = vld [vmem:[%s5624_s4 + $0x14] sm:$0xf]  ;;  %v1280_v40 = vld [vmem:[#allocation2 + $0x80] sm:$0xff] }
 0x1b8   :  { %3869 = vmatpush3.bf16.msra.mxu1 %v1147_v39  ;;  %3844 = vmatprep.mubr.msk.bf16.mxu1 %vm4335_vm2, %v4333_v0  ;;  %v1659_v39 = vsel %vm328_vm0, %v3434_v38, 0 }
 0x1b9   :  { %4050 = vmatprep.mubr.msk.bf16.mxu0 %vm4335_vm2, %v4333_v0  ;;  %3898 = vmatprep.subr.bf16.mxu1 %v4333_v0 }
 0x1bf   :  { %3845 = vmatmul.mubr.msk.bf16.gmra.mrb[36].mxu1 %vm33_vm4, %v4819_v44  ;;  %v4825_v46 = vpop.f32.mrb[96].mxu0  ;;  %4051 = vmatmul.mubr.msk.bf16.vlgmr.msra.gmra.mrb[152].mxu0 %vm33_vm4, %v2138_v45  ;;  %v4971_v45 = vld [vmem:[#allocation2 + $0xa0] sm:$0xff] }
 0x1c0   :  { %v3932_v47 = vpop.f32.mrb[97].mxu0  ;;  %3848 = vmatprep.mubr.msk.bf16.mxu1 %vm4335_vm2, %v4333_v0  ;;  %4054 = vmatprep.mubr.msk.bf16.mxu0 %vm4335_vm2, %v4333_v0 }
 0x1c1   :  { %v4832_v48 = vpop.f32.mrb[98].mxu0  ;;  %v4977_v47 = vld [vmem:[#allocation2 + $0xa8] sm:$0xff] }
 0x1c2   :  { %v3933_v49 = vpop.f32.mrb[99].mxu0 }
 0x1c3   :  { %v1286_v49 = vld [vmem:[#allocation2 + $0xb0] sm:$0x7f] }
 0x1c7   :  { %3849 = vmatmul.mubr.msk.bf16.gmra.mrb[40].mxu1 %vm33_vm4, %v4835_v51  ;;  %4055 = vmatmul.mubr.msk.bf16.gmra.mrb[156].mxu0 %vm33_vm4, %v4839_v52 }
 0x1c8   :  { %3852 = vmatprep.mubr.msk.bf16.mxu1 %vm4335_vm2, %v4333_v0  ;;  %4058 = vmatprep.mubr.msk.bf16.mxu0 %vm4335_vm2, %v4333_v0 }
 0x1ca   :  { %v4849_v53 = vpop.f32.mrb[100].mxu0 }
 0x1cb   :  { %v3936_v55 = vpop.f32.mrb[101].mxu0 }
 0x1cc   :  { %v4852_v56 = vpop.f32.mrb[102].mxu0  ;;  %v1625_v55 = vrot.slane %v1281_v41, 1 }
 0x1cd   :  { %v3937_v57 = vpop.f32.mrb[103].mxu0 }
 0x1ce   :  { %v3450_v57 = vld [vmem:[%s5624_s4 + $0x1c] sm:$0xf]  ;;  %s4338_s4 = smov 16  }
 0x1cf   :  { %3853 = vmatmul.mubr.msk.bf16.gmra.mrb[44].mxu1 %vm33_vm4, %v4854_v59  ;;  %4059 = vmatmul.mubr.msk.bf16.gmra.mrb[160].mxu0 %vm33_vm4, %v4857_v60 }
 0x1d0   :  { %3856 = vmatprep.mubr.msk.bf16.mxu1 %vm4335_vm2, %v4333_v0  ;;  %4062 = vmatprep.mubr.msk.bf16.mxu0 %vm4335_vm2, %v4333_v0 }
 0x1d2   :  { %v4868_v1 = vpop.f32.mrb[104].mxu0 }
 0x1d3   :  { %v3940_v4 = vpop.f32.mrb[105].mxu0 }
 0x1d4   :  { %v4872_v5 = vpop.f32.mrb[106].mxu0 }
 0x1d5   :  { %v3941_v7 = vpop.f32.mrb[107].mxu0 }
 0x1d6   :  { %v1987_v7 = vsel %vm328_vm0, %v3450_v57, 0  ;;  %v1633_v57 = vrot.slane %v4977_v47, 1  ;;  %vm2416_vm0 = vcmask 523264  }
 0x1d7   :  { %3857 = vmatmul.mubr.msk.bf16.gmra.mrb[48].mxu1 %vm33_vm4, %v4874_v8  ;;  %4063 = vmatmul.mubr.msk.bf16.gmra.mrb[164].mxu0 %vm33_vm4, %v2144_v9 }
 0x1d8   :  { %3860 = vmatprep.mubr.msk.bf16.mxu1 %vm4335_vm2, %v4333_v0  ;;  %4066 = vmatprep.mubr.msk.bf16.mxu0 %vm4335_vm2, %v4333_v0 }
 0x1da   :  { %v4884_v10 = vpop.f32.mrb[108].mxu0 }
 0x1db   :  { %v3944_v12 = vpop.f32.mrb[109].mxu0 }
 0x1dc   :  { %v4887_v13 = vpop.f32.mrb[110].mxu0 }
 0x1dd   :  { %v3945_v14 = vpop.f32.mrb[111].mxu0 }
 0x1de   :  { %v1627_v14 = vrot.slane %v1282_v42, 1 }
 0x1df   :  { %3861 = vmatmul.mubr.msk.bf16.gmra.mrb[52].mxu1 %vm33_vm4, %v4889_v15  ;;  %4067 = vmatmul.mubr.msk.bf16.gmra.mrb[168].mxu0 %vm33_vm4, %v2146_v16 }
 0x1e0   :  { %3864 = vmatprep.mubr.msk.bf16.mxu1 %vm4335_vm2, %v4333_v0  ;;  %4070 = vmatprep.mubr.msk.bf16.mxu0 %vm4335_vm2, %v4333_v0 }
 0x1e2   :  { %v4899_v17 = vpop.f32.mrb[112].mxu0 }
 0x1e3   :  { %v3948_v19 = vpop.f32.mrb[113].mxu0 }
 0x1e4   :  { %v4901_v20 = vpop.f32.mrb[114].mxu0 }
 0x1e5   :  { %v3949_v21 = vpop.f32.mrb[115].mxu0 }
 0x1e7   :  { %3865 = vmatmul.mubr.msk.bf16.gmra.mrb[56].mxu1 %vm33_vm4, %v938_v22  ;;  %4071 = vmatmul.mubr.msk.bf16.gmra.mrb[172].mxu0 %vm33_vm4, %v2148_v23  ;;  %v1628_v23 = vsel %vm766_vm11, %v1625_v55, %v1627_v14 }
 0x1e8   :  { %3870 = vmatprep.mubr.msk.bf16.mxu1 %vm4335_vm2, %v4333_v0  ;;  %4074 = vmatprep.mubr.msk.bf16.mxu0 %vm4335_vm2, %v4333_v0 }
 0x1ea   :  { %v4910_v25 = vpop.f32.mrb[116].mxu0 }
 0x1eb   :  { %v3952_v28 = vpop.f32.mrb[117].mxu0 }
 0x1ec   :  { %v4916_v29 = vpop.f32.mrb[118].mxu0 }
 0x1ed   :  { %v3953_v30 = vpop.f32.mrb[119].mxu0 }
 0x1ef   :  { %3871 = vmatmul.mubr.msk.bf16.vlgmr.msra.gmra.mrb[60].mxu1 %vm33_vm4, %v1114_v32  ;;  %4075 = vmatmul.mubr.msk.bf16.gmra.mrb[176].mxu0 %vm33_vm4, %v2147_v18 }
 0x1f0   :  { %3899 = vmatpush3.bf16.msra.mxu1 %v1311_v31  ;;  %3874 = vmatprep.mubr.msk.bf16.mxu1 %vm4335_vm2, %v4333_v0 }
 0x1f1   :  { %3958 = vmatprep.subr.bf16.mxu1 %v4333_v0 }
 0x1f2   :  { %v4925_v58 = vpop.f32.mrb[120].mxu0 }
 0x1f3   :  { %v3956_v33 = vpop.f32.mrb[121].mxu0 }
 0x1f4   :  { %v4927_v35 = vpop.f32.mrb[122].mxu0 }
 0x1f5   :  { %v3957_v36 = vpop.f32.mrb[123].mxu0 }
 0x1f6   :  { %v1630_v36 = vsel %vm766_vm11, %v1627_v14, %v1629_v26 }
 0x1f7   :  { %3875 = vmatmul.mubr.msk.bf16.gmra.mrb[64].mxu1 %vm33_vm4, %v1116_v37 }
 0x1f8   :  { %3878 = vmatprep.mubr.msk.bf16.mxu1 %vm4335_vm2, %v4333_v0 }
 0x1ff   :  { %3879 = vmatmul.mubr.msk.bf16.gmra.mrb[68].mxu1 %vm33_vm4, %v4839_v52 }
 0x200   :  { %3882 = vmatprep.mubr.msk.bf16.mxu1 %vm4335_vm2, %v4333_v0 }
 0x207   :  { %3883 = vmatmul.mubr.msk.bf16.gmra.mrb[72].mxu1 %vm33_vm4, %v4857_v60 }
 0x208   :  { %3886 = vmatprep.mubr.msk.bf16.mxu1 %vm4335_vm2, %v4333_v0 }
 0x20f   :  { %3887 = vmatmul.mubr.msk.bf16.gmra.mrb[76].mxu1 %vm33_vm4, %v2144_v9  ;;  %v1626_v9 = vsel %vm766_vm11, %v1624_v2, %v1625_v55 }
 0x210   :  { %3890 = vmatprep.mubr.msk.bf16.mxu1 %vm4335_vm2, %v4333_v0 }
 0x217   :  { %3891 = vmatmul.mubr.msk.bf16.gmra.mrb[80].mxu1 %vm33_vm4, %v2146_v16 }
 0x218   :  { %3894 = vmatprep.mubr.msk.bf16.mxu1 %vm4335_vm2, %v4333_v0 }
 0x21f   :  { %3895 = vmatmul.mubr.msk.bf16.gmra.mrb[84].mxu1 %vm33_vm4, %v2145_v11 }
 0x220   :  { %3900 = vmatprep.mubr.msk.bf16.mxu1 %vm4335_vm2, %v4333_v0 }
 0x227   :  { %3901 = vmatmul.mubr.msk.bf16.vlgmr.msra.gmra.mrb[88].mxu1 %vm33_vm4, %v1280_v40 }
 0x228   :  { %3959 = vmatpush3.bf16.msra.mxu1 %v1659_v39  ;;  %3904 = vmatprep.mubr.msk.bf16.mxu1 %vm4335_vm2, %v4333_v0  ;;  %v1631_v39 = vrot.slane %v4971_v45, 1 }
 0x229   :  { %4018 = vmatprep.subr.bf16.mxu1 %v4333_v0 }
 0x22f   :  { %3905 = vmatmul.mubr.msk.bf16.gmra.mrb[92].mxu1 %vm33_vm4, %v1281_v41 }
 0x230   :  { %3908 = vmatprep.mubr.msk.bf16.mxu1 %vm4335_vm2, %v4333_v0 }
 0x237   :  { %3909 = vmatmul.mubr.msk.bf16.gmra.mrb[96].mxu1 %vm33_vm4, %v1282_v42 }
 0x238   :  { %3912 = vmatprep.mubr.msk.bf16.mxu1 %vm4335_vm2, %v4333_v0 }
 0x23f   :  { %3913 = vmatmul.mubr.msk.bf16.gmra.mrb[100].mxu1 %vm33_vm4, %v4965_v43 }
 0x240   :  { %3916 = vmatprep.mubr.msk.bf16.mxu1 %vm4335_vm2, %v4333_v0 }
 0x247   :  { %3917 = vmatmul.mubr.msk.bf16.gmra.mrb[104].mxu1 %vm33_vm4, %v4971_v45 }
 0x248   :  { %3920 = vmatprep.mubr.msk.bf16.mxu1 %vm4335_vm2, %v4333_v0 }
 0x24f   :  { %3921 = vmatmul.mubr.msk.bf16.gmra.mrb[108].mxu1 %vm33_vm4, %v4977_v47 }
 0x250   :  { %3924 = vmatprep.mubr.msk.bf16.mxu1 %vm4335_vm2, %v4333_v0 }
 0x257   :  { %3925 = vmatmul.mubr.msk.bf16.gmra.mrb[112].mxu1 %vm33_vm4, %v1286_v49 }
 0x258   :  { %3960 = vmatprep.mubr.msk.bf16.mxu1 %vm4335_vm2, %v4333_v0 }
 0x25a   :  { %v869_v52 = vpop.f32.mrb[8].mxu1  ;;  %v4986_v54 = vpop.f32.mrb[124].mxu0 }
 0x25b   :  { %919 = vst.msk [vmem:[#allocation3 + $0x10] sm:$0xff] %vm916_vm12, %v869_v52  ;;  %v3816_v60 = vpop.f32.mrb[9].mxu1  ;;  %v3992_v61 = vpop.f32.mrb[125].mxu0  ;;  %v1632_v52 = vsel %vm766_vm11, %v1629_v26, %v1631_v39 }
 0x25c   :  { %v872_v62 = vpop.f32.mrb[10].mxu1  ;;  %v4992_v63 = vpop.f32.mrb[126].mxu0 }
 0x25d   :  { %920 = vst.msk [vmem:[#allocation3 + $0x18] sm:$0xff] %vm916_vm12, %v872_v62  ;;  %v3817_v3 = vpop.f32.mrb[11].mxu1  ;;  %v3993_v4 = vpop.f32.mrb[127].mxu0 }
 0x25f   :  { %3961 = vmatmul.mubr.msk.bf16.vlgmr.msra.gmra.mrb[116].mxu1 %vm33_vm4, %v1626_v9  ;;  %v1614_v9 = vld [vmem:[#allocation2 + $0xb0] sm:$0xff] }
 0x260   :  { %4019 = vmatpush3.bf16.msra.mxu1 %v1987_v7  ;;  %3964 = vmatprep.mubr.msk.bf16.mxu1 %vm4335_vm2, %v4333_v0  ;;  %v1634_v7 = vsel %vm766_vm11, %v1631_v39, %v1633_v57  ;;  %v1635_v14 = vrot.slane %v1614_v9, 1 }
 0x262   :  { %v877_v11 = vpop.f32.mrb[12].mxu1  ;;  %v5000_v12 = vpop.f32.mrb[128].mxu0 }
 0x263   :  { %921 = vst.msk [vmem:[#allocation3 + $0x20] sm:$0xff] %vm916_vm12, %v877_v11  ;;  %v3820_v16 = vpop.f32.mrb[13].mxu1  ;;  %v3996_v6 = vpop.f32.mrb[129].mxu0 }
 0x264   :  { %v880_v18 = vpop.f32.mrb[14].mxu1  ;;  %v5003_v19 = vpop.f32.mrb[130].mxu0 }
 0x265   :  { %922 = vst.msk [vmem:[#allocation3 + $0x28] sm:$0xff] %vm916_vm12, %v880_v18  ;;  %v3821_v21 = vpop.f32.mrb[15].mxu1  ;;  %v3997_v22 = vpop.f32.mrb[131].mxu0 }
 0x267   :  { %3965 = vmatmul.mubr.msk.bf16.gmra.mrb[120].mxu1 %vm33_vm4, %v1628_v23 }
 0x268   :  { %3968 = vmatprep.mubr.msk.bf16.mxu1 %vm4335_vm2, %v4333_v0 }
 0x26a   :  { %v885_v24 = vpop.f32.mrb[16].mxu1  ;;  %v5010_v34 = vpop.f32.mrb[132].mxu0 }
 0x26b   :  { %923 = vst.msk [vmem:[#allocation3 + $0x30] sm:$0xff] %vm916_vm12, %v885_v24  ;;  %v3824_v27 = vpop.f32.mrb[17].mxu1  ;;  %v4000_v28 = vpop.f32.mrb[133].mxu0  ;;  %v1636_v24 = vsel %vm766_vm11, %v1633_v57, %v1635_v14 }
 0x26c   :  { %v888_v30 = vpop.f32.mrb[18].mxu1  ;;  %v5014_v31 = vpop.f32.mrb[134].mxu0  ;;  %v1054_v27 = vld [vmem:[#allocation3] sm:$0xff] }
 0x26d   :  { %924 = vst.msk [vmem:[#allocation3 + $0x38] sm:$0xff] %vm916_vm12, %v888_v30  ;;  %v3825_v32 = vpop.f32.mrb[19].mxu1  ;;  %v4001_v33 = vpop.f32.mrb[135].mxu0 }
 0x26f   :  { %3969 = vmatmul.mubr.msk.bf16.gmra.mrb[124].mxu1 %vm33_vm4, %v1630_v36 }
 0x270   :  { %3972 = vmatprep.mubr.msk.bf16.mxu1 %vm4335_vm2, %v4333_v0 }
 0x272   :  { %v893_v37 = vpop.f32.mrb[20].mxu1  ;;  %v5021_v38 = vpop.f32.mrb[136].mxu0 }
 0x273   :  { %925 = vst.msk [vmem:[#allocation3 + $0x40] sm:$0xff] %vm916_vm12, %v893_v37  ;;  %v3828_v40 = vpop.f32.mrb[21].mxu1  ;;  %v4004_v41 = vpop.f32.mrb[137].mxu0  ;;  %v1055_v37 = vld [vmem:[#allocation3 + $0x8] sm:$0xff] }
 0x274   :  { %v896_v42 = vpop.f32.mrb[22].mxu1  ;;  %v5025_v43 = vpop.f32.mrb[138].mxu0 }
 0x275   :  { %926 = vst.msk [vmem:[#allocation3 + $0x48] sm:$0xff] %vm916_vm12, %v896_v42  ;;  %v3829_v49 = vpop.f32.mrb[23].mxu1  ;;  %v4005_v50 = vpop.f32.mrb[139].mxu0 }
 0x276   :  { %v1056_v50 = vld [vmem:[#allocation3 + $0x10] sm:$0xff] }
 0x277   :  { %3973 = vmatmul.mubr.msk.bf16.gmra.mrb[128].mxu1 %vm33_vm4, %v1632_v52 }
 0x278   :  { %3976 = vmatprep.mubr.msk.bf16.mxu1 %vm4335_vm2, %v4333_v0 }
 0x27a   :  { %v901_v55 = vpop.f32.mrb[24].mxu1  ;;  %v5032_v45 = vpop.f32.mrb[140].mxu0 }
 0x27b   :  { %927 = vst.msk [vmem:[#allocation3 + $0x50] sm:$0xff] %vm916_vm12, %v901_v55  ;;  %v3832_v60 = vpop.f32.mrb[25].mxu1  ;;  %v4008_v61 = vpop.f32.mrb[141].mxu0 }
 0x27c   :  { %v904_v62 = vpop.f32.mrb[26].mxu1  ;;  %v5036_v2 = vpop.f32.mrb[142].mxu0 }
 0x27d   :  { %928 = vst.msk [vmem:[#allocation3 + $0x58] sm:$0xff] %vm916_vm12, %v904_v62  ;;  %v3833_v3 = vpop.f32.mrb[27].mxu1  ;;  %v4009_v4 = vpop.f32.mrb[143].mxu0  ;;  %v1057_v62 = vld [vmem:[#allocation3 + $0x18] sm:$0xff] }
 0x27f   :  { %3977 = vmatmul.mubr.msk.bf16.gmra.mrb[132].mxu1 %vm33_vm4, %v1634_v7 }
 0x280   :  { %3980 = vmatprep.mubr.msk.bf16.mxu1 %vm4335_vm2, %v4333_v0 }
 0x282   :  { %v909_v47 = vpop.f32.mrb[28].mxu1  ;;  %v5043_v11 = vpop.f32.mrb[144].mxu0 }
 0x283   :  { %929 = vst.msk [vmem:[#allocation3 + $0x60] sm:$0xff] %vm916_vm12, %v909_v47  ;;  %v3836_v16 = vpop.f32.mrb[29].mxu1  ;;  %v4012_v6 = vpop.f32.mrb[145].mxu0 }
 0x284   :  { %v912_v18 = vpop.f32.mrb[30].mxu1  ;;  %v5046_v21 = vpop.f32.mrb[146].mxu0 }
 0x285   :  { %931 = vst.msk [vmem:[#allocation3 + $0x68] sm:$0x3f] %vm930_vm13, %v912_v18  ;;  %v3837_v22 = vpop.f32.mrb[31].mxu1  ;;  %v4013_v23 = vpop.f32.mrb[147].mxu0 }
 0x287   :  { %3981 = vmatmul.mubr.msk.bf16.gmra.mrb[136].mxu1 %vm33_vm4, %v1636_v24  ;;  %v1059_v24 = vld [vmem:[#allocation3 + $0x28] sm:$0xff] }
 0x288   :  { %3984 = vmatprep.mubr.msk.bf16.mxu1 %vm4335_vm2, %v4333_v0 }
 0x28a   :  { %v999_v26 = vpop.f32.mrb[32].mxu1  ;;  %v5053_v28 = vpop.f32.mrb[148].mxu0 }
 0x28b   :  { %v1068_v30 = vadd.f32 %v1054_v27, %v999_v26  ;;  %v3842_v32 = vpop.f32.mrb[33].mxu1  ;;  %v4016_v33 = vpop.f32.mrb[149].mxu0 }
 0x28c   :  { %v1002_v36 = vpop.f32.mrb[34].mxu1  ;;  %v5055_v39 = vpop.f32.mrb[150].mxu0  ;;  %v1060_v33 = vld [vmem:[#allocation3 + $0x30] sm:$0xff] }
 0x28d   :  { %1082 = vst.msk [vmem:[#allocation3] sm:$0xff] %vm916_vm12, %v1068_v30  ;;  %v1069_v40 = vadd.f32 %v1055_v37, %v1002_v36  ;;  %v3843_v41 = vpop.f32.mrb[35].mxu1  ;;  %v4017_v42 = vpop.f32.mrb[151].mxu0 }
 0x28f   :  { %1083 = vst.msk [vmem:[#allocation3 + $0x8] sm:$0xff] %vm916_vm12, %v1069_v40  ;;  %3985 = vmatmul.mubr.msk.bf16.gmra.mrb[140].mxu1 %vm33_vm4, %v1635_v14  ;;  %v1058_v14 = vld [vmem:[#allocation3 + $0x20] sm:$0xff] }
 0x290   :  { %4020 = vmatprep.mubr.msk.bf16.mxu1 %vm4335_vm2, %v4333_v0 }
 0x292   :  { %v1007_v49 = vpop.f32.mrb[36].mxu1  ;;  %v5062_v52 = vpop.f32.mrb[152].mxu0 }
 0x293   :  { %v1070_v55 = vadd.f32 %v1056_v50, %v1007_v49  ;;  %v3846_v57 = vpop.f32.mrb[37].mxu1  ;;  %v4052_v60 = vpop.f32.mrb[153].mxu0  ;;  %v1061_v49 = vld [vmem:[#allocation3 + $0x38] sm:$0xff] }
 0x294   :  { %v1010_v61 = vpop.f32.mrb[38].mxu1  ;;  %v5064_v3 = vpop.f32.mrb[154].mxu0 }
 0x295   :  { %1084 = vst.msk [vmem:[#allocation3 + $0x10] sm:$0xff] %vm916_vm12, %v1070_v55  ;;  %v1071_v4 = vadd.f32 %v1057_v62, %v1010_v61  ;;  %v3847_v7 = vpop.f32.mrb[39].mxu1  ;;  %v4053_v9 = vpop.f32.mrb[155].mxu0  ;;  %v1062_v61 = vld [vmem:[#allocation3 + $0x40] sm:$0xff] }
 0x297   :  { %1085 = vst.msk [vmem:[#allocation3 + $0x18] sm:$0xff] %vm916_vm12, %v1071_v4  ;;  %4021 = vmatmul.mubr.msk.bf16.vlgmr.msra.gmra.mrb[144].mxu1 %vm33_vm4, %v4819_v44 }
 0x298   :  { %4024 = vmatprep.mubr.msk.bf16.mxu1 %vm4335_vm2, %v4333_v0 }
 0x29a   :  { %v1015_v47 = vpop.f32.mrb[40].mxu1  ;;  %v5072_v16 = vpop.f32.mrb[156].mxu0 }
 0x29b   :  { %v1072_v6 = vadd.f32 %v1058_v14, %v1015_v47  ;;  %v3850_v18 = vpop.f32.mrb[41].mxu1  ;;  %v4056_v22 = vpop.f32.mrb[157].mxu0  ;;  %v1063_v14 = vld [vmem:[#allocation3 + $0x48] sm:$0xff] }
 0x29c   :  { %v1018_v23 = vpop.f32.mrb[42].mxu1  ;;  %v5074_v26 = vpop.f32.mrb[158].mxu0 }
 0x29d   :  { %1086 = vst.msk [vmem:[#allocation3 + $0x20] sm:$0xff] %vm916_vm12, %v1072_v6  ;;  %v1073_v27 = vadd.f32 %v1059_v24, %v1018_v23  ;;  %v3851_v30 = vpop.f32.mrb[43].mxu1  ;;  %v4057_v32 = vpop.f32.mrb[159].mxu0  ;;  %v1064_v24 = vld [vmem:[#allocation3 + $0x50] sm:$0xff] }
 0x29f   :  { %1087 = vst.msk [vmem:[#allocation3 + $0x28] sm:$0xff] %vm916_vm12, %v1073_v27  ;;  %4025 = vmatmul.mubr.msk.bf16.gmra.mrb[148].mxu1 %vm33_vm4, %v4835_v51 }
 0x2a0   :  { %4028 = vmatprep.mubr.msk.bf16.mxu1 %vm4335_vm2, %v4333_v0 }
 0x2a2   :  { %v1023_v44 = vpop.f32.mrb[44].mxu1  ;;  %v5082_v36 = vpop.f32.mrb[160].mxu0 }
 0x2a3   :  { %v1074_v37 = vadd.f32 %v1060_v33, %v1023_v44  ;;  %v3854_v40 = vpop.f32.mrb[45].mxu1  ;;  %v4060_v41 = vpop.f32.mrb[161].mxu0 }
 0x2a4   :  { %v1026_v42 = vpop.f32.mrb[46].mxu1  ;;  %v5084_v50 = vpop.f32.mrb[162].mxu0 }
 0x2a5   :  { %1088 = vst.msk [vmem:[#allocation3 + $0x30] sm:$0xff] %vm916_vm12, %v1074_v37  ;;  %v1075_v55 = vadd.f32 %v1061_v49, %v1026_v42  ;;  %v3855_v57 = vpop.f32.mrb[47].mxu1  ;;  %v4061_v60 = vpop.f32.mrb[163].mxu0  ;;  %v1065_v37 = vld [vmem:[#allocation3 + $0x58] sm:$0xff] }
 0x2a7   :  { %1089 = vst.msk [vmem:[#allocation3 + $0x38] sm:$0xff] %vm916_vm12, %v1075_v55  ;;  %4029 = vmatmul.mubr.msk.bf16.gmra.mrb[152].mxu1 %vm33_vm4, %v4854_v59  ;;  %v1066_v55 = vld [vmem:[#allocation3 + $0x60] sm:$0xff] }
 0x2a8   :  { %4032 = vmatprep.mubr.msk.bf16.mxu1 %vm4335_vm2, %v4333_v0 }
 0x2aa   :  { %v1031_v51 = vpop.f32.mrb[48].mxu1  ;;  %v5092_v62 = vpop.f32.mrb[164].mxu0 }
 0x2ab   :  { %v1076_v4 = vadd.f32 %v1062_v61, %v1031_v51  ;;  %v3858_v7 = vpop.f32.mrb[49].mxu1  ;;  %v4064_v9 = vpop.f32.mrb[165].mxu0 }
 0x2ac   :  { %v1034_v47 = vpop.f32.mrb[50].mxu1  ;;  %v5094_v6 = vpop.f32.mrb[166].mxu0  ;;  %v1067_v7 = vld [vmem:[#allocation3 + $0x68] sm:$0x3f] }
 0x2ad   :  { %1090 = vst.msk [vmem:[#allocation3 + $0x40] sm:$0xff] %vm916_vm12, %v1076_v4  ;;  %v1077_v18 = vadd.f32 %v1063_v14, %v1034_v47  ;;  %v3859_v22 = vpop.f32.mrb[51].mxu1  ;;  %v4065_v23 = vpop.f32.mrb[167].mxu0 }
 0x2ae   :  { %v1238_v23 = vld [vmem:[#allocation3] sm:$0xff] }
 0x2af   :  { %1091 = vst.msk [vmem:[#allocation3 + $0x48] sm:$0xff] %vm916_vm12, %v1077_v18  ;;  %4033 = vmatmul.mubr.msk.bf16.gmra.mrb[156].mxu1 %vm33_vm4, %v4874_v8 }
 0x2b0   :  { %4036 = vmatprep.mubr.msk.bf16.mxu1 %vm4335_vm2, %v4333_v0 }
 0x2b2   :  { %v1039_v59 = vpop.f32.mrb[52].mxu1  ;;  %v5102_v27 = vpop.f32.mrb[168].mxu0 }
 0x2b3   :  { %v1078_v30 = vadd.f32 %v1064_v24, %v1039_v59  ;;  %v3862_v32 = vpop.f32.mrb[53].mxu1  ;;  %v4068_v44 = vpop.f32.mrb[169].mxu0 }
 0x2b4   :  { %v1042_v33 = vpop.f32.mrb[54].mxu1  ;;  %v5104_v40 = vpop.f32.mrb[170].mxu0 }
 0x2b5   :  { %1092 = vst.msk [vmem:[#allocation3 + $0x50] sm:$0xff] %vm916_vm12, %v1078_v30  ;;  %v1079_v41 = vadd.f32 %v1065_v37, %v1042_v33  ;;  %v3863_v42 = vpop.f32.mrb[55].mxu1  ;;  %v4069_v49 = vpop.f32.mrb[171].mxu0  ;;  %v1239_v33 = vld [vmem:[#allocation3 + $0x8] sm:$0xff] }
 0x2b7   :  { %1093 = vst.msk [vmem:[#allocation3 + $0x58] sm:$0xff] %vm916_vm12, %v1079_v41  ;;  %4037 = vmatmul.mubr.msk.bf16.gmra.mrb[160].mxu1 %vm33_vm4, %v4889_v15  ;;  %v1961_v15 = vld [vmem:[#allocation2 + $0x70] sm:$0xff] }
 0x2b8   :  { %4040 = vmatprep.mubr.msk.bf16.mxu1 %vm4335_vm2, %v4333_v0 }
 0x2ba   :  { %v1047_v8 = vpop.f32.mrb[56].mxu1  ;;  %v5112_v57 = vpop.f32.mrb[172].mxu0 }
 0x2bb   :  { %v1080_v60 = vadd.f32 %v1066_v55, %v1047_v8  ;;  %v3866_v51 = vpop.f32.mrb[57].mxu1  ;;  %v4072_v61 = vpop.f32.mrb[173].mxu0  ;;  %v1962_v8 = vld [vmem:[#allocation2 + $0x78] sm:$0x7f] }
 0x2bc   :  { %v1050_v4 = vpop.f32.mrb[58].mxu1  ;;  %v5114_v9 = vpop.f32.mrb[174].mxu0 }
 0x2bd   :  { %1094 = vst.msk [vmem:[#allocation3 + $0x60] sm:$0xff] %vm916_vm12, %v1080_v60  ;;  %v1081_v47 = vadd.f32 %v1067_v7, %v1050_v4  ;;  %v3867_v14 = vpop.f32.mrb[59].mxu1  ;;  %v4073_v18 = vpop.f32.mrb[175].mxu0  ;;  %v1240_v60 = vld [vmem:[#allocation3 + $0x10] sm:$0xff]  ;;  %v1241_v7 = vld [vmem:[#allocation3 + $0x18] sm:$0xff] }
 0x2bf   :  { %1095 = vst.msk [vmem:[#allocation3 + $0x68] sm:$0x3f] %vm930_vm13, %v1081_v47  ;;  %4041 = vmatmul.mubr.msk.bf16.gmra.mrb[164].mxu1 %vm33_vm4, %v1961_v15  ;;  %v1242_v15 = vld [vmem:[#allocation3 + $0x20] sm:$0xff] }
 0x2c0   :  { %4044 = vmatprep.mubr.msk.bf16.mxu1 %vm4335_vm2, %v4333_v0 }
 0x2c2   :  { %v1183_v22 = vpop.f32.mrb[60].mxu1  ;;  %v5121_v59 = vpop.f32.mrb[176].mxu0 }
 0x2c3   :  { %v1252_v24 = vadd.f32 %v1238_v23, %v1183_v22  ;;  %v3872_v30 = vpop.f32.mrb[61].mxu1  ;;  %v4076_v32 = vpop.f32.mrb[177].mxu0 }
 0x2c4   :  { %v1186_v44 = vpop.f32.mrb[62].mxu1  ;;  %v5123_v37 = vpop.f32.mrb[178].mxu0  ;;  %v1243_v30 = vld [vmem:[#allocation3 + $0x28] sm:$0xff] }
 0x2c5   :  { %1266 = vst.msk [vmem:[#allocation3] sm:$0xff] %vm916_vm12, %v1252_v24  ;;  %v1253_v41 = vadd.f32 %v1239_v33, %v1186_v44  ;;  %v3873_v42 = vpop.f32.mrb[63].mxu1  ;;  %v4077_v49 = vpop.f32.mrb[179].mxu0 }
 0x2c7   :  { %1267 = vst.msk [vmem:[#allocation3 + $0x8] sm:$0xff] %vm916_vm12, %v1253_v41  ;;  %4045 = vmatmul.mubr.msk.bf16.gmra.mrb[168].mxu1 %vm33_vm4, %v1962_v8  ;;  %v1244_v41 = vld [vmem:[#allocation3 + $0x30] sm:$0xff] }
 0x2ca   :  { %v1191_v55 = vpop.f32.mrb[64].mxu1 }
 0x2cb   :  { %v1254_v51 = vadd.f32 %v1240_v60, %v1191_v55  ;;  %v3876_v61 = vpop.f32.mrb[65].mxu1  ;;  %v1245_v55 = vld [vmem:[#allocation3 + $0x38] sm:$0xff] }
 0x2cc   :  { %v1194_v4 = vpop.f32.mrb[66].mxu1 }
 0x2cd   :  { %1268 = vst.msk [vmem:[#allocation3 + $0x10] sm:$0xff] %vm916_vm12, %v1254_v51  ;;  %v1255_v47 = vadd.f32 %v1241_v7, %v1194_v4  ;;  %v3877_v14 = vpop.f32.mrb[67].mxu1  ;;  %v1246_v4 = vld [vmem:[#allocation3 + $0x40] sm:$0xff] }
 0x2cf   :  { %1269 = vst.msk [vmem:[#allocation3 + $0x18] sm:$0xff] %vm916_vm12, %v1255_v47 }
 0x2d2   :  { %v1199_v18 = vpop.f32.mrb[68].mxu1 }
 0x2d3   :  { %v1256_v22 = vadd.f32 %v1242_v15, %v1199_v18  ;;  %v3880_v23 = vpop.f32.mrb[69].mxu1  ;;  %v1247_v18 = vld [vmem:[#allocation3 + $0x48] sm:$0xff] }
 0x2d4   :  { %v1202_v24 = vpop.f32.mrb[70].mxu1 }
 0x2d5   :  { %1270 = vst.msk [vmem:[#allocation3 + $0x20] sm:$0xff] %vm916_vm12, %v1256_v22  ;;  %v1257_v32 = vadd.f32 %v1243_v30, %v1202_v24  ;;  %v3881_v44 = vpop.f32.mrb[71].mxu1  ;;  %v1248_v24 = vld [vmem:[#allocation3 + $0x50] sm:$0xff] }
 0x2d7   :  { %1271 = vst.msk [vmem:[#allocation3 + $0x28] sm:$0xff] %vm916_vm12, %v1257_v32 }
 0x2da   :  { %v1207_v33 = vpop.f32.mrb[72].mxu1 }
 0x2db   :  { %v1258_v42 = vadd.f32 %v1244_v41, %v1207_v33  ;;  %v3884_v49 = vpop.f32.mrb[73].mxu1  ;;  %v1249_v33 = vld [vmem:[#allocation3 + $0x58] sm:$0xff] }
 0x2dc   :  { %v1210_v8 = vpop.f32.mrb[74].mxu1 }
 0x2dd   :  { %1272 = vst.msk [vmem:[#allocation3 + $0x30] sm:$0xff] %vm916_vm12, %v1258_v42  ;;  %v1259_v60 = vadd.f32 %v1245_v55, %v1210_v8  ;;  %v3885_v51 = vpop.f32.mrb[75].mxu1  ;;  %v1250_v8 = vld [vmem:[#allocation3 + $0x60] sm:$0xff] }
 0x2df   :  { %1273 = vst.msk [vmem:[#allocation3 + $0x38] sm:$0xff] %vm916_vm12, %v1259_v60 }
 0x2e2   :  { %v1215_v61 = vpop.f32.mrb[76].mxu1 }
 0x2e3   :  { %v1260_v7 = vadd.f32 %v1246_v4, %v1215_v61  ;;  %v3888_v47 = vpop.f32.mrb[77].mxu1  ;;  %v1251_v61 = vld [vmem:[#allocation3 + $0x68] sm:$0x3f] }
 0x2e4   :  { %v1218_v14 = vpop.f32.mrb[78].mxu1 }
 0x2e5   :  { %1274 = vst.msk [vmem:[#allocation3 + $0x40] sm:$0xff] %vm916_vm12, %v1260_v7  ;;  %v1261_v15 = vadd.f32 %v1247_v18, %v1218_v14  ;;  %v3889_v22 = vpop.f32.mrb[79].mxu1  ;;  %v1402_v14 = vld [vmem:[#allocation3] sm:$0xff] }
 0x2e7   :  { %1275 = vst.msk [vmem:[#allocation3 + $0x48] sm:$0xff] %vm916_vm12, %v1261_v15 }
 0x2ea   :  { %v1223_v23 = vpop.f32.mrb[80].mxu1 }
 0x2eb   :  { %v1262_v30 = vadd.f32 %v1248_v24, %v1223_v23  ;;  %v3892_v32 = vpop.f32.mrb[81].mxu1  ;;  %v1403_v23 = vld [vmem:[#allocation3 + $0x8] sm:$0xff] }
 0x2ec   :  { %v1226_v44 = vpop.f32.mrb[82].mxu1 }
 0x2ed   :  { %1276 = vst.msk [vmem:[#allocation3 + $0x50] sm:$0xff] %vm916_vm12, %v1262_v30  ;;  %v1263_v41 = vadd.f32 %v1249_v33, %v1226_v44  ;;  %v3893_v42 = vpop.f32.mrb[83].mxu1  ;;  %v1404_v44 = vld [vmem:[#allocation3 + $0x10] sm:$0xff] }
 0x2ef   :  { %1277 = vst.msk [vmem:[#allocation3 + $0x58] sm:$0xff] %vm916_vm12, %v1263_v41 }
 0x2f2   :  { %v1231_v49 = vpop.f32.mrb[84].mxu1 }
 0x2f3   :  { %v1264_v55 = vadd.f32 %v1250_v8, %v1231_v49  ;;  %v3896_v60 = vpop.f32.mrb[85].mxu1  ;;  %v1405_v49 = vld [vmem:[#allocation3 + $0x18] sm:$0xff] }
 0x2f4   :  { %v1234_v51 = vpop.f32.mrb[86].mxu1 }
 0x2f5   :  { %1278 = vst.msk [vmem:[#allocation3 + $0x60] sm:$0xff] %vm916_vm12, %v1264_v55  ;;  %v1265_v4 = vadd.f32 %v1251_v61, %v1234_v51  ;;  %v3897_v7 = vpop.f32.mrb[87].mxu1 }
 0x2f7   :  { %1279 = vst.msk [vmem:[#allocation3 + $0x68] sm:$0x3f] %vm930_vm13, %v1265_v4 }
 0x2fa   :  { %v1347_v47 = vpop.f32.mrb[88].mxu1 }
 0x2fb   :  { %v1416_v18 = vadd.f32 %v1402_v14, %v1347_v47  ;;  %v3902_v15 = vpop.f32.mrb[89].mxu1  ;;  %v1406_v47 = vld [vmem:[#allocation3 + $0x20] sm:$0xff] }
 0x2fc   :  { %v1350_v22 = vpop.f32.mrb[90].mxu1 }
 0x2fd   :  { %1430 = vst.msk [vmem:[#allocation3] sm:$0xff] %vm916_vm12, %v1416_v18  ;;  %v1417_v24 = vadd.f32 %v1403_v23, %v1350_v22  ;;  %v3903_v30 = vpop.f32.mrb[91].mxu1  ;;  %v1407_v22 = vld [vmem:[#allocation3 + $0x28] sm:$0xff] }
 0x2ff   :  { %1431 = vst.msk [vmem:[#allocation3 + $0x8] sm:$0xff] %vm916_vm12, %v1417_v24 }
 0x302   :  { %v1355_v32 = vpop.f32.mrb[92].mxu1 }
 0x303   :  { %v1418_v33 = vadd.f32 %v1404_v44, %v1355_v32  ;;  %v3906_v41 = vpop.f32.mrb[93].mxu1 }
 0x304   :  { %v1358_v42 = vpop.f32.mrb[94].mxu1  ;;  %v1566_v8 = vld [vmem:[#allocation3] sm:$0xff] }
 0x305   :  { %1432 = vst.msk [vmem:[#allocation3 + $0x10] sm:$0xff] %vm916_vm12, %v1418_v33  ;;  %v1419_v55 = vadd.f32 %v1405_v49, %v1358_v42  ;;  %v3907_v60 = vpop.f32.mrb[95].mxu1  ;;  %v1580_v51 = vadd.f32 %v1566_v8, %v4825_v46  ;;  %v1408_v33 = vld [vmem:[#allocation3 + $0x30] sm:$0xff]  ;;  %v1409_v8 = vld [vmem:[#allocation3 + $0x38] sm:$0xff] }
 0x306   :  { %v1567_v61 = vld [vmem:[#allocation3 + $0x8] sm:$0xff] }
 0x307   :  { %1433 = vst.msk [vmem:[#allocation3 + $0x18] sm:$0xff] %vm916_vm12, %v1419_v55  ;;  %1594 = vst.msk [vmem:[#allocation3] sm:$0xff] %vm916_vm12, %v1580_v51  ;;  %v1581_v4 = vadd.f32 %v1567_v61, %v4832_v48 }
 0x309   :  { %1595 = vst.msk [vmem:[#allocation3 + $0x8] sm:$0xff] %vm916_vm12, %v1581_v4 }
 0x30a   :  { %v1363_v7 = vpop.f32.mrb[96].mxu1 }
 0x30b   :  { %v1420_v14 = vadd.f32 %v1406_v47, %v1363_v7  ;;  %v3910_v18 = vpop.f32.mrb[97].mxu1  ;;  %v1410_v7 = vld [vmem:[#allocation3 + $0x40] sm:$0xff] }
 0x30c   :  { %v1366_v15 = vpop.f32.mrb[98].mxu1  ;;  %v1568_v23 = vld [vmem:[#allocation3 + $0x10] sm:$0xff] }
 0x30d   :  { %1434 = vst.msk [vmem:[#allocation3 + $0x20] sm:$0xff] %vm916_vm12, %v1420_v14  ;;  %v1421_v24 = vadd.f32 %v1407_v22, %v1366_v15  ;;  %v3911_v46 = vpop.f32.mrb[99].mxu1  ;;  %v1582_v30 = vadd.f32 %v1568_v23, %v4849_v53  ;;  %v1411_v15 = vld [vmem:[#allocation3 + $0x48] sm:$0xff] }
 0x30e   :  { %v1569_v32 = vld [vmem:[#allocation3 + $0x18] sm:$0xff] }
 0x30f   :  { %1435 = vst.msk [vmem:[#allocation3 + $0x28] sm:$0xff] %vm916_vm12, %v1421_v24  ;;  %1596 = vst.msk [vmem:[#allocation3 + $0x10] sm:$0xff] %vm916_vm12, %v1582_v30  ;;  %v1583_v48 = vadd.f32 %v1569_v32, %v4852_v56  ;;  %v1412_v32 = vld [vmem:[#allocation3 + $0x50] sm:$0xff] }
 0x311   :  { %1597 = vst.msk [vmem:[#allocation3 + $0x18] sm:$0xff] %vm916_vm12, %v1583_v48 }
 0x312   :  { %v1371_v44 = vpop.f32.mrb[100].mxu1 }
 0x313   :  { %v1422_v41 = vadd.f32 %v1408_v33, %v1371_v44  ;;  %v3914_v42 = vpop.f32.mrb[101].mxu1 }
 0x314   :  { %v1374_v49 = vpop.f32.mrb[102].mxu1  ;;  %v1570_v55 = vld [vmem:[#allocation3 + $0x20] sm:$0xff] }
 0x315   :  { %1436 = vst.msk [vmem:[#allocation3 + $0x30] sm:$0xff] %vm916_vm12, %v1422_v41  ;;  %v1423_v60 = vadd.f32 %v1409_v8, %v1374_v49  ;;  %v3915_v53 = vpop.f32.mrb[103].mxu1  ;;  %v1584_v51 = vadd.f32 %v1570_v55, %v4868_v1  ;;  %v1413_v41 = vld [vmem:[#allocation3 + $0x58] sm:$0xff] }
 0x316   :  { %v1571_v61 = vld [vmem:[#allocation3 + $0x28] sm:$0xff]  ;;  %v1414_v53 = vld [vmem:[#allocation3 + $0x60] sm:$0xff] }
 0x317   :  { %1437 = vst.msk [vmem:[#allocation3 + $0x38] sm:$0xff] %vm916_vm12, %v1423_v60  ;;  %1598 = vst.msk [vmem:[#allocation3 + $0x20] sm:$0xff] %vm916_vm12, %v1584_v51  ;;  %v1585_v56 = vadd.f32 %v1571_v61, %v4872_v5 }
 0x319   :  { %1599 = vst.msk [vmem:[#allocation3 + $0x28] sm:$0xff] %vm916_vm12, %v1585_v56 }
 0x31a   :  { %v1379_v4 = vpop.f32.mrb[104].mxu1 }
 0x31b   :  { %v1424_v47 = vadd.f32 %v1410_v7, %v1379_v4  ;;  %v3918_v14 = vpop.f32.mrb[105].mxu1  ;;  %v1415_v4 = vld [vmem:[#allocation3 + $0x68] sm:$0x3f] }
 0x31c   :  { %v1382_v18 = vpop.f32.mrb[106].mxu1  ;;  %v1572_v22 = vld [vmem:[#allocation3 + $0x30] sm:$0xff] }
 0x31d   :  { %1438 = vst.msk [vmem:[#allocation3 + $0x40] sm:$0xff] %vm916_vm12, %v1424_v47  ;;  %v1425_v23 = vadd.f32 %v1411_v15, %v1382_v18  ;;  %v3919_v1 = vpop.f32.mrb[107].mxu1  ;;  %v1586_v24 = vadd.f32 %v1572_v22, %v4884_v10  ;;  %v1750_v22 = vld [vmem:[#allocation3] sm:$0xff] }
 0x31e   :  { %v1573_v46 = vld [vmem:[#allocation3 + $0x38] sm:$0xff] }
 0x31f   :  { %1439 = vst.msk [vmem:[#allocation3 + $0x48] sm:$0xff] %vm916_vm12, %v1425_v23  ;;  %1600 = vst.msk [vmem:[#allocation3 + $0x30] sm:$0xff] %vm916_vm12, %v1586_v24  ;;  %v1587_v5 = vadd.f32 %v1573_v46, %v4887_v13  ;;  %v1751_v46 = vld [vmem:[#allocation3 + $0x8] sm:$0xff] }
 0x321   :  { %1601 = vst.msk [vmem:[#allocation3 + $0x38] sm:$0xff] %vm916_vm12, %v1587_v5 }
 0x322   :  { %v1387_v30 = vpop.f32.mrb[108].mxu1 }
 0x323   :  { %v1426_v48 = vadd.f32 %v1412_v32, %v1387_v30  ;;  %v3922_v44 = vpop.f32.mrb[109].mxu1 }
 0x324   :  { %v1390_v33 = vpop.f32.mrb[110].mxu1  ;;  %v1574_v42 = vld [vmem:[#allocation3 + $0x40] sm:$0xff] }
 0x325   :  { %1440 = vst.msk [vmem:[#allocation3 + $0x50] sm:$0xff] %vm916_vm12, %v1426_v48  ;;  %v1427_v49 = vadd.f32 %v1413_v41, %v1390_v33  ;;  %v3923_v10 = vpop.f32.mrb[111].mxu1  ;;  %v1588_v8 = vadd.f32 %v1574_v42, %v4899_v17  ;;  %v1752_v33 = vld [vmem:[#allocation3 + $0x10] sm:$0xff] }
 0x326   :  { %v1575_v55 = vld [vmem:[#allocation3 + $0x48] sm:$0xff]  ;;  %v1753_v10 = vld [vmem:[#allocation3 + $0x18] sm:$0xff] }
 0x327   :  { %1441 = vst.msk [vmem:[#allocation3 + $0x58] sm:$0xff] %vm916_vm12, %v1427_v49  ;;  %1602 = vst.msk [vmem:[#allocation3 + $0x40] sm:$0xff] %vm916_vm12, %v1588_v8  ;;  %v1589_v13 = vadd.f32 %v1575_v55, %v4901_v20 }
 0x329   :  { %1603 = vst.msk [vmem:[#allocation3 + $0x48] sm:$0xff] %vm916_vm12, %v1589_v13 }
 0x32a   :  { %v1395_v60 = vpop.f32.mrb[112].mxu1 }
 0x32b   :  { %v1428_v51 = vadd.f32 %v1414_v53, %v1395_v60  ;;  %v3926_v61 = vpop.f32.mrb[113].mxu1 }
 0x32c   :  { %v1398_v56 = vpop.f32.mrb[114].mxu1  ;;  %v1576_v7 = vld [vmem:[#allocation3 + $0x50] sm:$0xff] }
 0x32d   :  { %1442 = vst.msk [vmem:[#allocation3 + $0x60] sm:$0xff] %vm916_vm12, %v1428_v51  ;;  %v1429_v47 = vadd.f32 %v1415_v4, %v1398_v56  ;;  %v3927_v17 = vpop.f32.mrb[115].mxu1  ;;  %v1590_v14 = vadd.f32 %v1576_v7, %v4910_v25  ;;  %v1754_v51 = vld [vmem:[#allocation3 + $0x20] sm:$0xff]  ;;  %v1755_v7 = vld [vmem:[#allocation3 + $0x28] sm:$0xff] }
 0x32e   :  { %v1577_v18 = vld [vmem:[#allocation3 + $0x58] sm:$0xff] }
 0x32f   :  { %1443 = vst.msk [vmem:[#allocation3 + $0x68] sm:$0x3f] %vm930_vm13, %v1429_v47  ;;  %v1591_v20 = vadd.f32 %v1577_v18, %v4916_v29 }
 0x330   :  { %1604 = vst.msk [vmem:[#allocation3 + $0x50] sm:$0xff] %vm916_vm12, %v1590_v14 }
 0x331   :  { %1605 = vst.msk [vmem:[#allocation3 + $0x58] sm:$0xff] %vm916_vm12, %v1591_v20  ;;  %v1756_v20 = vld [vmem:[#allocation3 + $0x30] sm:$0xff] }
 0x332   :  { %v1695_v15 = vpop.f32.mrb[116].mxu1 }
 0x333   :  { %v1764_v23 = vadd.f32 %v1750_v22, %v1695_v15  ;;  %v3962_v1 = vpop.f32.mrb[117].mxu1  ;;  %v4276_v15 = vld [vmem:[%s5626_s6 + $0x40] sm:$0xff]  }
 0x334   :  { %v1698_v24 = vpop.f32.mrb[118].mxu1  ;;  %v1578_v5 = vld [vmem:[#allocation3 + $0x60] sm:$0xff]  ;;  %3623 = vmatprep.subr.bf16.mxu1 %v4276_v15 }
 0x335   :  { %1778 = vst.msk [vmem:[#allocation3] sm:$0xff] %vm916_vm12, %v1764_v23  ;;  %v1765_v30 = vadd.f32 %v1751_v46, %v1698_v24  ;;  %v3963_v25 = vpop.f32.mrb[119].mxu1  ;;  %v1592_v32 = vadd.f32 %v1578_v5, %v4925_v58  ;;  %v1757_v23 = vld [vmem:[#allocation3 + $0x38] sm:$0xff] }
 0x336   :  { %v1579_v48 = vld [vmem:[#allocation3 + $0x68] sm:$0x3f] }
 0x337   :  { %v1593_v44 = vadd.f32 %v1579_v48, %v4927_v35  ;;  %1779 = vst.msk [vmem:[#allocation3 + $0x8] sm:$0xff] %vm916_vm12, %v1765_v30  ;;  %1606 = vst.msk [vmem:[#allocation3 + $0x60] sm:$0xff] %vm916_vm12, %v1592_v32  ;;  %v4279_v30 = vld [vmem:[%s5626_s6 + $0x8] sm:$0xff]  }
 0x339   :  { %1607 = vst.msk [vmem:[#allocation3 + $0x68] sm:$0x3f] %vm930_vm13, %v1593_v44  ;;  %v4280_v44 = vld [vmem:[%s5626_s6 + $0xc0] sm:$0xff]  }
 0x33a   :  { %v1703_v29 = vpop.f32.mrb[120].mxu1  ;;  %3645 = vmatprep.subr.bf16.mxu0 %v4280_v44 }
 0x33b   :  { %v1766_v41 = vadd.f32 %v1752_v33, %v1703_v29  ;;  %v3966_v42 = vpop.f32.mrb[121].mxu1 }
 0x33c   :  { %v1706_v49 = vpop.f32.mrb[122].mxu1  ;;  %v1914_v8 = vld [vmem:[#allocation3] sm:$0xff] }
 0x33d   :  { %1780 = vst.msk [vmem:[#allocation3 + $0x10] sm:$0xff] %vm916_vm12, %v1766_v41  ;;  %v1767_v55 = vadd.f32 %v1753_v10, %v1706_v49  ;;  %v3967_v58 = vpop.f32.mrb[123].mxu1  ;;  %v1928_v13 = vadd.f32 %v1914_v8, %v4986_v54  ;;  %v4281_v41 = vld [vmem:[%s5626_s6 + $0x80] sm:$0xff]   ;;  %v4283_v49 = vld [vmem:[%s5626_s6 + $0x10] sm:$0xff]   ;;  %v4284_v8 = vld [vmem:[%s5626_s6 + $0xc8] sm:$0xff]  }
 0x33e   :  { %v1915_v35 = vld [vmem:[#allocation3 + $0x8] sm:$0xff]  ;;  %v1758_v42 = vld [vmem:[#allocation3 + $0x40] sm:$0xff]  ;;  %3646 = vmatpush3.bf16.msra.mxu0 %v4281_v41 }
 0x33f   :  { %1781 = vst.msk [vmem:[#allocation3 + $0x18] sm:$0xff] %vm916_vm12, %v1767_v55  ;;  %1942 = vst.msk [vmem:[#allocation3] sm:$0xff] %vm916_vm12, %v1928_v13  ;;  %v1929_v60 = vadd.f32 %v1915_v35, %v4992_v63  ;;  %v4285_v13 = vld [vmem:[%s5626_s6 + $0x88] sm:$0xff]   ;;  %3647 = vmatprep.subr.bf16.mxu0 %v4284_v8 }
 0x341   :  { %1943 = vst.msk [vmem:[#allocation3 + $0x8] sm:$0xff] %vm916_vm12, %v1929_v60 }
 0x342   :  { %v1711_v53 = vpop.f32.mrb[124].mxu1  ;;  %3648 = vmatpush3.bf16.msra.mxu0 %v4285_v13 }
 0x343   :  { %v1768_v61 = vadd.f32 %v1754_v51, %v1711_v53  ;;  %v3970_v56 = vpop.f32.mrb[125].mxu1  ;;  %v4286_v53 = vld [vmem:[%s5626_s6 + $0x58] sm:$0xff]  }
 0x344   :  { %v1714_v4 = vpop.f32.mrb[126].mxu1  ;;  %v1916_v47 = vld [vmem:[#allocation3 + $0x10] sm:$0xff] }
 0x345   :  { %1782 = vst.msk [vmem:[#allocation3 + $0x20] sm:$0xff] %vm916_vm12, %v1768_v61  ;;  %v1769_v17 = vadd.f32 %v1755_v7, %v1714_v4  ;;  %v3971_v54 = vpop.f32.mrb[127].mxu1  ;;  %v1930_v14 = vadd.f32 %v1916_v47, %v5000_v12  ;;  %v4277_v12 = vld [vmem:[%s5626_s6] sm:$0xff]   ;;  %v4287_v4 = vld [vmem:[%s5626_s6 + $0x18] sm:$0xff]  }
 0x346   :  { %v1917_v18 = vld [vmem:[#allocation3 + $0x18] sm:$0xff]  ;;  %3624 = vmatpush3.bf16.msra.mxu1 %v4277_v12  ;;  %v1760_v54 = vld [vmem:[#allocation3 + $0x50] sm:$0xff] }
 0x347   :  { %1783 = vst.msk [vmem:[#allocation3 + $0x28] sm:$0xff] %vm916_vm12, %v1769_v17  ;;  %1944 = vst.msk [vmem:[#allocation3 + $0x10] sm:$0xff] %vm916_vm12, %v1930_v14  ;;  %v1931_v63 = vadd.f32 %v1917_v18, %v5003_v19  ;;  %v4278_v19 = vld [vmem:[%s5626_s6 + $0x48] sm:$0xff]   ;;  %v4288_v17 = vld [vmem:[%s5626_s6 + $0xd0] sm:$0xff]  }
 0x348   :  { %3625 = vmatprep.subr.bf16.mxu1 %v4278_v19  ;;  %3649 = vmatprep.subr.bf16.mxu0 %v4288_v17  ;;  %v4290_v14 = vld [vmem:[%s5626_s6 + $0x60] sm:$0xff]  }
 0x349   :  { %1945 = vst.msk [vmem:[#allocation3 + $0x18] sm:$0xff] %vm916_vm12, %v1931_v63  ;;  %v1761_v63 = vld [vmem:[#allocation3 + $0x58] sm:$0xff] }
 0x34a   :  { %v1719_v22 = vpop.f32.mrb[128].mxu1  ;;  %3626 = vmatpush3.bf16.msra.mxu1 %v4279_v30 }
 0x34b   :  { %v1770_v1 = vadd.f32 %v1756_v20, %v1719_v22  ;;  %v3974_v24 = vpop.f32.mrb[129].mxu1  ;;  %v4292_v22 = vld [vmem:[%s5626_s6 + $0xd8] sm:$0xff]  }
 0x34c   :  { %v1722_v46 = vpop.f32.mrb[130].mxu1  ;;  %v1918_v5 = vld [vmem:[#allocation3 + $0x20] sm:$0xff] }
 0x34d   :  { %1784 = vst.msk [vmem:[#allocation3 + $0x30] sm:$0xff] %vm916_vm12, %v1770_v1  ;;  %v1771_v25 = vadd.f32 %v1757_v23, %v1722_v46  ;;  %v3975_v32 = vpop.f32.mrb[131].mxu1  ;;  %v1932_v48 = vadd.f32 %v1918_v5, %v5010_v34  ;;  %v4282_v34 = vld [vmem:[%s5626_s6 + $0x50] sm:$0xff]   ;;  %v4293_v46 = vld [vmem:[%s5626_s6 + $0x98] sm:$0xff]  }
 0x34e   :  { %v1919_v29 = vld [vmem:[#allocation3 + $0x28] sm:$0xff]  ;;  %3627 = vmatprep.subr.bf16.mxu1 %v4282_v34  ;;  %v1762_v32 = vld [vmem:[#allocation3 + $0x60] sm:$0xff] }
 0x34f   :  { %1785 = vst.msk [vmem:[#allocation3 + $0x38] sm:$0xff] %vm916_vm12, %v1771_v25  ;;  %1946 = vst.msk [vmem:[#allocation3 + $0x20] sm:$0xff] %vm916_vm12, %v1932_v48  ;;  %v1933_v33 = vadd.f32 %v1919_v29, %v5014_v31  ;;  %v1759_v31 = vld [vmem:[#allocation3 + $0x48] sm:$0xff]  ;;  %3628 = vmatpush3.bf16.msra.mxu1 %v4283_v49 }
 0x350   :  { %3629 = vmatprep.subr.bf16.mxu1 %v4286_v53  ;;  %v1763_v48 = vld [vmem:[#allocation3 + $0x68] sm:$0x3f] }
 0x351   :  { %1947 = vst.msk [vmem:[#allocation3 + $0x28] sm:$0xff] %vm916_vm12, %v1933_v33 }
 0x352   :  { %v1727_v10 = vpop.f32.mrb[132].mxu1 }
 0x353   :  { %v1772_v55 = vadd.f32 %v1758_v42, %v1727_v10  ;;  %v3978_v58 = vpop.f32.mrb[133].mxu1  ;;  %3630 = vmatpush3.bf16.msra.mxu1 %v4287_v4 }
 0x354   :  { %v1730_v35 = vpop.f32.mrb[134].mxu1  ;;  %v1920_v60 = vld [vmem:[#allocation3 + $0x30] sm:$0xff]  ;;  %3631 = vmatprep.subr.bf16.mxu1 %v4290_v14  ;;  %v2079_v58 = vld [vmem:[#allocation3 + $0x8] sm:$0xff] }
 0x355   :  { %1786 = vst.msk [vmem:[#allocation3 + $0x40] sm:$0xff] %vm916_vm12, %v1772_v55  ;;  %v1773_v51 = vadd.f32 %v1759_v31, %v1730_v35  ;;  %v3979_v61 = vpop.f32.mrb[135].mxu1  ;;  %v1934_v56 = vadd.f32 %v1920_v60, %v5021_v38  ;;  %v4289_v38 = vld [vmem:[%s5626_s6 + $0x90] sm:$0xff]   ;;  %v2078_v31 = vld [vmem:[#allocation3] sm:$0xff] }
 0x356   :  { %v1921_v7 = vld [vmem:[#allocation3 + $0x38] sm:$0xff]  ;;  %3650 = vmatpush3.bf16.msra.mxu0 %v4289_v38 }
 0x357   :  { %1787 = vst.msk [vmem:[#allocation3 + $0x48] sm:$0xff] %vm916_vm12, %v1773_v51  ;;  %1948 = vst.msk [vmem:[#allocation3 + $0x30] sm:$0xff] %vm916_vm12, %v1934_v56  ;;  %v1935_v47 = vadd.f32 %v1921_v7, %v5025_v43  ;;  %v4291_v43 = vld [vmem:[%s5626_s6 + $0x20] sm:$0xff]   ;;  %3651 = vmatprep.subr.bf16.mxu0 %v4292_v22  ;;  %v2080_v56 = vld [vmem:[#allocation3 + $0x10] sm:$0xff] }
 0x358   :  { %3632 = vmatpush3.bf16.msra.mxu1 %v4291_v43  ;;  %v2082_v43 = vld [vmem:[#allocation3 + $0x20] sm:$0xff]  ;;  %v2083_v22 = vld [vmem:[#allocation3 + $0x28] sm:$0xff] }
 0x359   :  { %1949 = vst.msk [vmem:[#allocation3 + $0x38] sm:$0xff] %vm916_vm12, %v1935_v47  ;;  %v2081_v47 = vld [vmem:[#allocation3 + $0x18] sm:$0xff] }
 0x35a   :  { %v1735_v18 = vpop.f32.mrb[136].mxu1  ;;  %3652 = vmatpush3.bf16.msra.mxu0 %v4293_v46 }
 0x35b   :  { %v1774_v20 = vadd.f32 %v1760_v54, %v1735_v18  ;;  %v3982_v15 = vpop.f32.mrb[137].mxu1 }
 0x35c   :  { %v1738_v23 = vpop.f32.mrb[138].mxu1  ;;  %v1922_v12 = vld [vmem:[#allocation3 + $0x40] sm:$0xff] }
 0x35d   :  { %1788 = vst.msk [vmem:[#allocation3 + $0x50] sm:$0xff] %vm916_vm12, %v1774_v20  ;;  %v1775_v1 = vadd.f32 %v1761_v63, %v1738_v23  ;;  %v3983_v24 = vpop.f32.mrb[139].mxu1  ;;  %v1936_v19 = vadd.f32 %v1922_v12, %v5032_v45 }
 0x35e   :  { %v1923_v5 = vld [vmem:[#allocation3 + $0x48] sm:$0xff] }
 0x35f   :  { %1789 = vst.msk [vmem:[#allocation3 + $0x58] sm:$0xff] %vm916_vm12, %v1775_v1  ;;  %1950 = vst.msk [vmem:[#allocation3 + $0x40] sm:$0xff] %vm916_vm12, %v1936_v19  ;;  %v1937_v30 = vadd.f32 %v1923_v5, %v5036_v2 }
 0x361   :  { %1951 = vst.msk [vmem:[#allocation3 + $0x48] sm:$0xff] %vm916_vm12, %v1937_v30  ;;  %v2084_v30 = vld [vmem:[#allocation3 + $0x30] sm:$0xff] }
 0x362   :  { %v1743_v25 = vpop.f32.mrb[140].mxu1 }
 0x363   :  { %v1776_v44 = vadd.f32 %v1762_v32, %v1743_v25  ;;  %v3986_v45 = vpop.f32.mrb[141].mxu1 }
 0x364   :  { %v1746_v29 = vpop.f32.mrb[142].mxu1  ;;  %v1924_v33 = vld [vmem:[#allocation3 + $0x50] sm:$0xff] }
 0x365   :  { %1790 = vst.msk [vmem:[#allocation3 + $0x60] sm:$0xff] %vm916_vm12, %v1776_v44  ;;  %v1777_v41 = vadd.f32 %v1763_v48, %v1746_v29  ;;  %v3987_v42 = vpop.f32.mrb[143].mxu1  ;;  %v1938_v34 = vadd.f32 %v1924_v33, %v5043_v11  ;;  %v2085_v29 = vld [vmem:[#allocation3 + $0x38] sm:$0xff]  ;;  %v4294_v33 = vld [vmem:[%s5626_s6 + $0x68] sm:$0xff]  }
 0x366   :  { %v1925_v49 = vld [vmem:[#allocation3 + $0x58] sm:$0xff]  ;;  %3633 = vmatprep.subr.bf16.mxu1 %v4294_v33 }
 0x367   :  { %1791 = vst.msk [vmem:[#allocation3 + $0x68] sm:$0x3f] %vm930_vm13, %v1777_v41  ;;  %v1939_v2 = vadd.f32 %v1925_v49, %v5046_v21 }
 0x368   :  { %1952 = vst.msk [vmem:[#allocation3 + $0x50] sm:$0xff] %vm916_vm12, %v1938_v34 }
 0x369   :  { %1953 = vst.msk [vmem:[#allocation3 + $0x58] sm:$0xff] %vm916_vm12, %v1939_v2 }
 0x36a   :  { %v2023_v10 = vpop.f32.mrb[144].mxu1 }
 0x36b   :  { %v2092_v8 = vadd.f32 %v2078_v31, %v2023_v10  ;;  %v4022_v55 = vpop.f32.mrb[145].mxu1 }
 0x36c   :  { %v2026_v13 = vpop.f32.mrb[146].mxu1  ;;  %v1926_v35 = vld [vmem:[#allocation3 + $0x60] sm:$0xff] }
 0x36d   :  { %2106 = vst.msk [vmem:[#allocation3] sm:$0xff] %vm916_vm12, %v2092_v8  ;;  %v2093_v60 = vadd.f32 %v2079_v58, %v2026_v13  ;;  %v4023_v11 = vpop.f32.mrb[147].mxu1  ;;  %v1940_v53 = vadd.f32 %v1926_v35, %v5053_v28  ;;  %v4295_v13 = vld [vmem:[%s5626_s6 + $0x28] sm:$0xff]  }
 0x36e   :  { %v1927_v51 = vld [vmem:[#allocation3 + $0x68] sm:$0x3f]  ;;  %3634 = vmatpush3.bf16.msra.mxu1 %v4295_v13 }
 0x36f   :  { %v1941_v61 = vadd.f32 %v1927_v51, %v5055_v39  ;;  %2107 = vst.msk [vmem:[#allocation3 + $0x8] sm:$0xff] %vm916_vm12, %v2093_v60  ;;  %1954 = vst.msk [vmem:[#allocation3 + $0x60] sm:$0xff] %vm916_vm12, %v1940_v53  ;;  %v2086_v60 = vld [vmem:[#allocation3 + $0x40] sm:$0xff] }
 0x370   :  { %v4296_v53 = vld [vmem:[%s5626_s6 + $0xe0] sm:$0xff]  }
 0x371   :  { %1955 = vst.msk [vmem:[#allocation3 + $0x68] sm:$0x3f] %vm930_vm13, %v1941_v61  ;;  %v4297_v51 = vld [vmem:[%s5626_s6 + $0xa0] sm:$0xff]   ;;  %3653 = vmatprep.subr.bf16.mxu0 %v4296_v53 }
 0x372   :  { %v2031_v21 = vpop.f32.mrb[148].mxu1  ;;  %3654 = vmatpush3.bf16.msra.mxu0 %v4297_v51 }
 0x373   :  { %v2094_v4 = vadd.f32 %v2080_v56, %v2031_v21  ;;  %v4026_v7 = vpop.f32.mrb[149].mxu1 }
 0x374   :  { %v2262_v17 = vld [vmem:[#allocation3] sm:$0xff]  ;;  %v2034_v54 = vpop.f32.mrb[150].mxu1 }
 0x375   :  { %v2276_v38 = vadd.f32 %v2262_v17, %v5062_v52  ;;  %2108 = vst.msk [vmem:[#allocation3 + $0x10] sm:$0xff] %vm916_vm12, %v2094_v4  ;;  %v2095_v28 = vadd.f32 %v2081_v47, %v2034_v54  ;;  %v4027_v14 = vpop.f32.mrb[151].mxu1  ;;  %v2087_v54 = vld [vmem:[#allocation3 + $0x48] sm:$0xff] }
 0x376   :  { %v2263_v39 = vld [vmem:[#allocation3 + $0x8] sm:$0xff]  ;;  %v4298_v14 = vld [vmem:[%s5626_s6 + $0x70] sm:$0xff]  }
 0x377   :  { %2290 = vst.msk [vmem:[#allocation3] sm:$0xff] %vm916_vm12, %v2276_v38  ;;  %v2277_v18 = vadd.f32 %v2263_v39, %v5064_v3  ;;  %2109 = vst.msk [vmem:[#allocation3 + $0x18] sm:$0xff] %vm916_vm12, %v2095_v28  ;;  %v5291_v3 = vld [vmem:[%s5627_s5] ss:$0 sm:$0xff]  ;;  %3635 = vmatprep.subr.bf16.mxu1 %v4298_v14 }
 0x378   :  { %v2091_v14 = vld [vmem:[#allocation3 + $0x68] sm:$0x3f] }
 0x379   :  { %2291 = vst.msk [vmem:[#allocation3 + $0x8] sm:$0xff] %vm916_vm12, %v2277_v18 }
 0x37a   :  { %v2039_v63 = vpop.f32.mrb[152].mxu1 }
 0x37b   :  { %v2096_v20 = vadd.f32 %v2082_v43, %v2039_v63  ;;  %v4030_v15 = vpop.f32.mrb[153].mxu1 }
 0x37c   :  { %v2264_v23 = vld [vmem:[#allocation3 + $0x10] sm:$0xff]  ;;  %v2042_v52 = vpop.f32.mrb[154].mxu1 }
 0x37d   :  { %v2278_v12 = vadd.f32 %v2264_v23, %v5072_v16  ;;  %2110 = vst.msk [vmem:[#allocation3 + $0x20] sm:$0xff] %vm916_vm12, %v2096_v20  ;;  %v2097_v1 = vadd.f32 %v2083_v22, %v2042_v52  ;;  %v4031_v24 = vpop.f32.mrb[155].mxu1  ;;  %v4299_v15 = vld [vmem:[%s5626_s6 + $0x30] sm:$0xff]  }
 0x37e   :  { %v2265_v19 = vld [vmem:[#allocation3 + $0x18] sm:$0xff]  ;;  %v2304_v46 = vld [vmem:[#allocation3] sm:$0xff]  ;;  %3636 = vmatpush3.bf16.msra.mxu1 %v4299_v15 }
 0x37f   :  { %2292 = vst.msk [vmem:[#allocation3 + $0x10] sm:$0xff] %vm916_vm12, %v2278_v12  ;;  %v2279_v5 = vadd.f32 %v2265_v19, %v5074_v26  ;;  %2111 = vst.msk [vmem:[#allocation3 + $0x28] sm:$0xff] %vm916_vm12, %v2097_v1  ;;  %v2325_v25 = vadd.f32 %v5291_v3, %v2304_v46  ;;  %v4302_v1 = vld [vmem:[%s5626_s6 + $0x78] sm:$0xff]  }
 0x380   :  { %v2305_v8 = vld [vmem:[#allocation3 + $0x8] sm:$0xff]  ;;  %3637 = vmatprep.subr.bf16.mxu1 %v4302_v1 }
 0x381   :  { %2293 = vst.msk [vmem:[#allocation3 + $0x18] sm:$0xff] %vm916_vm12, %v2279_v5  ;;  %v5303_v2 = vmax.f32 %v2325_v25, 0.0  ;;  %v2326_v11 = vadd.f32 %v5291_v3, %v2305_v8  ;;  %v4300_v5 = vld [vmem:[%s5626_s6 + $0xe8] sm:$0xff]  }
 0x382   :  { %v2047_v16 = vpop.f32.mrb[156].mxu1  ;;  %3655 = vmatprep.subr.bf16.mxu0 %v4300_v5 }
 0x383   :  { %v2098_v32 = vadd.f32 %v2084_v30, %v2047_v16  ;;  %v4034_v48 = vpop.f32.mrb[157].mxu1  ;;  %v2354_v4 = vrot.slane %v5303_v2, 2  ;;  %v2340_v52 = vmax.f32 %v2326_v11, 0.0  ;;  %v4301_v16 = vld [vmem:[%s5626_s6 + $0xa8] sm:$0xff]   ;;  %v4303_v30 = vld [vmem:[%s5626_s6 + $0x38] sm:$0xff]  }
 0x384   :  { %v2266_v44 = vld [vmem:[#allocation3 + $0x20] sm:$0xff]  ;;  %v2050_v45 = vpop.f32.mrb[158].mxu1  ;;  %3638 = vmatpush3.bf16.msra.mxu1 %v4303_v30  ;;  %3656 = vmatpush3.bf16.msra.mxu0 %v4301_v16 }
 0x385   :  { %v2280_v41 = vadd.f32 %v2266_v44, %v5082_v36  ;;  %2112 = vst.msk [vmem:[#allocation3 + $0x30] sm:$0xff] %vm916_vm12, %v2098_v32  ;;  %v2099_v26 = vadd.f32 %v2085_v29, %v2050_v45  ;;  %v4035_v42 = vpop.f32.mrb[159].mxu1  ;;  %v2088_v32 = vld [vmem:[#allocation3 + $0x50] sm:$0xff]  ;;  %v2089_v29 = vld [vmem:[#allocation3 + $0x58] sm:$0xff]  ;;  %v2374_v33 = vrot.slane %v2340_v52, 4 }
 0x386   :  { %v2267_v34 = vld [vmem:[#allocation3 + $0x28] sm:$0xff]  ;;  %v2306_v49 = vld [vmem:[#allocation3 + $0x10] sm:$0xff] }
 0x387   :  { %2294 = vst.msk [vmem:[#allocation3 + $0x20] sm:$0xff] %vm916_vm12, %v2280_v41  ;;  %v2281_v10 = vadd.f32 %v2267_v34, %v5084_v50  ;;  %2113 = vst.msk [vmem:[#allocation3 + $0x38] sm:$0xff] %vm916_vm12, %v2099_v26  ;;  %v2327_v31 = vadd.f32 %v5291_v3, %v2306_v49  ;;  %v2362_v50 = vrot.slane %v5303_v2, 6  ;;  %v2370_v41 = vrot.slane %v2340_v52, 2  ;;  %v4304_v49 = vld [vmem:[%s5626_s6 + $0x140] sm:$0xff]  }
 0x388   :  { %v2307_v55 = vld [vmem:[#allocation3 + $0x18] sm:$0xff]  ;;  %3667 = vmatprep.subr.bf16.mxu1 %v4304_v49 }
 0x389   :  { %2295 = vst.msk [vmem:[#allocation3 + $0x28] sm:$0xff] %vm916_vm12, %v2281_v10  ;;  %v5310_v36 = vmax.f32 %v2327_v31, 0.0  ;;  %v2328_v58 = vadd.f32 %v5291_v3, %v2307_v55  ;;  %v4305_v10 = vld [vmem:[%s5626_s6 + $0xf0] sm:$0xff]  }
 0x38a   :  { %v2055_v35 = vpop.f32.mrb[160].mxu1  ;;  %3657 = vmatprep.subr.bf16.mxu0 %v4305_v10 }
 0x38b   :  { %v2100_v61 = vadd.f32 %v2086_v60, %v2055_v35  ;;  %v4038_v21 = vpop.f32.mrb[161].mxu1  ;;  %v2391_v56 = vrot.slane %v5310_v36, 6  ;;  %v2383_v7 = vrot.slane %v5310_v36, 2  ;;  %v2387_v38 = vrot.slane %v5310_v36, 4 }
 0x38c   :  { %v2268_v47 = vld [vmem:[#allocation3 + $0x30] sm:$0xff]  ;;  %v2058_v17 = vpop.f32.mrb[162].mxu1  ;;  %v5328_v28 = vmax.f32 %v2328_v58, 0.0 }
 0x38d   :  { %v2282_v39 = vadd.f32 %v2268_v47, %v5092_v62  ;;  %2114 = vst.msk [vmem:[#allocation3 + $0x40] sm:$0xff] %vm916_vm12, %v2100_v61  ;;  %v2101_v18 = vadd.f32 %v2087_v54, %v2058_v17  ;;  %v4039_v63 = vpop.f32.mrb[163].mxu1  ;;  %v4155_v43 = vpack.i.bf16 %v2362_v50, %v2391_v56  ;;  %v4145_v20 = vpack.i.bf16 %v2354_v4, %v2383_v7  ;;  %v4307_v4 = vld [vmem:[%s5626_s6 + $0xb0] sm:$0xff]   ;;  %v2090_v47 = vld [vmem:[#allocation3 + $0x60] sm:$0xff] }
 0x38e   :  { %v2269_v22 = vld [vmem:[#allocation3 + $0x38] sm:$0xff]  ;;  %v2358_v62 = vrot.slane %v5303_v2, 4  ;;  %v2308_v12 = vld [vmem:[#allocation3 + $0x20] sm:$0xff]  ;;  %v4160_v24 = vpack.i.bf16 %v2340_v52, %v5328_v28  ;;  %v2403_v19 = vrot.slane %v5328_v28, 4  ;;  %v2399_v46 = vrot.slane %v5328_v28, 2  ;;  %3658 = vmatpush3.bf16.msra.mxu0 %v4307_v4 }
 0x38f   :  { %2296 = vst.msk [vmem:[#allocation3 + $0x30] sm:$0xff] %vm916_vm12, %v2282_v39  ;;  %v2283_v23 = vadd.f32 %v2269_v22, %v5094_v6  ;;  %2115 = vst.msk [vmem:[#allocation3 + $0x48] sm:$0xff] %vm916_vm12, %v2101_v18  ;;  %4156 = vrot.lane.b32.xlu1 %v4155_v43, %s4337_s12  ;;  %4146 = vrot.lane.b32.xlu0 %v4145_v20, %s4338_s4  ;;  %v2329_v48 = vadd.f32 %v5291_v3, %v2308_v12  ;;  %v2407_v34 = vrot.slane %v5328_v28, 6 }
 0x390   :  { %v4150_v6 = vpack.i.bf16 %v2358_v62, %v2387_v38  ;;  %v4170_v58 = vpack.i.bf16 %v2374_v33, %v2403_v19  ;;  %v4165_v13 = vpack.i.bf16 %v2370_v41, %v2399_v46  ;;  %v2309_v51 = vld [vmem:[#allocation3 + $0x28] sm:$0xff] }
 0x391   :  { %2297 = vst.msk [vmem:[#allocation3 + $0x38] sm:$0xff] %vm916_vm12, %v2283_v23  ;;  %v5372_v50 = vmax.f32 %v2329_v48, 0.0  ;;  %v2330_v54 = vadd.f32 %v5291_v3, %v2309_v51  ;;  %v4310_v23 = vld [vmem:[%s5626_s6 + $0xf8] sm:$0xff]  }
 0x392   :  { %v2063_v25 = vpop.f32.mrb[164].mxu1  ;;  %3659 = vmatprep.subr.bf16.mxu0 %v4310_v23 }
 0x393   :  { %v2102_v44 = vadd.f32 %v2088_v32, %v2063_v25  ;;  %v4042_v45 = vpop.f32.mrb[165].mxu1  ;;  %4151 = vrot.lane.b32.xlu0 %v4150_v6, %s4339_s0  ;;  %4161 = vrot.lane.b32.xlu1 %v4160_v24, %s4340_s3  ;;  %v2436_v17 = vrot.slane %v5372_v50, 4  ;;  %v2432_v18 = vrot.slane %v5372_v50, 2  ;;  %v4312_v24 = vld [vmem:[%s5626_s6 + $0xb8] sm:$0xff]   ;;  %v2344_v5 = vmax.f32 %v2330_v54, 0.0 }
 0x394   :  { %v2270_v26 = vld [vmem:[#allocation3 + $0x40] sm:$0xff]  ;;  %v2066_v42 = vpop.f32.mrb[166].mxu1  ;;  %3660 = vmatpush3.bf16.msra.mxu0 %v4312_v24 }
 0x395   :  { %v2284_v31 = vadd.f32 %v2270_v26, %v5102_v27  ;;  %2116 = vst.msk [vmem:[#allocation3 + $0x50] sm:$0xff] %vm916_vm12, %v2102_v44  ;;  %v2103_v8 = vadd.f32 %v2089_v29, %v2066_v42  ;;  %v4043_v55 = vpop.f32.mrb[167].mxu1  ;;  %v2378_v27 = vrot.slane %v2340_v52, 6  ;;  %4078 = vmatprep.subr.bf16.mxu0 %v4333_v0  ;;  %v2448_v44 = vrot.slane %v2344_v5, 2 }
 0x396   :  { %v2271_v35 = vld [vmem:[#allocation3 + $0x48] sm:$0xff]  ;;  %v2310_v60 = vld [vmem:[#allocation3 + $0x30] sm:$0xff] }
 0x397   :  { %2298 = vst.msk [vmem:[#allocation3 + $0x40] sm:$0xff] %vm916_vm12, %v2284_v31  ;;  %v2285_v11 = vadd.f32 %v2271_v35, %v5104_v40  ;;  %2117 = vst.msk [vmem:[#allocation3 + $0x58] sm:$0xff] %vm916_vm12, %v2103_v8  ;;  %4171 = vrot.lane.b32.xlu1 %v4170_v58, %s4341_s23  ;;  %4166 = vrot.lane.b32.xlu0 %v4165_v13, %s4342_s24  ;;  %v2331_v53 = vadd.f32 %v5291_v3, %v2310_v60  ;;  %v2456_v31 = vrot.slane %v2344_v5, 6 }
 0x398   :  { %v2311_v61 = vld [vmem:[#allocation3 + $0x38] sm:$0xff]  ;;  %v4175_v21 = vpack.i.bf16 %v2378_v27, %v2407_v34 }
 0x399   :  { %2299 = vst.msk [vmem:[#allocation3 + $0x48] sm:$0xff] %vm916_vm12, %v2285_v11  ;;  %v5381_v56 = vmax.f32 %v2331_v53, 0.0  ;;  %v2332_v40 = vadd.f32 %v5291_v3, %v2311_v61 }
 0x39a   :  { %v2071_v7 = vpop.f32.mrb[168].mxu1 }
 0x39b   :  { %v2104_v38 = vadd.f32 %v2090_v47, %v2071_v7  ;;  %v4046_v28 = vpop.f32.mrb[169].mxu1  ;;  %4176 = vrot.lane.b32.xlu0 %v4175_v21, %s4343_s27  ;;  %v2465_v39 = vrot.slane %v5381_v56, 4  ;;  %v2461_v63 = vrot.slane %v5381_v56, 2  ;;  %v2469_v15 = vrot.slane %v5381_v56, 6 }
 0x39c   :  { %v2272_v43 = vld [vmem:[#allocation3 + $0x50] sm:$0xff]  ;;  %v2074_v20 = vpop.f32.mrb[170].mxu1  ;;  %v2346_v22 = vmax.f32 %v2332_v40, 0.0 }
 0x39d   :  { %v2286_v62 = vadd.f32 %v2272_v43, %v5112_v57  ;;  %2118 = vst.msk [vmem:[#allocation3 + $0x60] sm:$0xff] %vm916_vm12, %v2104_v38  ;;  %v2105_v52 = vadd.f32 %v2091_v14, %v2074_v20  ;;  %v4047_v12 = vpop.f32.mrb[171].mxu1  ;;  %v4185_v1 = vpack.i.bf16 %v2436_v17, %v2465_v39  ;;  %v4180_v6 = vpack.i.bf16 %v2432_v18, %v2461_v63 }
 0x39e   :  { %v2273_v19 = vld [vmem:[#allocation3 + $0x58] sm:$0xff]  ;;  %v2440_v57 = vrot.slane %v5372_v50, 6  ;;  %v2312_v16 = vld [vmem:[#allocation3 + $0x40] sm:$0xff]  ;;  %v4195_v25 = vpack.i.bf16 %v2344_v5, %v2346_v22  ;;  %v2481_v32 = vrot.slane %v2346_v22, 4  ;;  %v2477_v48 = vrot.slane %v2346_v22, 2 }
 0x39f   :  { %2300 = vst.msk [vmem:[#allocation3 + $0x50] sm:$0xff] %vm916_vm12, %v2286_v62  ;;  %v2287_v46 = vadd.f32 %v2273_v19, %v5114_v9  ;;  %4186 = vrot.lane.b32.xlu0 %v4185_v1, %s4339_s0  ;;  %4181 = vrot.lane.b32.xlu1 %v4180_v6, %s4338_s4  ;;  %v2452_v9 = vrot.slane %v2344_v5, 4  ;;  %v2333_v45 = vadd.f32 %v5291_v3, %v2312_v16  ;;  %v2485_v42 = vrot.slane %v2346_v22, 6 }
 0x3a0   :  { %2119 = vst.msk [vmem:[#allocation3 + $0x68] sm:$0x3f] %vm930_vm13, %v2105_v52  ;;  %v4190_v30 = vpack.i.bf16 %v2440_v57, %v2469_v15  ;;  %v4200_v26 = vpack.i.bf16 %v2448_v44, %v2477_v48  ;;  %v2313_v58 = vld [vmem:[#allocation3 + $0x48] sm:$0xff] }
 0x3a1   :  { %2301 = vst.msk [vmem:[#allocation3 + $0x58] sm:$0xff] %vm916_vm12, %v2287_v46  ;;  %v4205_v41 = vpack.i.bf16 %v2452_v9, %v2481_v32  ;;  %v5419_v55 = vmax.f32 %v2333_v45, 0.0  ;;  %v4210_v13 = vpack.i.bf16 %v2456_v31, %v2485_v42 }
 0x3a3   :  { %4191 = vrot.lane.b32.xlu1 %v4190_v30, %s4337_s12  ;;  %4196 = vrot.lane.b32.xlu0 %v4195_v25, %s4340_s3  ;;  %v2508_v11 = vrot.slane %v5419_v55, 4  ;;  %v2504_v53 = vrot.slane %v5419_v55, 2  ;;  %v2512_v7 = vrot.slane %v5419_v55, 6 }
 0x3a4   :  { %v2274_v29 = vld [vmem:[#allocation3 + $0x60] sm:$0xff] }
 0x3a5   :  { %v2288_v33 = vadd.f32 %v2274_v29, %v5121_v59 }
 0x3a6   :  { %v2314_v49 = vld [vmem:[#allocation3 + $0x50] sm:$0xff] }
 0x3a7   :  { %v2275_v34 = vld [vmem:[#allocation3 + $0x68] sm:$0x3f]  ;;  %2302 = vst.msk [vmem:[#allocation3 + $0x60] sm:$0xff] %vm916_vm12, %v2288_v33  ;;  %4206 = vrot.lane.b32.xlu0 %v4205_v41, %s4341_s23  ;;  %4201 = vrot.lane.b32.xlu1 %v4200_v26, %s4342_s24  ;;  %v2335_v8 = vadd.f32 %v5291_v3, %v2314_v49 }
 0x3a8   :  { %v2289_v10 = vadd.f32 %v2275_v34, %v5123_v37  ;;  %v2315_v59 = vld [vmem:[#allocation3 + $0x58] sm:$0xff]  ;;  %v2334_v37 = vadd.f32 %v5291_v3, %v2313_v58 }
 0x3a9   :  { %v5422_v35 = vmax.f32 %v2335_v8, 0.0  ;;  %v2336_v60 = vadd.f32 %v5291_v3, %v2315_v59 }
 0x3aa   :  { %2303 = vst.msk [vmem:[#allocation3 + $0x68] sm:$0x3f] %vm930_vm13, %v2289_v10  ;;  %v2348_v17 = vmax.f32 %v2334_v37, 0.0 }
 0x3ab   :  { %4211 = vrot.lane.b32.xlu1 %v4210_v13, %s4343_s27  ;;  %v2537_v27 = vrot.slane %v5422_v35, 4  ;;  %v2533_v51 = vrot.slane %v5422_v35, 2  ;;  %v2541_v61 = vrot.slane %v5422_v35, 6  ;;  %v2350_v4 = vmax.f32 %v2336_v60, 0.0 }
 0x3ac   :  { %v2524_v18 = vrot.slane %v2348_v17, 4  ;;  %v2520_v63 = vrot.slane %v2348_v17, 2  ;;  %v2528_v62 = vrot.slane %v2348_v17, 6 }
 0x3ad   :  { %v4220_v21 = vpack.i.bf16 %v2508_v11, %v2537_v27  ;;  %v4215_v40 = vpack.i.bf16 %v2504_v53, %v2533_v51  ;;  %v4225_v54 = vpack.i.bf16 %v2512_v7, %v2541_v61  ;;  %v4230_v38 = vpack.i.bf16 %v2348_v17, %v2350_v4 }
 0x3ae   :  { %v2316_v47 = vld [vmem:[#allocation3 + $0x60] sm:$0xff]  ;;  %v2553_v28 = vrot.slane %v2350_v4, 4  ;;  %v2549_v14 = vrot.slane %v2350_v4, 2  ;;  %v2557_v15 = vrot.slane %v2350_v4, 6 }
 0x3af   :  { %4221 = vrot.lane.b32.xlu1 %v4220_v21, %s4339_s0  ;;  %4216 = vrot.lane.b32.xlu0 %v4215_v40, %s4338_s4  ;;  %v2337_v39 = vadd.f32 %v5291_v3, %v2316_v47 }
 0x3b0   :  { %v4240_v43 = vpack.i.bf16 %v2524_v18, %v2553_v28  ;;  %v4235_v20 = vpack.i.bf16 %v2520_v63, %v2549_v14  ;;  %v4245_v52 = vpack.i.bf16 %v2528_v62, %v2557_v15  ;;  %v4309_v62 = vld [vmem:[%s5626_s6 + $0x108] sm:$0xff]  }
 0x3b1   :  { %v5438_v22 = vmax.f32 %v2337_v39, 0.0  ;;  %v2317_v23 = vld [vmem:[#allocation3 + $0x68] sm:$0x3f] }
 0x3b2   :  { %v2338_v1 = vadd.f32 %v5291_v3, %v2317_v23  ;;  %v4308_v39 = vld [vmem:[%s5626_s6 + $0x148] sm:$0xff]  }
 0x3b3   :  { %4226 = vrot.lane.b32.xlu0 %v4225_v54, %s4337_s12  ;;  %4231 = vrot.lane.b32.xlu1 %v4230_v38, %s4340_s3  ;;  %v2576_v12 = vrot.slane %v5438_v22, 2  ;;  %v2580_v6 = vrot.slane %v5438_v22, 4  ;;  %v2584_v24 = vrot.slane %v5438_v22, 6  ;;  %v4306_v38 = vld [vmem:[%s5626_s6 + $0x100] sm:$0xff]  }
 0x3b4   :  { %v2352_v19 = vmax.f32 %v2338_v1, 0.0  ;;  %v4311_v1 = vld [vmem:[%s5626_s6 + $0x150] sm:$0xff]  }
 0x3b6   :  { %v2592_v46 = vrot.slane %v2352_v19, 2  ;;  %v2596_v57 = vrot.slane %v2352_v19, 4 }
 0x3b7   :  { %4241 = vrot.lane.b32.xlu1 %v4240_v43, %s4341_s23  ;;  %4236 = vrot.lane.b32.xlu0 %v4235_v20, %s4342_s24 }
 0x3bb   :  { %4246 = vrot.lane.b32.xlu0 %v4245_v52, %s4343_s27  ;;  %2577 = vrot.lane.b32.xlu1 %v2576_v12, %s4338_s4 }
 0x3bf   :  { %2581 = vrot.lane.b32.xlu0 %v2580_v6, %s4339_s0  ;;  %2585 = vrot.lane.b32.xlu1 %v2584_v24, %s4337_s12 }
 0x3c3   :  { %2589 = vrot.lane.b32.xlu0 %v2352_v19, %s4340_s3  ;;  %2593 = vrot.lane.b32.xlu1 %v2592_v46, %s4342_s24 }
 0x3c7   :  { %2597 = vrot.lane.b32.xlu0 %v2596_v57, %s4341_s23 }
 0x401   :  { %v4157_v3 = vpop.permute.xlu1 %4156  ;;  %v4147_v5 = vpop.permute.xlu0 %4146 }
 0x402   :  { %v4149_v16 = vunpack.i.h.bf16 %v4147_v5  ;;  %v4148_v30 = vunpack.i.l.bf16 %v4147_v5  ;;  %v4159_v44 = vunpack.i.h.bf16 %v4157_v3  ;;  %v4158_v45 = vunpack.i.l.bf16 %v4157_v3  ;;  %v4313_v5 = vld [vmem:[%s5626_s6 + $0x110] sm:$0xff]  }
 0x404   :  { %v2411_v29 = vsel %vm916_vm12, %v5303_v2, %v4149_v16  ;;  %v2424_v33 = vsel %vm916_vm12, %v5310_v36, %v4148_v30 }
 0x405   :  { %v4152_v25 = vpop.permute.xlu0 %4151  ;;  %v4162_v32 = vpop.permute.xlu1 %4161 }
 0x406   :  { %v4154_v48 = vunpack.i.h.bf16 %v4152_v25  ;;  %v4153_v9 = vunpack.i.l.bf16 %v4152_v25  ;;  %v4164_v42 = vunpack.i.h.bf16 %v4162_v32  ;;  %v4163_v34 = vunpack.i.l.bf16 %v4162_v32  ;;  %v4314_v25 = vld [vmem:[%s5626_s6 + $0x158] sm:$0xff]  }
 0x408   :  { %v2413_v41 = vsel %vm2412_vm14, %v2411_v29, %v4154_v48  ;;  %v2425_v26 = vsel %vm2412_vm14, %v2424_v33, %v4153_v9 }
 0x409   :  { %v2415_v49 = vsel %vm2414_vm15, %v2413_v41, %v4159_v44  ;;  %v2426_v10 = vsel %vm2414_vm15, %v2425_v26, %v4158_v45  ;;  %v4172_v31 = vpop.permute.xlu1 %4171  ;;  %v4167_v8 = vpop.permute.xlu0 %4166  ;;  %v4315_v41 = vld [vmem:[%s5626_s6 + $0x118] sm:$0xff]  }
 0x40a   :  { %v2417_v58 = vsel %vm2416_vm0, %v2415_v49, %v4164_v42  ;;  %v2427_v59 = vsel %vm2416_vm0, %v2426_v10, %v4163_v34  ;;  %v4174_v2 = vunpack.i.h.bf16 %v4172_v31  ;;  %v4173_v13 = vunpack.i.l.bf16 %v4172_v31  ;;  %v4316_v34 = vld [vmem:[%s5626_s6 + $0x160] sm:$0xff]  }
 0x40b   :  { %v4169_v36 = vunpack.i.h.bf16 %v4167_v8  ;;  %v4168_v60 = vunpack.i.l.bf16 %v4167_v8 }
 0x40d   :  { %v2419_v37 = vsel %vm2418_vm1, %v2417_v58, %v4169_v36  ;;  %v2428_v11 = vsel %vm2418_vm1, %v2427_v59, %v4168_v60  ;;  %v4177_v27 = vpop.permute.xlu0 %4176  ;;  %v4317_v36 = vld [vmem:[%s5626_s6 + $0x180] sm:$0xff]  }
 0x40e   :  { %v4179_v53 = vunpack.i.h.bf16 %v4177_v27  ;;  %v4178_v51 = vunpack.i.l.bf16 %v4177_v27  ;;  %v2421_v61 = vsel %vm2420_vm3, %v2419_v37, %v4174_v2  ;;  %v2429_v21 = vsel %vm2420_vm3, %v2428_v11, %v4173_v13  ;;  %v4318_v60 = vld [vmem:[%s5626_s6 + $0x120] sm:$0xff]   ;;  %v4319_v27 = vld [vmem:[%s5626_s6 + $0x168] sm:$0xff]  }
 0x410   :  { %v2423_v40 = vsel %vm2422_vm5, %v2421_v61, %v4179_v53  ;;  %v2430_v4 = vsel %vm2422_vm5, %v2429_v21, %v4178_v51 }
 0x411   :  { %v2606_v7 = vpack.c.bf16 %v2423_v40, %v2423_v40  ;;  %v4187_v47 = vpop.permute.xlu0 %4186  ;;  %v4182_v17 = vpop.permute.xlu1 %4181  ;;  %v2607_v54 = vpack.c.bf16 %v2430_v4, %v2430_v4 }
 0x412   :  { %v4184_v28 = vunpack.i.h.bf16 %v4182_v17  ;;  %v4183_v14 = vunpack.i.l.bf16 %v4182_v17  ;;  %v4189_v18 = vunpack.i.h.bf16 %v4187_v47  ;;  %v4188_v63 = vunpack.i.l.bf16 %v4187_v47  ;;  %v4321_v47 = vld [vmem:[%s5626_s6 + $0x128] sm:$0xff]  }
 0x413   :  { %3095 = vmatprep.mubr.bf16.mxu1 %v2607_v54 }
 0x414   :  { %v2489_v43 = vsel %vm916_vm12, %v5372_v50, %v4184_v28  ;;  %v2496_v20 = vsel %vm916_vm12, %v5381_v56, %v4183_v14  ;;  %3096 = vmatmul.mubr.bf16.vlgmr.msra.gmra.mrb[172].mxu1 %v2606_v7  ;;  %v4320_v7 = vld [vmem:[%s5626_s6 + $0x188] sm:$0xff]  }
 0x415   :  { %3668 = vmatpush3.bf16.msra.mxu1 %v4306_v38  ;;  %v4192_v15 = vpop.permute.xlu1 %4191  ;;  %v4197_v23 = vpop.permute.xlu0 %4196  ;;  %v2490_v50 = vsel %vm2412_vm14, %v2489_v43, %v4189_v18  ;;  %v2497_v6 = vsel %vm2412_vm14, %v2496_v20, %v4188_v63  ;;  %v4323_v20 = vld [vmem:[%s5626_s6 + $0x190] sm:$0xff]  }
 0x416   :  { %v4194_v52 = vunpack.i.h.bf16 %v4192_v15  ;;  %v4193_v12 = vunpack.i.l.bf16 %v4192_v15  ;;  %3669 = vmatprep.subr.bf16.mxu1 %v4308_v39  ;;  %v4199_v56 = vunpack.i.h.bf16 %v4197_v23  ;;  %v4198_v24 = vunpack.i.l.bf16 %v4197_v23  ;;  %v4324_v15 = vld [vmem:[%s5626_s6 + $0x130] sm:$0xff]  }
 0x418   :  { %v2491_v19 = vsel %vm2414_vm15, %v2490_v50, %v4194_v52  ;;  %v2498_v46 = vsel %vm2414_vm15, %v2497_v6, %v4193_v12  ;;  %v4325_v52 = vld [vmem:[%s5626_s6 + $0x178] sm:$0xff]  }
 0x419   :  { %3670 = vmatpush3.bf16.msra.mxu1 %v4309_v62  ;;  %v4207_v57 = vpop.permute.xlu0 %4206  ;;  %v4202_v3 = vpop.permute.xlu1 %4201  ;;  %v2492_v32 = vsel %vm2416_vm0, %v2491_v19, %v4199_v56  ;;  %v2499_v48 = vsel %vm2416_vm0, %v2498_v46, %v4198_v24 }
 0x41a   :  { %v4204_v16 = vunpack.i.h.bf16 %v4202_v3  ;;  %v4203_v30 = vunpack.i.l.bf16 %v4202_v3  ;;  %3671 = vmatprep.subr.bf16.mxu1 %v4311_v1  ;;  %v4209_v9 = vunpack.i.h.bf16 %v4207_v57  ;;  %v4208_v44 = vunpack.i.l.bf16 %v4207_v57  ;;  %v4326_v57 = vld [vmem:[%s5626_s6 + $0x198] sm:$0xff]  }
 0x41b   :  { %v4327_v3 = vld [vmem:[%s5626_s6 + $0x138] sm:$0xff]  }
 0x41c   :  { %v2493_v45 = vsel %vm2418_vm1, %v2492_v32, %v4204_v16  ;;  %v2500_v29 = vsel %vm2418_vm1, %v2499_v48, %v4203_v30 }
 0x41d   :  { %3672 = vmatpush3.bf16.msra.mxu1 %v4313_v5  ;;  %v4212_v33 = vpop.permute.xlu1 %4211  ;;  %v2494_v49 = vsel %vm2420_vm3, %v2493_v45, %v4209_v9  ;;  %v2501_v10 = vsel %vm2420_vm3, %v2500_v29, %v4208_v44 }
 0x41e   :  { %v4214_v26 = vunpack.i.h.bf16 %v4212_v33  ;;  %v4213_v42 = vunpack.i.l.bf16 %v4212_v33  ;;  %3673 = vmatprep.subr.bf16.mxu1 %v4314_v25  ;;  %v4328_v33 = vld [vmem:[%s5626_s6 + $0x1a0] sm:$0xff]  }
 0x420   :  { %v2495_v31 = vsel %vm2422_vm5, %v2494_v49, %v4214_v26  ;;  %v2502_v8 = vsel %vm2422_vm5, %v2501_v10, %v4213_v42 }
 0x421   :  { %v2608_v58 = vpack.c.bf16 %v2495_v31, %v2495_v31  ;;  %3674 = vmatpush3.bf16.msra.mxu1 %v4315_v41  ;;  %v4222_v59 = vpop.permute.xlu1 %4221  ;;  %v4217_v2 = vpop.permute.xlu0 %4216  ;;  %v2609_v13 = vpack.c.bf16 %v2502_v8, %v2502_v8  ;;  %v4330_v8 = vld [vmem:[%s5626_s6 + $0x1b0] sm:$0xff]  }
 0x422   :  { %v4219_v37 = vunpack.i.h.bf16 %v4217_v2  ;;  %v4218_v11 = vunpack.i.l.bf16 %v4217_v2  ;;  %3675 = vmatprep.subr.bf16.mxu1 %v4316_v34  ;;  %v4224_v53 = vunpack.i.h.bf16 %v4222_v59  ;;  %v4223_v51 = vunpack.i.l.bf16 %v4222_v59  ;;  %v4329_v34 = vld [vmem:[%s5626_s6 + $0x1a8] sm:$0xff]  }
 0x423   :  { %3135 = vmatprep.mubr.bf16.mxu0 %v2609_v13  ;;  %v3225_v13 = vld [vmem:[%s5628_s8] sm:$0xff] }
 0x424   :  { %v2561_v61 = vsel %vm916_vm12, %v5419_v55, %v4219_v37  ;;  %v2568_v21 = vsel %vm916_vm12, %v5422_v35, %v4218_v11  ;;  %3136 = vmatmul.mubr.bf16.vlgmr.msra.gmra.mrb[180].mxu0 %v2608_v58  ;;  %v4322_v55 = vld [vmem:[%s5626_s6 + $0x170] sm:$0xff]   ;;  %v3228_v11 = vld [vmem:[%s5628_s8 + $0x18] sm:$0xff] }
 0x425   :  { %4079 = vmatpush3.bf16.msra.mxu0 %v4317_v36  ;;  %3676 = vmatpush3.bf16.msra.mxu1 %v4318_v60  ;;  %v4227_v40 = vpop.permute.xlu0 %4226  ;;  %v4232_v4 = vpop.permute.xlu1 %4231  ;;  %v2562_v35 = vsel %vm2412_vm14, %v2561_v61, %v4224_v53  ;;  %v2569_v38 = vsel %vm2412_vm14, %v2568_v21, %v4223_v51  ;;  %v3226_v36 = vld [vmem:[%s5628_s8 + $0x8] sm:$0xff]  ;;  %v4344_v60 = vmov 0.0|0.0   ;;  %v3229_v53 = vld [vmem:[%s5628_s8 + $0x20] sm:$0xff]  ;;  %v3231_v21 = vld [vmem:[%s5628_s8 + $0x30] sm:$0xff] }
 0x426   :  { %v4229_v17 = vunpack.i.h.bf16 %v4227_v40  ;;  %v4228_v54 = vunpack.i.l.bf16 %v4227_v40  ;;  %4080 = vmatprep.subr.bf16.mxu0 %v4333_v0  ;;  %3677 = vmatprep.subr.bf16.mxu1 %v4319_v27  ;;  %v4234_v28 = vunpack.i.h.bf16 %v4232_v4  ;;  %v4233_v14 = vunpack.i.l.bf16 %v4232_v4  ;;  %v3230_v51 = vld [vmem:[%s5628_s8 + $0x28] sm:$0xff]  ;;  %v3232_v40 = vld [vmem:[%s5628_s8 + $0x38] sm:$0xff] }
 0x427   :  { %4092 = vmatprep.mubr.msk.bf16.mxu0 %vm4335_vm2, %v4333_v0  ;;  %v4116_v37 = vpack.c.bf16 %v3226_v36, %v3225_v13  ;;  %v4122_v61 = vpack.c.bf16 %v3230_v51, %v3229_v53  ;;  %v4125_v4 = vpack.c.bf16 %v3232_v40, %v3231_v21 }
 0x428   :  { %v2563_v39 = vsel %vm2414_vm15, %v2562_v35, %v4229_v17  ;;  %v2570_v18 = vsel %vm2414_vm15, %v2569_v38, %v4228_v54  ;;  %v3467_v38 = vld [vmem:[%s5630_s7] ss:$0 sm:$0xff]  ;;  %s4347_s7 = smov 6  }
 0x429   :  { %4081 = vmatpush3.bf16.msra.mxu0 %v4320_v7  ;;  %3678 = vmatpush3.bf16.msra.mxu1 %v4321_v47  ;;  %v4242_v63 = vpop.permute.xlu1 %4241  ;;  %v4237_v43 = vpop.permute.xlu0 %4236  ;;  %v2564_v12 = vsel %vm2416_vm0, %v2563_v39, %v4234_v28  ;;  %v2571_v1 = vsel %vm2416_vm0, %v2570_v18, %v4233_v14  ;;  %v3224_v7 = vld [vmem:[%s5629_s1] sm:$0x3]  ;;  %s4346_s1 = smov 2  }
 0x42a   :  { %v4239_v23 = vunpack.i.h.bf16 %v4237_v43  ;;  %v4238_v62 = vunpack.i.l.bf16 %v4237_v43  ;;  %4082 = vmatprep.subr.bf16.mxu0 %v4333_v0  ;;  %3679 = vmatprep.subr.bf16.mxu1 %v4322_v55  ;;  %v4244_v50 = vunpack.i.h.bf16 %v4242_v63  ;;  %v4243_v6 = vunpack.i.l.bf16 %v4242_v63 }
 0x42b   :  { %3311 = vrot.lane.b32.xlu1 %v3224_v7, %s4345_s18 }
 0x42c   :  { %v2565_v56 = vsel %vm2418_vm1, %v2564_v12, %v4239_v23  ;;  %v2572_v24 = vsel %vm2418_vm1, %v2571_v1, %v4238_v62 }
 0x42d   :  { %4083 = vmatpush3.bf16.msra.mxu0 %v4323_v20  ;;  %3680 = vmatpush3.bf16.msra.mxu1 %v4324_v15  ;;  %v4247_v19 = vpop.permute.xlu0 %4246  ;;  %v2578_v46 = vpop.permute.xlu1 %2577  ;;  %v2566_v30 = vsel %vm2420_vm3, %v2565_v56, %v4244_v50  ;;  %v2573_v25 = vsel %vm2420_vm3, %v2572_v24, %v4243_v6 }
 0x42e   :  { %v4249_v5 = vunpack.i.h.bf16 %v4247_v19  ;;  %v4248_v16 = vunpack.i.l.bf16 %v4247_v19  ;;  %4084 = vmatprep.subr.bf16.mxu0 %v4333_v0  ;;  %3681 = vmatprep.subr.bf16.mxu1 %v4325_v52  ;;  %v2600_v41 = vsel %vm916_vm12, %v5438_v22, %v2578_v46 }
 0x430   :  { %v2567_v32 = vsel %vm2422_vm5, %v2566_v30, %v4249_v5  ;;  %v2574_v48 = vsel %vm2422_vm5, %v2573_v25, %v4248_v16 }
 0x431   :  { %v2610_v9 = vpack.c.bf16 %v2567_v32, %v2567_v32  ;;  %4085 = vmatpush3.bf16.msra.mxu0 %v4326_v57  ;;  %3682 = vmatpush3.bf16.msra.mxu1 %v4327_v3  ;;  %v2582_v44 = vpop.permute.xlu0 %2581  ;;  %v2586_v45 = vpop.permute.xlu1 %2585  ;;  %v2611_v29 = vpack.c.bf16 %v2574_v48, %v2574_v48 }
 0x432   :  { %4086 = vmatprep.subr.bf16.mxu0 %v4333_v0  ;;  %v2601_v26 = vsel %vm2412_vm14, %v2600_v41, %v2582_v44  ;;  %4115 = vmatprep.subr.bf16.mxu1 %v4344_v60 }
 0x433   :  { %3175 = vmatprep.mubr.bf16.mxu1 %v2611_v29  ;;  %v2602_v49 = vsel %vm2414_vm15, %v2601_v26, %v2586_v45 }
 0x434   :  { %3176 = vmatmul.mubr.bf16.vlgmr.msra.gmra.mrb[176].mxu1 %v2610_v9 }
 0x435   :  { %4087 = vmatpush3.bf16.msra.mxu0 %v4328_v33  ;;  %v2590_v42 = vpop.permute.xlu0 %2589  ;;  %4112 = vmatprep.mubr.msk.f32.mxu1 %vm4335_vm2, %v4333_v0  ;;  %v2594_v10 = vpop.permute.xlu1 %2593  ;;  %vm3332_vm2 = vcmask 15360  }
 0x436   :  { %4088 = vmatprep.subr.bf16.mxu0 %v4333_v0  ;;  %v2603_v22 = vsel %vm2416_vm0, %v2602_v49, %v2590_v42  ;;  %4117 = vmatpush3.bf16.msra.mxu1 %v4116_v37 }
 0x437   :  { %v2604_v58 = vsel %vm2418_vm1, %v2603_v22, %v2594_v10  ;;  %4118 = vmatprep.subr.bf16.mxu1 %v4344_v60 }
 0x439   :  { %4089 = vmatpush3.bf16.msra.mxu0 %v4329_v34  ;;  %v2598_v31 = vpop.permute.xlu0 %2597 }
 0x43a   :  { %4090 = vmatprep.subr.bf16.mxu0 %v4333_v0  ;;  %v2605_v59 = vsel %vm2420_vm3, %v2604_v58, %v2598_v31  ;;  %v3227_v0 = vld [vmem:[%s5628_s8 + $0x10] sm:$0xff]  ;;  %s4348_s8 = smov 4  }
 0x43b   :  { %v2612_v2 = vpack.c.bf16 %v2605_v59, %v2605_v59  ;;  %v4119_v27 = vpack.c.bf16 %v3228_v11, %v3227_v0 }
 0x43d   :  { %4091 = vmatpush3.bf16.msra.mxu0 %v4330_v8  ;;  %4120 = vmatpush3.bf16.msra.mxu1 %v4119_v27 }
 0x43e   :  { %4121 = vmatprep.subr.bf16.mxu1 %v4344_v60 }
 0x440   :  { %4093 = vmatmul.mubr.msk.bf16.vlgmr.msra.gmra.mrb[184].mxu0 %vm2422_vm5, %v2612_v2 }
 0x441   :  { %4123 = vmatpush3.bf16.msra.mxu1 %v4122_v61 }
 0x442   :  { %4124 = vmatprep.subr.bf16.mxu1 %v4344_v60 }
 0x445   :  { %4126 = vmatpush3.bf16.msra.mxu1 %v4125_v4 }
 0x49d   :  { %v3312_v25 = vpop.permute.xlu1 %3311 }
 0x4e7   :  { %v3639_v47 = vpop.f32.mrb[172].mxu1 }
 0x4e8   :  { %v3640_v17 = vpop.f32.mrb[173].mxu1 }
 0x4e9   :  { %v3641_v54 = vadd.f32 %v3640_v17, %v3639_v47  ;;  %v3642_v55 = vpop.f32.mrb[174].mxu1 }
 0x4ea   :  { %v3643_v35 = vpop.f32.mrb[175].mxu1 }
 0x4eb   :  { %v3098_v39 = vadd.f32 %v3641_v54, %v3467_v38 }
 0x4f7   :  { %v3661_v28 = vpop.f32.mrb[180].mxu0 }
 0x4f8   :  { %v3662_v14 = vpop.f32.mrb[181].mxu0 }
 0x4f9   :  { %v3663_v18 = vadd.f32 %v3662_v14, %v3661_v28  ;;  %v3664_v63 = vpop.f32.mrb[182].mxu0 }
 0x4fa   :  { %v3665_v43 = vpop.f32.mrb[183].mxu0 }
 0x4fb   :  { %v3138_v20 = vadd.f32 %v3663_v18, %v3098_v39 }
 0x507   :  { %v3683_v15 = vpop.f32.mrb[176].mxu1 }
 0x508   :  { %v3684_v23 = vpop.f32.mrb[177].mxu1 }
 0x509   :  { %v3685_v62 = vadd.f32 %v3684_v23, %v3683_v15  ;;  %v3686_v52 = vpop.f32.mrb[178].mxu1 }
 0x50a   :  { %v3687_v12 = vpop.f32.mrb[179].mxu1 }
 0x50b   :  { %v3178_v1 = vadd.f32 %v3685_v62, %v3138_v20 }
 0x513   :  { %v3217_v50 = vpop.f32.mrb[184].mxu0 }
 0x514   :  { %v3218_v6 = vadd.f32 %v3217_v50, %v3178_v1  ;;  %v4094_v56 = vpop.f32.mrb[185].mxu0 }
 0x515   :  { %v3220_v24 = vpop.f32.mrb[186].mxu0 }
 0x516   :  { %v3223_v19 = vmax.f32 %v3218_v6, 0.0  ;;  %v4095_v46 = vpop.f32.mrb[187].mxu0 }
 0x518   :  { %4113 = vmatmul.mubr.msk.f32.vlgmr.msra.gmra.mrb[180].mxu1 %vm2416_vm0, %v3223_v19 }
 0x5eb   :  { %v3302_v57 = vpop.f32.mrb[180].mxu1 }
 0x5ec   :  { %v3303_v3 = vadd.f32 %v3302_v57, %v3224_v7  ;;  %v4114_v5 = vpop.f32.mrb[181].mxu1 }
 0x5ee   :  { %v3306_v16 = vmul.f32 0.5, %v3303_v3  ;;  %3321 = vrot.lane.b32.xlu1 %v3303_v3, %s4346_s1 }
 0x5f0   :  { %v3307_v30 = vmul.f32 1.442695, %v3306_v16 }
 0x5f2   :  { %4331 = vpow2.f32 %v3307_v30 }
 0x5fc   :  { %v4332_v32 = vpop.eup %4331 }
 0x5fd   :  { %v3314_v48 = vmul.f32 %v4332_v32, %v3312_v25  ;;  %v3309_v9 = vmul.f32 %v4332_v32, %v4332_v32 }
 0x5ff   :  { %3316 = vrot.lane.b32.xlu0 %v3314_v48, %s4345_s18  ;;  %3329 = vrot.lane.b32.xlu1 %v3309_v9, %s4347_s7 }
 0x603   :  { %3325 = vrot.lane.b32.xlu0 %v4332_v32, %s4348_s8 }
 0x660   :  { %v3322_v45 = vpop.permute.xlu1 %3321 }
 0x671   :  { %v3317_v44 = vpop.permute.xlu0 %3316  ;;  %v3330_v26 = vpop.permute.xlu1 %3329 }
 0x672   :  { %v3319_v29 = vadd.f32 %v3317_v44, %v3303_v3 }
 0x674   :  { %v3333_v33 = vsel %vm3332_vm2, %v3319_v29, %v3322_v45 }
 0x675   :  { %v3326_v41 = vpop.permute.xlu0 %3325 }
 0x676   :  { %v3335_v42 = vsel %vm3334_vm6, %v3333_v33, %v3326_v41 }
 0x677   :  { %v3336_v34 = vsel %vm33_vm4, %v3335_v42, %v3330_v26 }
 0x678   :  { %3338 = vst.msk [vmem:[%s5631_s9] sm:$0x3] %vm3337_vm7, %v3336_v34 }

</bundles_post_ra>
